<compile_context>
chip_gen: v5e
topology: v5e:2x2
jax: 0.10.0
libtpu: 0.0.40
codegen_flags: <defaults>
</compile_context>

<pallas_src>
import functools

import jax
import jax.numpy as jnp
from jax.experimental import pallas as pl
from jax.experimental.pallas import tpu as pltpu


def _ranknet_kernel(n_linear, apply_sigmoid, *refs):
    """refs = (xi, xj, w0, b0, ..., w_{n_linear-1}, b_{n_linear-1},
               w_out, b_out, out)"""
    xi_ref, xj_ref = refs[0], refs[1]
    n_param = 2 * n_linear + 2
    param_refs = refs[2:2 + n_param]
    out_ref = refs[2 + n_param]

    tile = xi_ref.shape[0]

    # f32 tiles arrive straight from HBM; cast to bf16 on the VPU, then fuse
    # the pair along the sublane (batch) axis so every Linear layer is ONE
    # MXU matmul with M = 2*tile. The staging copy is bf16 (half-size).
    xi = xi_ref[...].astype(jnp.bfloat16)
    xj = xj_ref[...].astype(jnp.bfloat16)
    h = jnp.concatenate([xi, xj], axis=0)            # (2T, D) bf16

    for layer in range(n_linear):
        w = param_refs[2 * layer][...]                # (in, hidden)  bf16
        b = param_refs[2 * layer + 1][...]            # (1, hidden)   f32
        acc = jnp.dot(h, w, preferred_element_type=jnp.float32) + b
        h = jnp.maximum(acc, 0.0).astype(w.dtype)     # bf16 for next MXU pass

    w_out = param_refs[-2][...]                       # (1, hidden)   bf16
    b_out = param_refs[-1][...]                       # (1, 1)        f32
    # Head: (1, hidden) . (2T, hidden)^T -> (1, 2T): scores land lane-dense.
    s = jax.lax.dot_general(
        w_out, h, (((1,), (1,)), ((), ())),
        preferred_element_type=jnp.float32) + b_out   # (1, 2T) f32

    si = s[:, :tile]                                  # (1, T)
    sj = s[:, tile:]                                  # (1, T)
    d = si - sj
    if apply_sigmoid:
        d = jax.nn.sigmoid(d)

    # One full-width lane-dense store of the packed (3, T) block.
    out_ref[...] = jnp.concatenate([si, sj, d], axis=0)


def _round_up(x, m):
    return ((x + m - 1) // m) * m


def _default_batch_tile(B, D):
    """Pick a batch tile: multiple of 128 (or == B), grid >= 2 when possible
    (v7x has two TensorCores), as large as fits the scoped-VMEM budget."""
    if B <= 128:
        return B
    # Double-buffered f32 x_i/x_j tiles cost ~16*T*D bytes; keep <= ~8 MiB.
    vmem_cap = max(128, (524288 // max(D, 1)) // 128 * 128)
    half = _round_up(pl.cdiv(B, 2), 128)
    tile = min(1024, vmem_cap, half)
    return B if tile >= B else tile


def prepare_ranknet_params(params):
    """One-time cast of weights to bf16 (biases stay f32). Do this once and
    reuse the result across forward calls."""
    n_linear = (len(params) - 2) // 2
    kparams = []
    for layer in range(n_linear):
        kparams.append(params[2 * layer].astype(jnp.bfloat16))      # weight
        kparams.append(params[2 * layer + 1].astype(jnp.float32))   # bias
    kparams.append(params[-2].astype(jnp.bfloat16))                 # w_out
    kparams.append(params[-1].astype(jnp.float32))                  # b_out
    return kparams


def ranknet_forward(x_i, x_j, kparams, *, sigmoid=False, batch_tile=None):
    """kparams: output of prepare_ranknet_params. Hidden weights (in, out),
    biases (1, out), w_out (1, hidden), b_out (1, 1).
    Returns (score_i, score_j, out) each of shape (B, 1)."""
    assert x_i.shape == x_j.shape
    B, D = x_i.shape
    if batch_tile is None:
        batch_tile = _default_batch_tile(B, D)
    assert batch_tile == B or batch_tile % 128 == 0, (
        "batch_tile must equal B or be a multiple of 128")
    n_linear = (len(kparams) - 2) // 2   # number of Linear+ReLU layers

    kernel = functools.partial(_ranknet_kernel, n_linear, sigmoid)

    x_spec = pl.BlockSpec((batch_tile, D), lambda i: (i, 0))
    param_specs = [pl.BlockSpec(p.shape, lambda i: (0, 0)) for p in kparams]
    out_spec = pl.BlockSpec((3, batch_tile), lambda i: (0, i))

    grid = (pl.cdiv(B, batch_tile),)

    packed = pl.pallas_call(
        kernel,
        out_shape=jax.ShapeDtypeStruct((3, B), jnp.float32),
        grid_spec=pltpu.PrefetchScalarGridSpec(
            num_scalar_prefetch=0,
            grid=grid,
            in_specs=[x_spec, x_spec] + param_specs,
            out_specs=out_spec,
        ),
        compiler_params=pltpu.CompilerParams(
            dimension_semantics=("parallel",)),
    )(x_i.astype(jnp.float32), x_j.astype(jnp.float32), *kparams)

    score_i = packed[0].reshape(B, 1)
    score_j = packed[1].reshape(B, 1)
    out = packed[2].reshape(B, 1)
    return score_i, score_j, out


def init_ranknet_params(key, input_size, hidden_size, n_layers):
    """Deterministic synthetic parameters (same shapes as the PyTorch module,
    weights stored transposed as (in, out))."""
    params = []
    dims = [input_size] + [hidden_size] * (n_layers + 1)
    for layer in range(n_layers + 1):
        key, kw, kb = jax.random.split(key, 3)
        fan_in, fan_out = dims[layer], dims[layer + 1]
        scale = 1.0 / jnp.sqrt(fan_in)
        params.append(jax.random.uniform(kw, (fan_in, fan_out), jnp.float32,
                                         -scale, scale))
        params.append(jax.random.uniform(kb, (1, fan_out), jnp.float32,
                                         -scale, scale))
    key, kw, kb = jax.random.split(key, 3)
    scale = 1.0 / jnp.sqrt(hidden_size)
    params.append(jax.random.uniform(kw, (1, hidden_size), jnp.float32,
                                     -scale, scale))          # w_out (row vector)
    params.append(jax.random.uniform(kb, (1, 1), jnp.float32,
                                     -scale, scale))          # b_out
    return params


def ranknet_reference(x_i, x_j, params, sigmoid=False):
    """Plain-JAX reference with the same bf16-matmul / f32-accumulate numerics."""
    n_linear = (len(params) - 2) // 2

    def encode(x):
        h = x.astype(jnp.bfloat16)
        for layer in range(n_linear):
            w = params[2 * layer].astype(jnp.bfloat16)
            b = params[2 * layer + 1]
            acc = jnp.dot(h, w, preferred_element_type=jnp.float32) + b
            h = jnp.maximum(acc, 0.0).astype(jnp.bfloat16)
        w_out = params[-2].astype(jnp.bfloat16)
        b_out = params[-1]
        s = jnp.dot(h, w_out.T, preferred_element_type=jnp.float32) + b_out
        return s  # (B, 1) f32

    si, sj = encode(x_i), encode(x_j)
    out = si - sj
    if sigmoid:
        out = jax.nn.sigmoid(out)
    return si, sj, out


if __name__ == "__main__":
    # Small shapes consistent with RankNet(input_size, hidden_size, n_layers=3);
    # batch chosen so the default tiling gives a grid of 2 (pipelining /
    # megacore exercised).
    batch, input_size, hidden_size, n_layers = 512, 256, 128, 3

    root = jax.random.PRNGKey(0)
    k_xi, k_xj, k_params = jax.random.split(root, 3)
    x_i = jax.random.normal(k_xi, (batch, input_size), jnp.float32)
    x_j = jax.random.normal(k_xj, (batch, input_size), jnp.float32)
    params = init_ranknet_params(k_params, input_size, hidden_size, n_layers)
    kparams = prepare_ranknet_params(params)   # bf16 weight cast done ONCE

    # Plain difference path.
    score_i, score_j, out = ranknet_forward(x_i, x_j, kparams, sigmoid=False)
    jax.block_until_ready((score_i, score_j, out))
    ref_si, ref_sj, ref_out = ranknet_reference(x_i, x_j, params, sigmoid=False)
    assert jnp.allclose(score_i, ref_si, atol=1e-2, rtol=1e-2)
    assert jnp.allclose(score_j, ref_sj, atol=1e-2, rtol=1e-2)
    assert jnp.allclose(out, ref_out, atol=1e-2, rtol=1e-2)

    # Sigmoid path.
    _, _, out_sig = ranknet_forward(x_i, x_j, kparams, sigmoid=True)
    jax.block_until_ready(out_sig)
    _, _, ref_out_sig = ranknet_reference(x_i, x_j, params, sigmoid=True)
    assert jnp.allclose(out_sig, ref_out_sig, atol=1e-2, rtol=1e-2)

    print("KERNEL_OK")
</pallas_src>

<mosaic_0001>
module attributes {stable_mosaic.version = 11 : i64} {
  func.func @_ranknet_kernel(%arg0: i32, %arg1: memref<256x256xf32, #tpu.memory_space<vmem>>, %arg2: memref<256x256xf32, #tpu.memory_space<vmem>>, %arg3: memref<256x128xbf16, #tpu.memory_space<vmem>>, %arg4: memref<1x128xf32, #tpu.memory_space<vmem>>, %arg5: memref<128x128xbf16, #tpu.memory_space<vmem>>, %arg6: memref<1x128xf32, #tpu.memory_space<vmem>>, %arg7: memref<128x128xbf16, #tpu.memory_space<vmem>>, %arg8: memref<1x128xf32, #tpu.memory_space<vmem>>, %arg9: memref<128x128xbf16, #tpu.memory_space<vmem>>, %arg10: memref<1x128xf32, #tpu.memory_space<vmem>>, %arg11: memref<1x128xbf16, #tpu.memory_space<vmem>>, %arg12: memref<1x1xf32, #tpu.memory_space<vmem>>, %arg13: memref<3x256xf32, #tpu.memory_space<vmem>>) attributes {dimension_semantics = [#tpu.dimension_semantics<parallel>], iteration_bounds = array<i64: 2>, scalar_prefetch = 0 : i64, scratch_operands = 0 : i64, tpu.core_type = #tpu.core_type<tc>, window_params = [{transform_indices = @transform_0, window_bounds = array<i64: 256, 256>}, {transform_indices = @transform_1, window_bounds = array<i64: 256, 256>}, {pipeline_mode = #tpu.pipeline_mode<synchronous>, transform_indices = @transform_2, window_bounds = array<i64: 256, 128>}, {pipeline_mode = #tpu.pipeline_mode<synchronous>, transform_indices = @transform_3, window_bounds = array<i64: 1, 128>}, {pipeline_mode = #tpu.pipeline_mode<synchronous>, transform_indices = @transform_4, window_bounds = array<i64: 128, 128>}, {pipeline_mode = #tpu.pipeline_mode<synchronous>, transform_indices = @transform_5, window_bounds = array<i64: 1, 128>}, {pipeline_mode = #tpu.pipeline_mode<synchronous>, transform_indices = @transform_6, window_bounds = array<i64: 128, 128>}, {pipeline_mode = #tpu.pipeline_mode<synchronous>, transform_indices = @transform_7, window_bounds = array<i64: 1, 128>}, {pipeline_mode = #tpu.pipeline_mode<synchronous>, transform_indices = @transform_8, window_bounds = array<i64: 128, 128>}, {pipeline_mode = #tpu.pipeline_mode<synchronous>, transform_indices = @transform_9, window_bounds = array<i64: 1, 128>}, {pipeline_mode = #tpu.pipeline_mode<synchronous>, transform_indices = @transform_10, window_bounds = array<i64: 1, 128>}, {pipeline_mode = #tpu.pipeline_mode<synchronous>, transform_indices = @transform_11, window_bounds = array<i64: 1, 1>}, {transform_indices = @transform_12, window_bounds = array<i64: 3, 256>}]} {
    %c0 = arith.constant 0 : index
    %c0_0 = arith.constant 0 : index
    %0 = vector.load %arg1[%c0, %c0_0] : memref<256x256xf32, #tpu.memory_space<vmem>>, vector<256x256xf32>
    %1 = arith.truncf %0 : vector<256x256xf32> to vector<256x256xbf16>
    %c0_1 = arith.constant 0 : index
    %c0_2 = arith.constant 0 : index
    %2 = vector.load %arg2[%c0_1, %c0_2] : memref<256x256xf32, #tpu.memory_space<vmem>>, vector<256x256xf32>
    %3 = arith.truncf %2 : vector<256x256xf32> to vector<256x256xbf16>
    %4 = tpu.concatenate %1, %3 in 0 : vector<256x256xbf16>, vector<256x256xbf16> -> vector<512x256xbf16>
    %c0_3 = arith.constant 0 : index
    %c0_4 = arith.constant 0 : index
    %5 = vector.load %arg3[%c0_3, %c0_4] : memref<256x128xbf16, #tpu.memory_space<vmem>>, vector<256x128xbf16>
    %c0_5 = arith.constant 0 : index
    %c0_6 = arith.constant 0 : index
    %6 = vector.load %arg4[%c0_5, %c0_6] : memref<1x128xf32, #tpu.memory_space<vmem>>, vector<1x128xf32>
    %cst = arith.constant dense<0.000000e+00> : vector<512x128xf32>
    %7 = tpu.matmul %4, %5, %cst {dimension_numbers = #tpu.dot_dimension_numbers<[1], [0], [0], [1], [0, 0, 1, 1], [], []>} : vector<512x256xbf16>, vector<256x128xbf16>, vector<512x128xf32> -> vector<512x128xf32>
    %8 = vector.broadcast %6 : vector<1x128xf32> to vector<512x128xf32>
    %9 = arith.addf %7, %8 : vector<512x128xf32>
    %cst_7 = arith.constant 0.000000e+00 : f32
    %10 = vector.broadcast %cst_7 : f32 to vector<512x128xf32>
    %11 = arith.maximumf %9, %10 : vector<512x128xf32>
    %12 = arith.truncf %11 : vector<512x128xf32> to vector<512x128xbf16>
    %c0_8 = arith.constant 0 : index
    %c0_9 = arith.constant 0 : index
    %13 = vector.load %arg5[%c0_8, %c0_9] : memref<128x128xbf16, #tpu.memory_space<vmem>>, vector<128x128xbf16>
    %c0_10 = arith.constant 0 : index
    %c0_11 = arith.constant 0 : index
    %14 = vector.load %arg6[%c0_10, %c0_11] : memref<1x128xf32, #tpu.memory_space<vmem>>, vector<1x128xf32>
    %cst_12 = arith.constant dense<0.000000e+00> : vector<512x128xf32>
    %15 = tpu.matmul %12, %13, %cst_12 {dimension_numbers = #tpu.dot_dimension_numbers<[1], [0], [0], [1], [0, 0, 1, 1], [], []>} : vector<512x128xbf16>, vector<128x128xbf16>, vector<512x128xf32> -> vector<512x128xf32>
    %16 = vector.broadcast %14 : vector<1x128xf32> to vector<512x128xf32>
    %17 = arith.addf %15, %16 : vector<512x128xf32>
    %cst_13 = arith.constant 0.000000e+00 : f32
    %18 = vector.broadcast %cst_13 : f32 to vector<512x128xf32>
    %19 = arith.maximumf %17, %18 : vector<512x128xf32>
    %20 = arith.truncf %19 : vector<512x128xf32> to vector<512x128xbf16>
    %c0_14 = arith.constant 0 : index
    %c0_15 = arith.constant 0 : index
    %21 = vector.load %arg7[%c0_14, %c0_15] : memref<128x128xbf16, #tpu.memory_space<vmem>>, vector<128x128xbf16>
    %c0_16 = arith.constant 0 : index
    %c0_17 = arith.constant 0 : index
    %22 = vector.load %arg8[%c0_16, %c0_17] : memref<1x128xf32, #tpu.memory_space<vmem>>, vector<1x128xf32>
    %cst_18 = arith.constant dense<0.000000e+00> : vector<512x128xf32>
    %23 = tpu.matmul %20, %21, %cst_18 {dimension_numbers = #tpu.dot_dimension_numbers<[1], [0], [0], [1], [0, 0, 1, 1], [], []>} : vector<512x128xbf16>, vector<128x128xbf16>, vector<512x128xf32> -> vector<512x128xf32>
    %24 = vector.broadcast %22 : vector<1x128xf32> to vector<512x128xf32>
    %25 = arith.addf %23, %24 : vector<512x128xf32>
    %cst_19 = arith.constant 0.000000e+00 : f32
    %26 = vector.broadcast %cst_19 : f32 to vector<512x128xf32>
    %27 = arith.maximumf %25, %26 : vector<512x128xf32>
    %28 = arith.truncf %27 : vector<512x128xf32> to vector<512x128xbf16>
    %c0_20 = arith.constant 0 : index
    %c0_21 = arith.constant 0 : index
    %29 = vector.load %arg9[%c0_20, %c0_21] : memref<128x128xbf16, #tpu.memory_space<vmem>>, vector<128x128xbf16>
    %c0_22 = arith.constant 0 : index
    %c0_23 = arith.constant 0 : index
    %30 = vector.load %arg10[%c0_22, %c0_23] : memref<1x128xf32, #tpu.memory_space<vmem>>, vector<1x128xf32>
    %cst_24 = arith.constant dense<0.000000e+00> : vector<512x128xf32>
    %31 = tpu.matmul %28, %29, %cst_24 {dimension_numbers = #tpu.dot_dimension_numbers<[1], [0], [0], [1], [0, 0, 1, 1], [], []>} : vector<512x128xbf16>, vector<128x128xbf16>, vector<512x128xf32> -> vector<512x128xf32>
    %32 = vector.broadcast %30 : vector<1x128xf32> to vector<512x128xf32>
    %33 = arith.addf %31, %32 : vector<512x128xf32>
    %cst_25 = arith.constant 0.000000e+00 : f32
    %34 = vector.broadcast %cst_25 : f32 to vector<512x128xf32>
    %35 = arith.maximumf %33, %34 : vector<512x128xf32>
    %36 = arith.truncf %35 : vector<512x128xf32> to vector<512x128xbf16>
    %c0_26 = arith.constant 0 : index
    %c0_27 = arith.constant 0 : index
    %37 = vector.load %arg11[%c0_26, %c0_27] : memref<1x128xbf16, #tpu.memory_space<vmem>>, vector<1x128xbf16>
    %c0_28 = arith.constant 0 : index
    %c0_29 = arith.constant 0 : index
    %38 = vector.load %arg12[%c0_28, %c0_29] : memref<1x1xf32, #tpu.memory_space<vmem>>, vector<1x1xf32>
    %cst_30 = arith.constant dense<0.000000e+00> : vector<1x512xf32>
    %39 = tpu.matmul %37, %36, %cst_30 {dimension_numbers = #tpu.dot_dimension_numbers<[1], [1], [0], [0], [0, 0, 1, 0], [], []>} : vector<1x128xbf16>, vector<512x128xbf16>, vector<1x512xf32> -> vector<1x512xf32>
    %40 = vector.broadcast %38 : vector<1x1xf32> to vector<1x512xf32>
    %41 = arith.addf %39, %40 : vector<1x512xf32>
    %42 = vector.extract_strided_slice %41 {offsets = [0, 0], sizes = [1, 256], strides = [1, 1]} : vector<1x512xf32> to vector<1x256xf32>
    %43 = vector.extract_strided_slice %41 {offsets = [0, 256], sizes = [1, 256], strides = [1, 1]} : vector<1x512xf32> to vector<1x256xf32>
    %44 = arith.subf %42, %43 : vector<1x256xf32>
    %45 = tpu.concatenate %42, %43, %44 in 0 : vector<1x256xf32>, vector<1x256xf32>, vector<1x256xf32> -> vector<3x256xf32>
    %c0_31 = arith.constant 0 : index
    %c0_32 = arith.constant 0 : index
    %46 = vector.load %arg13[%c0_31, %c0_32] : memref<3x256xf32, #tpu.memory_space<vmem>>, vector<3x256xf32>
    tpu.vector_store %arg13[%c0_31, %c0_32], %45 {strides = array<i32>} : memref<3x256xf32, #tpu.memory_space<vmem>>, vector<3x256xf32>,
    return
  }
  func.func @transform_0(%arg0: i32) -> (i32, i32) {
    %c0_i32 = arith.constant 0 : i32
    %c0_i32_0 = arith.constant 0 : i32
    return %arg0, %c0_i32 : i32, i32
  }
  func.func @transform_1(%arg0: i32) -> (i32, i32) {
    %c0_i32 = arith.constant 0 : i32
    %c0_i32_0 = arith.constant 0 : i32
    return %arg0, %c0_i32 : i32, i32
  }
  func.func @transform_2(%arg0: i32) -> (i32, i32) {
    %c0_i32 = arith.constant 0 : i32
    %c0_i32_0 = arith.constant 0 : i32
    %c0_i32_1 = arith.constant 0 : i32
    return %c0_i32, %c0_i32_0 : i32, i32
  }
  func.func @transform_3(%arg0: i32) -> (i32, i32) {
    %c0_i32 = arith.constant 0 : i32
    %c0_i32_0 = arith.constant 0 : i32
    %c0_i32_1 = arith.constant 0 : i32
    return %c0_i32, %c0_i32_0 : i32, i32
  }
  func.func @transform_4(%arg0: i32) -> (i32, i32) {
    %c0_i32 = arith.constant 0 : i32
    %c0_i32_0 = arith.constant 0 : i32
    %c0_i32_1 = arith.constant 0 : i32
    return %c0_i32, %c0_i32_0 : i32, i32
  }
  func.func @transform_5(%arg0: i32) -> (i32, i32) {
    %c0_i32 = arith.constant 0 : i32
    %c0_i32_0 = arith.constant 0 : i32
    %c0_i32_1 = arith.constant 0 : i32
    return %c0_i32, %c0_i32_0 : i32, i32
  }
  func.func @transform_6(%arg0: i32) -> (i32, i32) {
    %c0_i32 = arith.constant 0 : i32
    %c0_i32_0 = arith.constant 0 : i32
    %c0_i32_1 = arith.constant 0 : i32
    return %c0_i32, %c0_i32_0 : i32, i32
  }
  func.func @transform_7(%arg0: i32) -> (i32, i32) {
    %c0_i32 = arith.constant 0 : i32
    %c0_i32_0 = arith.constant 0 : i32
    %c0_i32_1 = arith.constant 0 : i32
    return %c0_i32, %c0_i32_0 : i32, i32
  }
  func.func @transform_8(%arg0: i32) -> (i32, i32) {
    %c0_i32 = arith.constant 0 : i32
    %c0_i32_0 = arith.constant 0 : i32
    %c0_i32_1 = arith.constant 0 : i32
    return %c0_i32, %c0_i32_0 : i32, i32
  }
  func.func @transform_9(%arg0: i32) -> (i32, i32) {
    %c0_i32 = arith.constant 0 : i32
    %c0_i32_0 = arith.constant 0 : i32
    %c0_i32_1 = arith.constant 0 : i32
    return %c0_i32, %c0_i32_0 : i32, i32
  }
  func.func @transform_10(%arg0: i32) -> (i32, i32) {
    %c0_i32 = arith.constant 0 : i32
    %c0_i32_0 = arith.constant 0 : i32
    %c0_i32_1 = arith.constant 0 : i32
    return %c0_i32, %c0_i32_0 : i32, i32
  }
  func.func @transform_11(%arg0: i32) -> (i32, i32) {
    %c0_i32 = arith.constant 0 : i32
    %c0_i32_0 = arith.constant 0 : i32
    %c0_i32_1 = arith.constant 0 : i32
    return %c0_i32, %c0_i32_0 : i32, i32
  }
  func.func @transform_12(%arg0: i32) -> (i32, i32) {
    %c0_i32 = arith.constant 0 : i32
    %c0_i32_0 = arith.constant 0 : i32
    return %c0_i32, %arg0 : i32, i32
  }
}

</mosaic_0001>

<bundles_post_ra>
// kernel: tpu_custom_call.1
= control target key start
LH: loop header
LB: loop body
LE: loop exit
PB: predicated region body
PF: predicated region fallthrough
CT: control target
= control target key end

     0   :  { %s4608_s0 = inlined_call_operand.hbm [shape: f32[512,256], index: 0, kind: input, shape index: {}]   ;;  %s4609_s1 = inlined_call_operand.hbm [shape: f32[512,256], index: 1, kind: input, shape index: {}]   ;;  %s4610_s2 = inlined_call_operand.hbm [shape: bf16[256,128], index: 2, kind: input, shape index: {}]   ;;  %s4611_s3 = inlined_call_operand.vmem [shape: f32[1,128], index: 3, kind: input, shape index: {}]   ;;  %s4612_s4 = inlined_call_operand.hbm [shape: bf16[128,128], index: 4, kind: input, shape index: {}]   ;;  %s4613_s5 = inlined_call_operand.vmem [shape: f32[1,128], index: 5, kind: input, shape index: {}]   ;;  %s4614_s6 = inlined_call_operand.hbm [shape: bf16[128,128], index: 6, kind: input, shape index: {}]   ;;  %s4615_s7 = inlined_call_operand.vmem [shape: f32[1,128], index: 7, kind: input, shape index: {}]   ;;  %s4616_s8 = inlined_call_operand.hbm [shape: bf16[128,128], index: 8, kind: input, shape index: {}]   ;;  %s4617_s9 = inlined_call_operand.vmem [shape: f32[1,128], index: 9, kind: input, shape index: {}]   ;;  %s4618_s10 = inlined_call_operand.vmem [shape: bf16[1,128], index: 10, kind: input, shape index: {}]   ;;  %s4619_s11 = inlined_call_operand.<no memory space> [shape: f32[1,1], index: 11, kind: input, shape index: {}]   ;;  %s4620_s12 = inlined_call_operand.hbm [shape: f32[3,512], index: 12, kind: output, shape index: {}]  }
   0x1   :  { %4637 = sst [smem:[#allocation41_spill]] %s4608_s0  ;;  %v17_v0 = vstv %s4619_s11 }
   0x2   :  { %4638 = sst [smem:[#allocation42_spill]] %s4610_s2  ;;  %18 = vst [vmem:[#allocation2] sm:$0x1] %v17_v0 }
   0x3   :  { %4639 = sst [smem:[#allocation43_spill]] %s4612_s4 }
   0x4   :  { %4640 = sst [smem:[#allocation44_spill]] %s4614_s6 }
   0x5   :  { %4641 = sst [smem:[#allocation45_spill]] %s4616_s8 }
   0x6   :  { %19 = vsyncpa [#allocation4], 0 }
   0x7   :  { %21 = vsyncpa [#allocation4 + $0x1], 0 }
   0x8   :  { %22 = vsyncpa [#allocation7], 0 }
   0x9   :  { %24 = vsyncpa [#allocation7 + $0x1], 0 }
   0xa   :  { %25 = vsyncpa [#allocation10], 0 }
   0xb   :  { %26 = vsyncpa [#allocation13], 0 }
   0xc   :  { %27 = vsyncpa [#allocation5], 0 }
   0xd   :  { %29 = vsyncpa [#allocation5 + $0x1], 0  ;;  %s3565_s23 = smov 0   ;;  %s3567_s24 = smov 0  }
   0xe   :  { %s3569_s25 = smov 0   ;;  %s3571_s26 = smov 0  }
   0xf LB: > { %4642 = sst [smem:[#allocation21_spill]] %s3474_s23  ;;  %s3586_s11 = sadd.s32 4294967295, %s3486_s26   ;;  %s3486_s26 = sphi %s3571_s26, %s4692_s26   ;;  %s3482_s25 = sphi %s3569_s25, %s4694_s25   ;;  %s3478_s24 = sphi %s3567_s24, %s4696_s24   ;;  %s3474_s23 = sphi %s3565_s23, %s4695_s23  }
  0x10   : > { %4643 = sst [smem:[#allocation22_spill]] %s3482_s25  ;;  %s2861_s27 = sadd.s32 4294967294, %s3486_s26  }
  0x11   : > { %p55_p0 = scmp.ne.s32.totalorder %s3478_s24, %s3474_s23  ;;  %p56_p1 = scmp.eq.s32.totalorder %s3586_s11, 0 }
  0x12   : > { %p315_p2 = scmp.eq.s32.totalorder %s3586_s11, 1  ;;  %p321_p3 = scmp.eq.s32.totalorder %s2861_s27, 1 }
  0x13   : > { %p3595_p4 = por %p56_p1, %p55_p0  ;;  %p2862_p5 = scmp.ge.s32.totalorder %s3486_s26, 1 }
  0x14   : > { %p3600_p6 = por %p321_p3, %p55_p0  ;;  %p328_p7 = scmp.lt.s32.totalorder %s3486_s26, 3 }
  0x15   : > { %s4647_s2 = sld [smem:[#allocation42_spill]]  ;;  %s3488_s16 = smov [#allocation8]  }
  0x16   : > { %s4645_s29 = scalar_select %p3600_p6, 1, 0 }
  0x17   : > { %p3608_p8 = pnand %p2862_p5, %p328_p7  ;;  %s341_s17 = sshll.u32 %s3488_s16, 4  ;;  %s342_s17 = int_to_ptr.vmem [resolvable:$true] %s341_s17 }
  0x18   : > { %4646 = sst [smem:[#allocation23_spill]] %s4645_s29  ;;  %s3489_s22 = smov 64  }
  0x19   : > { %p3140_p9 = pneg %p3608_p8  ;;  %s4650_s4 = sld [smem:[#allocation43_spill]] }
  0x1a   : > { %s3490_s27 = smov 4   ;;  %s3491_s30 = smov [#allocation9]  }
  0x1b   : > { %s339_s14 = sshll.u32 %s4647_s2, 4  ;;  %p3616_p10 = pnand %p3140_p9, %p56_p1  ;;  %s340_s14 = int_to_ptr.hbm [resolvable:$true] %s339_s14 }
  0x1c   : > { %s358_s13 = sshll.u32 %s3491_s30, 4  ;;  %s4651_s6 = sld [smem:[#allocation44_spill]]  ;;  %s359_s13 = int_to_ptr.vmem [resolvable:$true] %s358_s13 }
  0x1d   : > { %3143 = dma.hbm_to_vmem [thread:$0]  (!%p3616_p10), %s340_s14, 2048, %s342_s17, [#allocation7], %s3489_s22, %s3489_s22, %s3490_s27  }
  0x1e   : > { %s4652_s8 = sld [smem:[#allocation45_spill]]  ;;  %s3492_s17 = smov [#allocation11]  }
  0x1f   : > { %s356_s21 = sshll.u32 %s4650_s4, 4  ;;  %s375_s30 = sshll.u32 %s3492_s17, 4  ;;  %s357_s21 = int_to_ptr.hbm [resolvable:$true] %s356_s21  ;;  %s376_s30 = int_to_ptr.vmem [resolvable:$true] %s375_s30 }
  0x20   : > { %3146 = dma.hbm_to_vmem [thread:$0]  (!%p3616_p10), %s357_s21, 1024, %s359_s13, [#allocation10], %s3489_s22, %s3489_s22, %s3490_s27  }
  0x21   : > { %s3493_s2 = smov [#allocation12]   ;;  %s3639_s21 = sadd.s32 1, %s3486_s26  }
  0x22   : > { %s373_s29 = sshll.u32 %s4651_s6, 4  ;;  %s392_s16 = sshll.u32 %s3493_s2, 4  ;;  %s374_s29 = int_to_ptr.hbm [resolvable:$true] %s373_s29  ;;  %s393_s16 = int_to_ptr.vmem [resolvable:$true] %s392_s16 }
  0x23   : > { %3149 = dma.hbm_to_vmem [thread:$0]  (!%p3616_p10), %s374_s29, 1024, %s376_s30, [#allocation10], %s3489_s22, %s3489_s22, %s3490_s27  }
  0x24   : > { %s390_s14 = sshll.u32 %s4652_s8, 4  ;;  %4653 = sst [smem:[#allocation24_spill]] %s3639_s21  ;;  %s391_s14 = int_to_ptr.hbm [resolvable:$true] %s390_s14 }
  0x25   : > { %3152 = dma.hbm_to_vmem [thread:$0]  (!%p3616_p10), %s391_s14, 1024, %s393_s16, [#allocation13], %s3489_s22, %s3489_s22, %s3490_s27  }
  0x26   : > { %s42_s13 = sadd.s32 1, %s3482_s25  ;;  %s39_s19 = ssub.s32 %s3486_s26, %s3639_s21 }
  0x27   : > { %p49_p12 = scmp.ne.s32.totalorder %s3482_s25, %s3478_s24  ;;  %p40_p13 = scmp.eq.s32.totalorder %s39_s19, 0 }
  0x28   : > { %p50_p0 = scmp.eq.s32.totalorder %s3486_s26, 0  ;;  %p3168_p5 = scmp.lt.s32.totalorder %s3486_s26, 2 }
  0x29   : > { %p3649_p3 = por %p315_p2, %p49_p12  ;;  %s415_s17 = sand.u32 1, %s3482_s25  }
  0x2a   : > { %s3655_s29 = scalar_select %p40_p13, %s3482_s25, %s42_s13  }
  0x2b   : > { %p51_p7 = por %p50_p0, %p49_p12  ;;  %s3658_s18 = sshll.u32 %s415_s17, 9 }
  0x2c   : > { %4655 = sst [smem:[#allocation25_spill]] %s3655_s29  ;;  %s4622_s22 = sshll.u32 %s3486_s26, 9 }
  0x2d   : > { %s4656_s0 = sld [smem:[#allocation41_spill]]  ;;  %s419_s2 = scalar_lea.vmem [#allocation3], %s3658_s18 }
  0x2e   : > { %s428_s16 = sshll.u32 %s419_s2, 4  ;;  %p3667_p2 = pnand %p3168_p5, %p51_p7  ;;  %s429_s16 = int_to_ptr.vmem [resolvable:$true] %s428_s16 }
  0x2f   : > { %s416_s13 = scalar_lea.sflag [#allocation4], %s415_s17 }
  0x30   : > { %p3348_p10 = pneg %p3667_p2 }
  0x33   : > { %s425_s30 = scalar_lea.hbm %s4656_s0, %s4622_s22 }
  0x34   : > { %s426_s19 = sshll.u32 %s425_s30, 4  ;;  %s3351_s30 = scalar_lea.hbm %s4656_s0, 1024  ;;  %s427_s19 = int_to_ptr.hbm [resolvable:$true] %s426_s19 }
  0x35   : > { %s3344_s6 = sshra.s32 %s427_s19, 4  ;;  %s3345_s6 = int_to_ptr.hbm [resolvable:$true] %s3344_s6 }
  0x36   : > { %s3346_s8 = scalar_lea.hbm %s3345_s6, 512  ;;  %p3352_p0 = scmp.lt.s32.totalorder %s3345_s6, %s4656_s0 }
  0x37   : > { %p3347_p9 = scmp.ne.s32.totalorder %s3345_s6, %s3346_s8  ;;  %p3353_p5 = scmp.lt.s32.totalorder %s3351_s30, %s3346_s8 }
  0x39   : > { %p3349_p12 = pnand %p3348_p10, %p3347_p9  ;;  %p3354_p7 = por %p3353_p5, %p3352_p0 }
  0x3b   : > { %p3350_p13 = pneg %p3349_p12 }
  0x3d   : > { %p3355_p11 = pnand %p3354_p7, %p3350_p13 }
  0x3f   : > { %3358 = shalt.err (!%p3355_p11)
}
  0x40   : > { %s3494_s17 = smov 256   ;;  %s3495_s29 = smov 16  }
  0x41   : > { %3156 = dma.hbm_to_vmem [thread:$0]  (!%p3667_p2), %s427_s19, 8192, %s429_s16, %s416_s13, %s3494_s17, %s3494_s17, %s3495_s29  }
  0x42   : > { %s4658_s25 = sshll.u32 %s3486_s26, 9  ;;  %s442_s22 = scalar_lea.vmem [#allocation6], %s3658_s18 }
  0x43   : > { %s448_s21 = scalar_lea.hbm %s4609_s1, %s4658_s25  ;;  %s451_s6 = sshll.u32 %s442_s22, 4  ;;  %s452_s6 = int_to_ptr.vmem [resolvable:$true] %s451_s6 }
  0x44   : > { %s449_s8 = sshll.u32 %s448_s21, 4  ;;  %s438_s30 = sand.u32 1, %s3486_s26   ;;  %s450_s8 = int_to_ptr.hbm [resolvable:$true] %s449_s8 }
  0x45   : > { %s439_s2 = scalar_lea.sflag [#allocation7], %s438_s30  ;;  %s3374_s0 = sshra.s32 %s450_s8, 4  ;;  %s3375_s0 = int_to_ptr.hbm [resolvable:$true] %s3374_s0 }
  0x46   : > { %s3376_s23 = scalar_lea.hbm %s3375_s0, 512  ;;  %s3381_s13 = scalar_lea.hbm %s4609_s1, 1024 }
  0x47   : > { %p3377_p11 = scmp.ne.s32.totalorder %s3375_s0, %s3376_s23  ;;  %p3382_p13 = scmp.lt.s32.totalorder %s3375_s0, %s4609_s1 }
  0x48   : > { %p3383_p0 = scmp.lt.s32.totalorder %s3381_s13, %s3376_s23 }
  0x49   : > { %p3379_p9 = pnand %p3377_p11, %p3348_p10 }
  0x4a   : > { %p3384_p5 = por %p3383_p0, %p3382_p13 }
  0x4b   : > { %p3380_p12 = pneg %p3379_p9 }
  0x4d   : > { %p3385_p7 = pnand %p3384_p5, %p3380_p12 }
  0x4f   : > { %3388 = shalt.err (!%p3385_p7)
}
  0x50   : > { %3159 = dma.hbm_to_vmem [thread:$0]  (!%p3667_p2), %s450_s8, 8192, %s452_s6, %s439_s2, %s3494_s17, %s3494_s17, %s3495_s29  }
  0x51   : > { %463 = sbr.rel (%p3608_p8) target bundleno = 1465 (0x5b9), region = 68 }
  0x56   : > { %s3705_s21 = sand.u32 1, %s3478_s24  }
  0x57   : > { %s2877_s27 = sshll.u32 %s3705_s21, 9  ;;  %s466_s14 = scalar_lea.sflag [#allocation4], %s3705_s21 }
  0x58   : > { %s3709_s22 = scalar_lea.vmem [#allocation3], %s2877_s27 }
  0x59   : > { %3449 = dma.done.wait (%p3595_p4), %s466_s14, 8192  }
  0x5a   : > { %3451 = vsyncadd (%p3595_p4), %s466_s14, 4294959104  ;;  %s475_s0 = sand.u32 1, %s3586_s11   ;;  %s3716_s23 = scalar_lea.vmem [#allocation6], %s2877_s27 }
  0x5b   : > { %s476_s4 = scalar_lea.sflag [#allocation7], %s475_s0 }
  0x5c   : > { %3453 = dma.done.wait (%p3595_p4), %s476_s4, 8192  }
  0x5d   : > { %3455 = vsyncadd (%p3595_p4), %s476_s4, 4294959104 }
  0x5e   : > { %3457 = dma.done.wait (%p56_p1), [#allocation7], 2048  }
  0x5f   : > { %3459 = vsyncadd (%p56_p1), [#allocation7], 4294965248 }
  0x60   : > { %3461 = dma.done.wait (%p56_p1), [#allocation10], 2048  }
  0x61   : > { %3463 = vsyncadd (%p56_p1), [#allocation10], 4294965248 }
  0x62   : > { %3465 = dma.done.wait (%p56_p1), [#allocation13], 1024  }
  0x63   : > { %3467 = vsyncadd (%p56_p1), [#allocation13], 4294966272  ;;  %v3060_v1 = vld [vmem:[#allocation8 + $0x38] sm:$0xff]  ;;  %v3059_v2 = vld [vmem:[#allocation8 + $0x30] sm:$0xff]  ;;  %s3093_s28 = sshll.u32 %s3586_s11, 3  ;;  %vm2700_vm0 = vcmask 1040384  }
  0x64   : > { %3094 = vmatpush.bf16.msra.mxu1 %v3060_v1  ;;  %3095 = vmatpush.bf16.msra.mxu2 %v3060_v1  ;;  %v3058_v3 = vld [vmem:[#allocation8 + $0x28] sm:$0xff]  ;;  %v3057_v4 = vld [vmem:[#allocation8 + $0x20] sm:$0xff]  ;;  %v3056_v5 = vld [vmem:[#allocation8 + $0x18] sm:$0xff]  ;;  %s2725_s17 = scalar_lea.hbm %s4620_s12, %s3093_s28  ;;  %vm2703_vm1 = vcmask 1041408   ;;  %vm2709_vm2 = vcmask 1043456   ;;  %s2714_s30 = scalar_lea.sflag [#allocation5], %s3705_s21 }
  0x65   : > { %1193 = vmatpush.bf16.msra.mxu0 %v3060_v1  ;;  %3096 = vmatpush.bf16.msra.mxu3 %v3060_v1  ;;  %v3055_v6 = vld [vmem:[#allocation8 + $0x10] sm:$0xff]  ;;  %v589_v7 = vld [vmem:[%s3709_s22 + $0x140] sm:$0xff]  ;;  %v590_v8 = vld [vmem:[%s3709_s22 + $0x148] sm:$0xff]  ;;  %s2729_s11 = sshll.u32 %s2725_s17, 4  ;;  %s3424_s25 = scalar_lea.hbm %s4620_s12, 16  ;;  %s2730_s11 = int_to_ptr.hbm [resolvable:$true] %s2729_s11 }
  0x66   : > { %v591_v9 = vld [vmem:[%s3709_s22 + $0x150] sm:$0xff]  ;;  %v592_v10 = vld [vmem:[%s3709_s22 + $0x158] sm:$0xff]  ;;  %v3738_v11 = vpack.c.bf16 %v590_v8, %v589_v7  ;;  %v3054_v13 = vld [vmem:[#allocation8 + $0x8] sm:$0xff]  ;;  %s3418_s2 = sshra.s32 %s2730_s11, 4  ;;  %s3419_s2 = int_to_ptr.hbm [resolvable:$true] %s3418_s2 }
  0x67   : > { %v3740_v12 = vpack.c.bf16 %v592_v10, %v591_v9  ;;  %v3053_v16 = vld [vmem:[#allocation8] sm:$0xff]  ;;  %v3068_v18 = vld [vmem:[#allocation8 + $0x78] sm:$0xff]  ;;  %v594_v20 = vld [vmem:[%s3709_s22 + $0x168] sm:$0xff]  ;;  %s3420_s16 = scalar_lea.hbm %s3419_s2, 8  ;;  %p3425_p2 = scmp.lt.s32.totalorder %s3419_s2, %s4620_s12 }
  0x68   : > { %3097 = vmatpush.bf16.msra.mxu1 %v3059_v2  ;;  %3098 = vmatpush.bf16.msra.mxu2 %v3059_v2  ;;  %v813_v14 = vunpack.c.l.b16 %v3738_v11  ;;  %v593_v19 = vld [vmem:[%s3709_s22 + $0x160] sm:$0xff]  ;;  %v595_v21 = vld [vmem:[%s3709_s22 + $0x170] sm:$0xff]  ;;  %v596_v22 = vld [vmem:[%s3709_s22 + $0x178] sm:$0xff]  ;;  %p3421_p1 = scmp.ne.s32.totalorder %s3419_s2, %s3420_s16  ;;  %p3426_p10 = scmp.lt.s32.totalorder %s3424_s25, %s3420_s16 }
  0x69   : > { %1194 = vmatpush.bf16.msra.mxu0 %v3059_v2  ;;  %3099 = vmatpush.bf16.msra.mxu3 %v3059_v2  ;;  %v815_v15 = vunpack.c.l.b16 %v3740_v12  ;;  %v3067_v23 = vld [vmem:[#allocation8 + $0x70] sm:$0xff]  ;;  %v3748_v24 = vpack.c.bf16 %v594_v20, %v593_v19  ;;  %v3750_v25 = vpack.c.bf16 %v596_v22, %v595_v21  ;;  %v3066_v26 = vld [vmem:[#allocation8 + $0x68] sm:$0xff]  ;;  %v3065_v29 = vld [vmem:[#allocation8 + $0x60] sm:$0xff] }
  0x6a   : > { %v605_v31 = vld [vmem:[%s3709_s22 + $0x1c0] sm:$0xff]  ;;  %v606_v32 = vld [vmem:[%s3709_s22 + $0x1c8] sm:$0xff]  ;;  %v607_v33 = vld [vmem:[%s3709_s22 + $0x1d0] sm:$0xff]  ;;  %p3422_p4 = pnand %p3421_p1, %p3649_p3  ;;  %p3427_p11 = por %p3426_p10, %p3425_p2 }
  0x6b   : > { %v857_v17 = vpack.c.b16 %v815_v15, %v813_v14  ;;  %v817_v27 = vunpack.c.l.b16 %v3748_v24  ;;  %v819_v28 = vunpack.c.l.b16 %v3750_v25  ;;  %v608_v34 = vld [vmem:[%s3709_s22 + $0x1d8] sm:$0xff]  ;;  %v3758_v35 = vpack.c.bf16 %v606_v32, %v605_v31  ;;  %v597_v36 = vld [vmem:[%s3709_s22 + $0x180] sm:$0xff]  ;;  %v550_v40 = vld [vmem:[%s3709_s22 + $0x8] sm:$0xff] }
  0x6c   : > { %3100 = vmatpush.bf16.msra.mxu1 %v3058_v3  ;;  %3101 = vmatpush.bf16.msra.mxu2 %v3058_v3  ;;  %v3064_v37 = vld [vmem:[#allocation8 + $0x58] sm:$0xff]  ;;  %v3761_v38 = vpack.c.bf16 %v608_v34, %v607_v33  ;;  %v549_v39 = vld [vmem:[%s3709_s22] sm:$0xff]  ;;  %v598_v41 = vld [vmem:[%s3709_s22 + $0x188] sm:$0xff]  ;;  %p3423_p8 = pneg %p3422_p4 }
  0x6d   : > { %1195 = vmatpush.bf16.msra.mxu0 %v3058_v3  ;;  %3102 = vmatpush.bf16.msra.mxu3 %v3058_v3  ;;  %v859_v30 = vpack.c.b16 %v819_v28, %v817_v27  ;;  %v829_v42 = vunpack.c.l.b16 %v3758_v35  ;;  %v551_v43 = vld [vmem:[%s3709_s22 + $0x10] sm:$0xff]  ;;  %v552_v44 = vld [vmem:[%s3709_s22 + $0x18] sm:$0xff]  ;;  %v3769_v45 = vpack.c.bf16 %v550_v40, %v549_v39  ;;  %v3778_v54 = vpack.c.bf16 %v598_v41, %v597_v36  ;;  %v3062_v57 = vld [vmem:[#allocation8 + $0x48] sm:$0xff] }
  0x6e   : > { %v599_v46 = vld [vmem:[%s3709_s22 + $0x190] sm:$0xff]  ;;  %v600_v47 = vld [vmem:[%s3709_s22 + $0x198] sm:$0xff]  ;;  %v831_v48 = vunpack.c.l.b16 %v3761_v38  ;;  %v3774_v50 = vpack.c.bf16 %v552_v44, %v551_v43  ;;  %v3061_v60 = vld [vmem:[#allocation8 + $0x40] sm:$0xff]  ;;  %p3428_p9 = pnand %p3427_p11, %p3423_p8 }
  0x6f   : > { %v3063_v49 = vld [vmem:[#allocation8 + $0x50] sm:$0xff]  ;;  %v773_v51 = vunpack.c.l.b16 %v3769_v45  ;;  %v3780_v55 = vpack.c.bf16 %v600_v47, %v599_v46  ;;  %v821_v58 = vunpack.c.l.b16 %v3778_v54  ;;  %v609_v62 = vld [vmem:[%s3709_s22 + $0x1e0] sm:$0xff]  ;;  %v610_v63 = vld [vmem:[%s3709_s22 + $0x1e8] sm:$0xff] }
  0x70   : > { %3103 = vmatpush.bf16.msra.mxu1 %v3057_v4  ;;  %3104 = vmatpush.bf16.msra.mxu2 %v3057_v4  ;;  %v865_v52 = vpack.c.b16 %v831_v48, %v829_v42  ;;  %v775_v53 = vunpack.c.l.b16 %v3774_v50  ;;  %v611_v0 = vld [vmem:[%s3709_s22 + $0x1f0] sm:$0xff]  ;;  %v612_v1 = vld [vmem:[%s3709_s22 + $0x1f8] sm:$0xff]  ;;  %v3788_v2 = vpack.c.bf16 %v610_v63, %v609_v62  ;;  %v601_v7 = vld [vmem:[%s3709_s22 + $0x1a0] sm:$0xff] }
  0x71   : > { %1196 = vmatpush.bf16.msra.mxu0 %v3057_v4  ;;  %3105 = vmatpush.bf16.msra.mxu3 %v3057_v4  ;;  %v823_v59 = vunpack.c.l.b16 %v3780_v55  ;;  %v3790_v3 = vpack.c.bf16 %v612_v1, %v611_v0  ;;  %v553_v4 = vld [vmem:[%s3709_s22 + $0x20] sm:$0xff]  ;;  %v556_v9 = vld [vmem:[%s3709_s22 + $0x38] sm:$0xff]  ;;  %v603_v14 = vld [vmem:[%s3709_s22 + $0x1b0] sm:$0xff] }
  0x72   : > { %v837_v56 = vpack.c.b16 %v775_v53, %v773_v51  ;;  %v833_v8 = vunpack.c.l.b16 %v3788_v2  ;;  %v604_v15 = vld [vmem:[%s3709_s22 + $0x1b8] sm:$0xff]  ;;  %v647_v31 = vld [vmem:[%s3716_s23 + $0x10] sm:$0xff]  ;;  %v557_v36 = vld [vmem:[%s3709_s22 + $0x40] sm:$0xff]  ;;  %v774_v51 = vunpack.c.h.b16 %v3769_v45 }
  0x73   : > { %v861_v61 = vpack.c.b16 %v823_v59, %v821_v58  ;;  %v3807_v22 = vpack.c.bf16 %v604_v15, %v603_v14  ;;  %v648_v32 = vld [vmem:[%s3716_s23 + $0x18] sm:$0xff]  ;;  %v559_v39 = vld [vmem:[%s3709_s22 + $0x50] sm:$0xff]  ;;  %v561_v62 = vld [vmem:[%s3709_s22 + $0x60] sm:$0xff] }
  0x74   : > { %3106 = vmatpush.bf16.msra.mxu1 %v3056_v5  ;;  %3107 = vmatpush.bf16.msra.mxu2 %v3056_v5  ;;  %v3817_v34 = vpack.c.bf16 %v648_v32, %v647_v31  ;;  %v560_v41 = vld [vmem:[%s3709_s22 + $0x58] sm:$0xff]  ;;  %v651_v58 = vld [vmem:[%s3716_s23 + $0x30] sm:$0xff]  ;;  %v562_v63 = vld [vmem:[%s3709_s22 + $0x68] sm:$0xff] }
  0x75   : > { %1197 = vmatpush.bf16.msra.mxu0 %v3056_v5  ;;  %3108 = vmatpush.bf16.msra.mxu3 %v3056_v5  ;;  %v554_v5 = vld [vmem:[%s3709_s22 + $0x28] sm:$0xff]  ;;  %v827_v27 = vunpack.c.l.b16 %v3807_v22  ;;  %v618_v44 = vpack.c.bf16 %v560_v41, %v559_v39  ;;  %v652_v59 = vld [vmem:[%s3716_s23 + $0x38] sm:$0xff]  ;;  %v563_v0 = vld [vmem:[%s3709_s22 + $0x70] sm:$0xff] }
  0x76   : > { %v3798_v10 = vpack.c.bf16 %v554_v5, %v553_v4  ;;  %v935_v43 = vunpack.c.l.b16 %v3817_v34  ;;  %v564_v45 = vld [vmem:[%s3709_s22 + $0x78] sm:$0xff] }
  0x77   : > { %v783_v48 = vunpack.c.l.b16 %v618_v44  ;;  %v620_v5 = vpack.c.bf16 %v564_v45, %v563_v0 }
  0x78   : > { %3109 = vmatpush.bf16.msra.mxu1 %v3055_v6  ;;  %3110 = vmatpush.bf16.msra.mxu2 %v3055_v6 }
  0x79   : > { %1198 = vmatpush.bf16.msra.mxu0 %v3055_v6  ;;  %3111 = vmatpush.bf16.msra.mxu3 %v3055_v6  ;;  %v555_v6 = vld [vmem:[%s3709_s22 + $0x30] sm:$0xff] }
  0x7c   : > { %3112 = vmatpush.bf16.msra.mxu1 %v3054_v13  ;;  %3113 = vmatpush.bf16.msra.mxu2 %v3054_v13 }
  0x7d   : > { %1199 = vmatpush.bf16.msra.mxu0 %v3054_v13  ;;  %3114 = vmatpush.bf16.msra.mxu3 %v3054_v13  ;;  %v602_v13 = vld [vmem:[%s3709_s22 + $0x1a8] sm:$0xff] }
  0x7e   : > { %v3805_v21 = vpack.c.bf16 %v602_v13, %v601_v7  ;;  %v778_v13 = vunpack.c.h.b16 %v3798_v10 }
  0x80   : > { %3115 = vmatpush.bf16.msra.mxu1 %v3053_v16  ;;  %3116 = vmatpush.bf16.msra.mxu2 %v3053_v16 }
  0x81   : > { %1200 = vmatpush.bf16.msra.mxu0 %v3053_v16  ;;  %3117 = vmatpush.bf16.msra.mxu3 %v3053_v16  ;;  %v835_v16 = vunpack.c.l.b16 %v3790_v3 }
  0x83   : > { %1251 = vmatmul.bf16.vlgmr.msra.gmra.mxu1 %v857_v17  ;;  %1271 = vmatmul.bf16.vlgmr.msra.gmra.mxu2 %v865_v52  ;;  %v616_v17 = vpack.c.bf16 %v556_v9, %v555_v6  ;;  %v867_v19 = vpack.c.b16 %v835_v16, %v833_v8  ;;  %v776_v52 = vunpack.c.h.b16 %v3774_v50  ;;  %v619_v50 = vpack.c.bf16 %v562_v63, %v561_v62  ;;  %v653_v16 = vld [vmem:[%s3716_s23 + $0x40] sm:$0xff] }
  0x84   : > { %1362 = vmatpush.bf16.msrb.mxu1 %v3068_v18  ;;  %1201 = vmatmul.bf16.vlgmr.msra.gmra.mxu0 %v837_v56  ;;  %v777_v18 = vunpack.c.l.b16 %v3798_v10  ;;  %v649_v56 = vld [vmem:[%s3716_s23 + $0x20] sm:$0xff]  ;;  %v787_v8 = vunpack.c.l.b16 %v620_v5  ;;  %v568_v10 = vld [vmem:[%s3709_s22 + $0x98] sm:$0xff] }
  0x85   : > { %v779_v20 = vunpack.c.l.b16 %v616_v17  ;;  %v838_v53 = vpack.c.b16 %v776_v52, %v774_v51  ;;  %v785_v6 = vunpack.c.l.b16 %v619_v50  ;;  %v780_v14 = vunpack.c.h.b16 %v616_v17  ;;  %v660_v51 = vld [vmem:[%s3716_s23 + $0x78] sm:$0xff] }
  0x87   : > { %v843_v9 = vpack.c.b16 %v787_v8, %v785_v6  ;;  %v840_v15 = vpack.c.b16 %v780_v14, %v778_v13  ;;  %v786_v6 = vunpack.c.h.b16 %v619_v50  ;;  %v662_v13 = vld [vmem:[%s3716_s23 + $0x88] sm:$0xff]  ;;  %v663_v14 = vld [vmem:[%s3716_s23 + $0x90] sm:$0xff] }
  0x88   : > { %1363 = vmatpush.bf16.msrb.mxu1 %v3067_v23  ;;  %v839_v23 = vpack.c.b16 %v779_v20, %v777_v18  ;;  %v654_v18 = vld [vmem:[%s3716_s23 + $0x48] sm:$0xff]  ;;  %v656_v20 = vld [vmem:[%s3716_s23 + $0x58] sm:$0xff] }
  0x8c   : > { %1364 = vmatpush.bf16.msrb.mxu1 %v3066_v26  ;;  %v825_v26 = vunpack.c.l.b16 %v3805_v21 }
  0x8e   : > { %v863_v28 = vpack.c.b16 %v827_v27, %v825_v26  ;;  %v565_v27 = vld [vmem:[%s3709_s22 + $0x80] sm:$0xff] }
  0x90   : > { %1365 = vmatpush.bf16.msrb.mxu1 %v3065_v29  ;;  %v645_v29 = vld [vmem:[%s3716_s23] sm:$0xff] }
  0x93   : > { %1256 = vmatmul.bf16.gmra.mxu1 %v859_v30  ;;  %1276 = vmatmul.bf16.gmra.mxu2 %v867_v19  ;;  %v646_v30 = vld [vmem:[%s3716_s23 + $0x8] sm:$0xff]  ;;  %v655_v19 = vld [vmem:[%s3716_s23 + $0x50] sm:$0xff] }
  0x94   : > { %1366 = vmatpush.bf16.msrb.mxu1 %v3064_v37  ;;  %1206 = vmatmul.bf16.gmra.mxu0 %v839_v23  ;;  %v3815_v33 = vpack.c.bf16 %v646_v30, %v645_v29  ;;  %v558_v37 = vld [vmem:[%s3709_s22 + $0x48] sm:$0xff]  ;;  %v3846_v23 = vpack.c.bf16 %v654_v18, %v653_v16  ;;  %v3848_v26 = vpack.c.bf16 %v656_v20, %v655_v19  ;;  %v567_v29 = vld [vmem:[%s3709_s22 + $0x90] sm:$0xff]  ;;  %v573_v19 = vld [vmem:[%s3709_s22 + $0xc0] sm:$0xff] }
  0x95   : > { %v617_v42 = vpack.c.bf16 %v558_v37, %v557_v36  ;;  %v622_v32 = vpack.c.bf16 %v568_v10, %v567_v29  ;;  %v574_v20 = vld [vmem:[%s3709_s22 + $0xc8] sm:$0xff]  ;;  %v576_v29 = vld [vmem:[%s3709_s22 + $0xd8] sm:$0xff] }
  0x96   : > { %v933_v40 = vunpack.c.l.b16 %v3815_v33  ;;  %v941_v30 = vunpack.c.l.b16 %v3846_v23  ;;  %v943_v31 = vunpack.c.l.b16 %v3848_v26  ;;  %v3886_v50 = vpack.c.bf16 %v574_v20, %v573_v19  ;;  %v669_v19 = vld [vmem:[%s3716_s23 + $0xc0] sm:$0xff]  ;;  %v670_v20 = vld [vmem:[%s3716_s23 + $0xc8] sm:$0xff] }
  0x97   : > { %v781_v46 = vunpack.c.l.b16 %v617_v42  ;;  %v791_v39 = vunpack.c.l.b16 %v622_v32  ;;  %v782_v41 = vunpack.c.h.b16 %v617_v42  ;;  %v572_v42 = vld [vmem:[%s3709_s22 + $0xb8] sm:$0xff] }
  0x98   : > { %1367 = vmatpush.bf16.msrb.mxu1 %v3063_v49  ;;  %v997_v47 = vpack.c.b16 %v935_v43, %v933_v40  ;;  %v1001_v37 = vpack.c.b16 %v943_v31, %v941_v30  ;;  %v784_v43 = vunpack.c.h.b16 %v618_v44  ;;  %v797_v10 = vunpack.c.l.b16 %v3886_v50 }
  0x99   : > { %v841_v49 = vpack.c.b16 %v783_v48, %v781_v46  ;;  %v658_v48 = vld [vmem:[%s3716_s23 + $0x68] sm:$0xff] }
  0x9a   : > { %v842_v46 = vpack.c.b16 %v784_v43, %v782_v41 }
  0x9c   : > { %1368 = vmatpush.bf16.msrb.mxu1 %v3062_v57  ;;  %v650_v57 = vld [vmem:[%s3716_s23 + $0x28] sm:$0xff] }
  0xa0   : > { %1369 = vmatpush.bf16.msrb.mxu1 %v3061_v60  ;;  %v3831_v60 = vpack.c.bf16 %v650_v57, %v649_v56  ;;  %v569_v56 = vld [vmem:[%s3709_s22 + $0xa0] sm:$0xff]  ;;  %v570_v57 = vld [vmem:[%s3709_s22 + $0xa8] sm:$0xff] }
  0xa1   : > { %v3869_v44 = vpack.c.bf16 %v570_v57, %v569_v56  ;;  %v577_v57 = vld [vmem:[%s3709_s22 + $0xe0] sm:$0xff] }
  0xa2   : > { %v937_v1 = vunpack.c.l.b16 %v3831_v60 }
  0xa3   : > { %1261 = vmatmul.bf16.gmra.mxu1 %v861_v61  ;;  %1281 = vmatmul.bf16.gmra.mxu2 %v997_v47  ;;  %v3833_v61 = vpack.c.bf16 %v652_v59, %v651_v58  ;;  %v657_v47 = vld [vmem:[%s3716_s23 + $0x60] sm:$0xff]  ;;  %v571_v58 = vld [vmem:[%s3709_s22 + $0xb0] sm:$0xff]  ;;  %v793_v0 = vunpack.c.l.b16 %v3869_v44 }
  0xa4   : > { %1211 = vmatmul.bf16.gmra.mxu0 %v841_v49  ;;  %v659_v49 = vld [vmem:[%s3716_s23 + $0x70] sm:$0xff]  ;;  %v3860_v52 = vpack.c.bf16 %v658_v48, %v657_v47  ;;  %v624_v63 = vpack.c.bf16 %v572_v42, %v571_v58  ;;  %v666_v47 = vld [vmem:[%s3716_s23 + $0xa8] sm:$0xff] }
  0xa5   : > { %v939_v4 = vunpack.c.l.b16 %v3833_v61  ;;  %v667_v48 = vld [vmem:[%s3716_s23 + $0xb0] sm:$0xff]  ;;  %v578_v58 = vld [vmem:[%s3709_s22 + $0xe8] sm:$0xff] }
  0xa6   : > { %v945_v59 = vunpack.c.l.b16 %v3860_v52  ;;  %v795_v45 = vunpack.c.l.b16 %v624_v63 }
  0xa7   : > { %v999_v7 = vpack.c.b16 %v939_v4, %v937_v1 }
  0xa8   : > { %v847_v4 = vpack.c.b16 %v795_v45, %v793_v0 }
  0xb3   : > { %1266 = vmatmul.bf16.gmra.mxu1 %v863_v28  ;;  %1286 = vmatmul.bf16.gmra.mxu2 %v999_v7  ;;  %v566_v28 = vld [vmem:[%s3709_s22 + $0x88] sm:$0xff]  ;;  %v788_v7 = vunpack.c.h.b16 %v620_v5 }
  0xb4   : > { %1216 = vmatmul.bf16.gmra.mxu0 %v843_v9  ;;  %v621_v17 = vpack.c.bf16 %v566_v28, %v565_v27  ;;  %v661_v9 = vld [vmem:[%s3716_s23 + $0x80] sm:$0xff]  ;;  %v575_v27 = vld [vmem:[%s3709_s22 + $0xd0] sm:$0xff] }
  0xb5   : > { %v844_v8 = vpack.c.b16 %v788_v7, %v786_v6  ;;  %v3877_v16 = vpack.c.bf16 %v662_v13, %v661_v9  ;;  %v3889_v30 = vpack.c.bf16 %v576_v29, %v575_v27  ;;  %v796_v9 = vunpack.c.h.b16 %v624_v63  ;;  %v3076_v13 = vld [vmem:[#allocation9 + $0x38] sm:$0xff]  ;;  %v671_v27 = vld [vmem:[%s3716_s23 + $0xd0] sm:$0xff] }
  0xb6   : > { %v789_v36 = vunpack.c.l.b16 %v621_v17  ;;  %1695 = vmatpush.bf16.msrb.mxu2 %v3076_v13  ;;  %v3924_v29 = vpack.c.bf16 %v670_v20, %v669_v19  ;;  %v583_v63 = vld [vmem:[%s3709_s22 + $0x110] sm:$0xff]  ;;  %v585_v13 = vld [vmem:[%s3709_s22 + $0x120] sm:$0xff]  ;;  %v588_v19 = vld [vmem:[%s3709_s22 + $0x138] sm:$0xff] }
  0xb7   : > { %v949_v28 = vunpack.c.l.b16 %v3877_v16  ;;  %v673_v20 = vld [vmem:[%s3716_s23 + $0xe0] sm:$0xff] }
  0xb8   : > { %v845_v40 = vpack.c.b16 %v791_v39, %v789_v36  ;;  %v799_v36 = vunpack.c.l.b16 %v3889_v30  ;;  %v790_v39 = vunpack.c.h.b16 %v621_v17  ;;  %v3908_v17 = vpack.c.bf16 %v578_v58, %v577_v57 }
  0xc3   : > { %1370 = vmatmul.bf16.vlgmr.msrb.gmra.mxu1 %v838_v53  ;;  %1291 = vmatmul.bf16.gmra.mxu2 %v1001_v37  ;;  %v3862_v53 = vpack.c.bf16 %v660_v51, %v659_v49  ;;  %v849_v37 = vpack.c.b16 %v799_v36, %v797_v10  ;;  %v668_v49 = vld [vmem:[%s3716_s23 + $0xb8] sm:$0xff]  ;;  %v582_v36 = vld [vmem:[%s3709_s22 + $0x108] sm:$0xff] }
  0xc4   : > { %1221 = vmatmul.bf16.gmra.mxu0 %v845_v40  ;;  %v792_v40 = vunpack.c.h.b16 %v622_v32  ;;  %v3901_v56 = vpack.c.bf16 %v668_v49, %v667_v48  ;;  %v3074_v48 = vld [vmem:[#allocation9 + $0x28] sm:$0xff] }
  0xc5   : > { %v947_v62 = vunpack.c.l.b16 %v3862_v53 }
  0xc6   : > { %v846_v41 = vpack.c.b16 %v792_v40, %v790_v39  ;;  %v955_v32 = vunpack.c.l.b16 %v3901_v56 }
  0xc7   : > { %v1003_v1 = vpack.c.b16 %v947_v62, %v945_v59  ;;  %v579_v59 = vld [vmem:[%s3709_s22 + $0xf0] sm:$0xff]  ;;  %v580_v62 = vld [vmem:[%s3709_s22 + $0xf8] sm:$0xff] }
  0xc8   : > { %v3911_v0 = vpack.c.bf16 %v580_v62, %v579_v59  ;;  %v798_v62 = vunpack.c.h.b16 %v3886_v50  ;;  %v587_v50 = vld [vmem:[%s3709_s22 + $0x130] sm:$0xff] }
  0xd3   : > { %1375 = vmatmul.bf16.gmra.mxu1 %v840_v15  ;;  %1296 = vmatmul.bf16.gmra.mxu2 %v1003_v1  ;;  %v664_v15 = vld [vmem:[%s3716_s23 + $0x98] sm:$0xff]  ;;  %v801_v1 = vunpack.c.l.b16 %v3908_v17 }
  0xd4   : > { %1226 = vmatmul.bf16.gmra.mxu0 %v847_v4  ;;  %v3879_v18 = vpack.c.bf16 %v664_v15, %v663_v14  ;;  %v803_v4 = vunpack.c.l.b16 %v3911_v0 }
  0xd6   : > { %v951_v5 = vunpack.c.l.b16 %v3879_v18  ;;  %v851_v7 = vpack.c.b16 %v803_v4, %v801_v1  ;;  %v3072_v1 = vld [vmem:[#allocation9 + $0x18] sm:$0xff] }
  0xd8   : > { %v1005_v31 = vpack.c.b16 %v951_v5, %v949_v28  ;;  %v672_v28 = vld [vmem:[%s3716_s23 + $0xd8] sm:$0xff]  ;;  %v3075_v5 = vld [vmem:[#allocation9 + $0x30] sm:$0xff] }
  0xd9   : > { %v3926_v10 = vpack.c.bf16 %v672_v28, %v671_v27  ;;  %1696 = vmatpush.bf16.msrb.mxu2 %v3075_v5  ;;  %v3959_v27 = vpack.c.bf16 %v588_v19, %v587_v50  ;;  %v674_v28 = vld [vmem:[%s3716_s23 + $0xe8] sm:$0xff]  ;;  %v675_v5 = vld [vmem:[%s3716_s23 + $0xf0] sm:$0xff] }
  0xda   : > { %v678_v50 = vld [vmem:[%s3716_s23 + $0x108] sm:$0xff]  ;;  %v679_v19 = vld [vmem:[%s3716_s23 + $0x110] sm:$0xff] }
  0xdb   : > { %v959_v40 = vunpack.c.l.b16 %v3926_v10 }
  0xdd   : > { %1697 = vmatpush.bf16.msrb.mxu2 %v3074_v48 }
  0xe3   : > { %1380 = vmatmul.bf16.gmra.mxu1 %v842_v46  ;;  %1301 = vmatmul.bf16.gmra.mxu2 %v1005_v31  ;;  %v665_v46 = vld [vmem:[%s3716_s23 + $0xa0] sm:$0xff] }
  0xe4   : > { %1231 = vmatmul.bf16.gmra.mxu0 %v849_v37  ;;  %v3899_v51 = vpack.c.bf16 %v666_v47, %v665_v46  ;;  %v581_v31 = vld [vmem:[%s3709_s22 + $0x100] sm:$0xff]  ;;  %v584_v37 = vld [vmem:[%s3709_s22 + $0x118] sm:$0xff] }
  0xe5   : > { %v3933_v39 = vpack.c.bf16 %v582_v36, %v581_v31  ;;  %v676_v31 = vld [vmem:[%s3716_s23 + $0xf8] sm:$0xff] }
  0xe6   : > { %v953_v42 = vunpack.c.l.b16 %v3899_v51 }
  0xe7   : > { %v805_v46 = vunpack.c.l.b16 %v3933_v39 }
  0xe8   : > { %v1007_v45 = vpack.c.b16 %v955_v32, %v953_v42  ;;  %v3073_v42 = vld [vmem:[#allocation9 + $0x20] sm:$0xff]  ;;  %v800_v32 = vunpack.c.h.b16 %v3889_v30 }
  0xe9   : > { %1698 = vmatpush.bf16.msrb.mxu2 %v3073_v42 }
  0xed   : > { %1699 = vmatpush.bf16.msrb.mxu2 %v3072_v1  ;;  %v802_v1 = vunpack.c.h.b16 %v3908_v17 }
  0xf3   : > { %1385 = vmatmul.bf16.gmra.mxu1 %v844_v8  ;;  %1306 = vmatmul.bf16.gmra.mxu2 %v1007_v45  ;;  %v794_v8 = vunpack.c.h.b16 %v3869_v44  ;;  %v957_v44 = vunpack.c.l.b16 %v3924_v29  ;;  %v850_v45 = vpack.c.b16 %v800_v32, %v798_v62  ;;  %v3069_v32 = vld [vmem:[#allocation9] sm:$0xff] }
  0xf4   : > { %1236 = vmatmul.bf16.gmra.mxu0 %v851_v7 }
  0xf5   : > { %v848_v14 = vpack.c.b16 %v796_v9, %v794_v8  ;;  %v1009_v47 = vpack.c.b16 %v959_v40, %v957_v44  ;;  %v3071_v9 = vld [vmem:[#allocation9 + $0x10] sm:$0xff]  ;;  %v3965_v44 = vpack.c.bf16 %v674_v28, %v673_v20  ;;  %v811_v40 = vunpack.c.l.b16 %v3959_v27  ;;  %v680_v28 = vld [vmem:[%s3716_s23 + $0x118] sm:$0xff] }
  0xf6   : > { %1700 = vmatpush.bf16.msrb.mxu2 %v3071_v9  ;;  %v3988_v17 = vpack.c.bf16 %v680_v28, %v679_v19 }
  0xf8   : > { %4661 = vst [vmem:[#allocation28_spill] sm:$0xff] %v3988_v17 }
 0x100   : > { %v3893_v43 = vpop.f32.mrf.mxu1 }
 0x101   : > { %v3940_v57 = vpop.f32.mrf.mxu0 }
 0x103   : > { %1390 = vmatmul.bf16.gmra.mxu1 %v846_v41  ;;  %v3936_v41 = vpack.c.bf16 %v584_v37, %v583_v63  ;;  %1311 = vmatmul.bf16.gmra.mxu2 %v1009_v47  ;;  %v3967_v63 = vpack.c.bf16 %v676_v31, %v675_v5  ;;  %v3070_v37 = vld [vmem:[#allocation9 + $0x8] sm:$0xff] }
 0x104   : > { %1701 = vmatpush.bf16.msrb.mxu2 %v3070_v37 }
 0x105   : > { %v807_v49 = vunpack.c.l.b16 %v3936_v41  ;;  %v963_v47 = vunpack.c.l.b16 %v3967_v63 }
 0x106   : > { %v3946_v4 = vpop.f32.mrf.mxu2 }
 0x107   : > { %v853_v59 = vpack.c.b16 %v807_v49, %v805_v46  ;;  %v961_v46 = vunpack.c.l.b16 %v3965_v44 }
 0x108   : > { %v3915_v6 = vpop.f32.mrf.mxu1  ;;  %1702 = vmatpush.bf16.msrb.mxu2 %v3069_v32 }
 0x109   : > { %1241 = vmatmul.bf16.gmra.mxu0 %v853_v59  ;;  %v3950_v8 = vpop.f32.mrf.mxu0  ;;  %v1011_v42 = vpack.c.b16 %v963_v47, %v961_v46  ;;  %v806_v46 = vunpack.c.h.b16 %v3933_v39  ;;  %v808_v47 = vunpack.c.h.b16 %v3936_v41  ;;  %v684_v39 = vld [vmem:[%s3716_s23 + $0x138] sm:$0xff] }
 0x10b   : > { %1316 = vmatmul.bf16.vlgmr.msra.gmra.mxu3 %v1011_v42  ;;  %v854_v32 = vpack.c.b16 %v808_v47, %v806_v46 }
 0x10e   : > { %v3974_v59 = vpop.f32.mrf.mxu2 }
 0x110   : > { %v3918_v15 = vpop.f32.mrf.mxu1 }
 0x111   : > { %v1207_v62 = vpop.f32.mrf.mxu0 }
 0x113   : > { %1395 = vmatmul.bf16.gmra.mxu1 %v848_v14  ;;  %v586_v14 = vld [vmem:[%s3709_s22 + $0x128] sm:$0xff] }
 0x114   : > { %v3956_v30 = vpack.c.bf16 %v586_v14, %v585_v13  ;;  %v677_v14 = vld [vmem:[%s3716_s23 + $0x100] sm:$0xff] }
 0x115   : > { %v3986_v5 = vpack.c.bf16 %v678_v50, %v677_v14  ;;  %v682_v14 = vld [vmem:[%s3716_s23 + $0x128] sm:$0xff]  ;;  %v683_v50 = vld [vmem:[%s3716_s23 + $0x130] sm:$0xff] }
 0x116   : > { %v809_v36 = vunpack.c.l.b16 %v3956_v30  ;;  %v3983_v20 = vpop.f32.mrf.mxu2  ;;  %v4011_v28 = vpack.c.bf16 %v684_v39, %v683_v50  ;;  %v810_v39 = vunpack.c.h.b16 %v3956_v30 }
 0x117   : > { %4659 = vst [vmem:[#allocation26_spill] sm:$0xff] %v3983_v20  ;;  %v687_v20 = vld [vmem:[%s3716_s23 + $0x150] sm:$0xff] }
 0x118   : > { %v3942_v58 = vpop.f32.mrf.mxu1  ;;  %v855_v49 = vpack.c.b16 %v811_v40, %v809_v36  ;;  %4660 = vst [vmem:[#allocation27_spill] sm:$0xff] %v3986_v5  ;;  %v967_v36 = vunpack.c.l.b16 %v3988_v17 }
 0x119   : > { %v1209_v31 = vpop.f32.mrf.mxu0  ;;  %4664 = vst [vmem:[#allocation31_spill] sm:$0xff] %v4011_v28 }
 0x11a   : > { %1246 = vmatmul.bf16.gmra.mxu0 %v855_v49 }
 0x11e   : > { %v3996_v49 = vpop.f32.mrf.mxu2 }
 0x11f   : > { %4662 = vst [vmem:[#allocation29_spill] sm:$0xff] %v3996_v49  ;;  %v686_v49 = vld [vmem:[%s3716_s23 + $0x148] sm:$0xff] }
 0x120   : > { %v3948_v7 = vpop.f32.mrf.mxu1 }
 0x121   : > { %v1212_v42 = vpop.f32.mrf.mxu0 }
 0x123   : > { %1400 = vmatmul.bf16.gmra.mxu1 %v850_v45  ;;  %v804_v45 = vunpack.c.h.b16 %v3911_v0  ;;  %v965_v0 = vunpack.c.l.b16 %v3986_v5  ;;  %v685_v5 = vld [vmem:[%s3716_s23 + $0x140] sm:$0xff] }
 0x125   : > { %v852_v9 = vpack.c.b16 %v804_v45, %v802_v1  ;;  %v1013_v40 = vpack.c.b16 %v967_v36, %v965_v0  ;;  %v4001_v45 = vld [vmem:[%s4611_s3] ss:$0 sm:$0xff]  ;;  %v971_v36 = vunpack.c.l.b16 %v4011_v28  ;;  %v812_v28 = vunpack.c.h.b16 %v3959_v27 }
 0x126   : > { %v1203_v19 = vadd.f32 %v4001_v45, %v3940_v57  ;;  %v4017_v47 = vpop.f32.mrf.mxu2 }
 0x127   : > { %1321 = vmatmul.bf16.gmra.mxu3 %v1013_v40  ;;  %v1205_v40 = vadd.f32 %v4001_v45, %v3950_v8  ;;  %4665 = vst [vmem:[#allocation32_spill] sm:$0xff] %v4017_v47  ;;  %v856_v8 = vpack.c.b16 %v812_v28, %v810_v39  ;;  %v1210_v28 = vadd.f32 %v4001_v45, %v1209_v31 }
 0x128   : > { %v3972_v48 = vpop.f32.mrf.mxu1 }
 0x129   : > { %v1214_v57 = vpop.f32.mrf.mxu0 }
 0x130   : > { %v3978_v13 = vpop.f32.mrf.mxu1 }
 0x131   : > { %v1217_v47 = vpop.f32.mrf.mxu0 }
 0x133   : > { %1405 = vmatmul.bf16.gmra.mxu1 %v852_v9  ;;  %v681_v9 = vld [vmem:[%s3716_s23 + $0x120] sm:$0xff] }
 0x134   : > { %v4009_v41 = vpack.c.bf16 %v682_v14, %v681_v9 }
 0x136   : > { %4663 = vst [vmem:[#allocation30_spill] sm:$0xff] %v4009_v41  ;;  %v969_v0 = vunpack.c.l.b16 %v4009_v41 }
 0x138   : > { %v3992_v37 = vpop.f32.mrf.mxu1 }
 0x140   : > { %v1371_v1 = vpop.f32.mrf.mxu1 }
 0x141   : > { %v1372_v46 = vadd.f32 %v1371_v1, %v1203_v19  ;;  %v4021_v19 = vpop.f32.mrf.mxu2 }
 0x143   : > { %1410 = vmatmul.bf16.gmra.mxu1 %v854_v32  ;;  %v1015_v32 = vpack.c.b16 %v971_v36, %v969_v0  ;;  %v1531_v14 = vmax.f32 %v1372_v46, 0.0  ;;  %v688_v0 = vld [vmem:[%s3716_s23 + $0x158] sm:$0xff]  ;;  %v4028_v36 = vpack.c.bf16 %v686_v49, %v685_v5  ;;  %v814_v5 = vunpack.c.h.b16 %v3738_v11 }
 0x144   : > { %v4030_v30 = vpack.c.bf16 %v688_v0, %v687_v20  ;;  %v816_v20 = vunpack.c.h.b16 %v3740_v12  ;;  %v691_v0 = vld [vmem:[%s3716_s23 + $0x170] sm:$0xff] }
 0x145   : > { %1326 = vmatmul.bf16.gmra.mxu3 %v1015_v32  ;;  %v973_v27 = vunpack.c.l.b16 %v4028_v36 }
 0x146   : > { %v858_v31 = vpack.c.b16 %v816_v20, %v814_v5 }
 0x148   : > { %v1373_v17 = vpop.f32.mrf.mxu1 }
 0x149   : > { %v1374_v9 = vadd.f32 %v1373_v17, %v1205_v40  ;;  %v1208_v17 = vadd.f32 %v4001_v45, %v1207_v62  ;;  %v4037_v49 = vpop.f32.mrf.mxu2 }
 0x14b   : > { %v1532_v50 = vmax.f32 %v1374_v9, 0.0 }
 0x14d   : > { %v1595_v41 = vpack.c.bf16 %v1532_v50, %v1531_v14  ;;  %v1219_v50 = vpop.f32.mrf.mxu0 }
 0x14f   : > { %1703 = vmatmul.bf16.vlgmr.msrb.gmra.mxu2 %v1595_v41  ;;  %v975_v41 = vunpack.c.l.b16 %v4030_v30 }
 0x150   : > { %v1376_v1 = vpop.f32.mrf.mxu1 }
 0x151   : > { %v1377_v40 = vadd.f32 %v1376_v1, %v1208_v17  ;;  %v1017_v32 = vpack.c.b16 %v975_v41, %v973_v27  ;;  %v689_v1 = vld [vmem:[%s3716_s23 + $0x160] sm:$0xff]  ;;  %v690_v17 = vld [vmem:[%s3716_s23 + $0x168] sm:$0xff]  ;;  %v1213_v27 = vadd.f32 %v4001_v45, %v1212_v42  ;;  %v692_v41 = vld [vmem:[%s3716_s23 + $0x178] sm:$0xff]  ;;  %v4048_v12 = vpop.f32.mrf.mxu2 }
 0x152   : > { %v4046_v11 = vpack.c.bf16 %v692_v41, %v691_v0 }
 0x153   : > { %1415 = vmatmul.bf16.gmra.mxu1 %v856_v8  ;;  %v1533_v62 = vmax.f32 %v1377_v40, 0.0 }
 0x154   : > { %4667 = vst [vmem:[#allocation34_spill] sm:$0xff] %v4046_v11 }
 0x155   : > { %1331 = vmatmul.bf16.gmra.mxu3 %v1017_v32  ;;  %v979_v32 = vunpack.c.l.b16 %v4046_v11  ;;  %v694_v11 = vld [vmem:[%s3716_s23 + $0x188] sm:$0xff] }
 0x158   : > { %v1378_v46 = vpop.f32.mrf.mxu1 }
 0x159   : > { %v1379_v9 = vadd.f32 %v1378_v46, %v1210_v28  ;;  %v4044_v28 = vpack.c.bf16 %v690_v17, %v689_v1  ;;  %v1222_v46 = vpop.f32.mrf.mxu0  ;;  %v820_v1 = vunpack.c.h.b16 %v3750_v25  ;;  %v4055_v41 = vpop.f32.mrf.mxu2 }
 0x15b   : > { %v1534_v14 = vmax.f32 %v1379_v9, 0.0  ;;  %4666 = vst [vmem:[#allocation33_spill] sm:$0xff] %v4044_v28  ;;  %v977_v40 = vunpack.c.l.b16 %v4044_v28  ;;  %v1215_v9 = vadd.f32 %v4001_v45, %v1214_v57  ;;  %v695_v28 = vld [vmem:[%s3716_s23 + $0x190] sm:$0xff] }
 0x15d   : > { %v1596_v39 = vpack.c.bf16 %v1534_v14, %v1533_v62  ;;  %v1019_v42 = vpack.c.b16 %v979_v32, %v977_v40  ;;  %v1218_v40 = vadd.f32 %v4001_v45, %v1217_v47  ;;  %v696_v32 = vld [vmem:[%s3716_s23 + $0x198] sm:$0xff] }
 0x15f   : > { %1708 = vmatmul.bf16.gmra.mxu2 %v1596_v39 }
 0x160   : > { %v1381_v8 = vpop.f32.mrf.mxu1 }
 0x161   : > { %v1382_v62 = vadd.f32 %v1381_v8, %v1213_v27  ;;  %v1224_v8 = vpop.f32.mrf.mxu0  ;;  %v693_v27 = vld [vmem:[%s3716_s23 + $0x180] sm:$0xff]  ;;  %v4069_v47 = vpop.f32.mrf.mxu2 }
 0x163   : > { %1420 = vmatmul.bf16.gmra.mxu1 %v858_v31  ;;  %v1535_v20 = vmax.f32 %v1382_v62, 0.0  ;;  %v818_v31 = vunpack.c.h.b16 %v3748_v24  ;;  %v4064_v24 = vpack.c.bf16 %v696_v32, %v695_v28  ;;  %v699_v32 = vld [vmem:[%s3716_s23 + $0x1b0] sm:$0xff] }
 0x165   : > { %1336 = vmatmul.bf16.gmra.mxu3 %v1019_v42  ;;  %v860_v0 = vpack.c.b16 %v820_v1, %v818_v31  ;;  %v983_v62 = vunpack.c.l.b16 %v4064_v24  ;;  %v822_v1 = vunpack.c.h.b16 %v3778_v54 }
 0x168   : > { %v1383_v14 = vpop.f32.mrf.mxu1 }
 0x169   : > { %v1384_v5 = vadd.f32 %v1383_v14, %v1215_v9  ;;  %v4062_v9 = vpack.c.bf16 %v694_v11, %v693_v27  ;;  %v1220_v14 = vadd.f32 %v4001_v45, %v1219_v50  ;;  %v1227_v31 = vpop.f32.mrf.mxu0  ;;  %v697_v27 = vld [vmem:[%s3716_s23 + $0x1a0] sm:$0xff] }
 0x16b   : > { %v1536_v39 = vmax.f32 %v1384_v5, 0.0  ;;  %v981_v25 = vunpack.c.l.b16 %v4062_v9 }
 0x16d   : > { %v1597_v17 = vpack.c.bf16 %v1536_v39, %v1535_v20  ;;  %v1021_v20 = vpack.c.b16 %v983_v62, %v981_v25  ;;  %v1223_v25 = vadd.f32 %v4001_v45, %v1222_v46  ;;  %v4077_v62 = vpop.f32.mrf.mxu2 }
 0x16f   : > { %1713 = vmatmul.bf16.gmra.mxu2 %v1597_v17  ;;  %v824_v17 = vunpack.c.h.b16 %v3780_v55 }
 0x170   : > { %v1386_v57 = vpop.f32.mrf.mxu1 }
 0x171   : > { %v1387_v42 = vadd.f32 %v1386_v57, %v1218_v40  ;;  %v862_v50 = vpack.c.b16 %v824_v17, %v822_v1  ;;  %v698_v40 = vld [vmem:[%s3716_s23 + $0x1a8] sm:$0xff] }
 0x173   : > { %1425 = vmatmul.bf16.gmra.mxu1 %v860_v0  ;;  %v1537_v11 = vmax.f32 %v1387_v42, 0.0  ;;  %v4080_v42 = vpack.c.bf16 %v698_v40, %v697_v27  ;;  %v828_v27 = vunpack.c.h.b16 %v3807_v22 }
 0x175   : > { %1341 = vmatmul.bf16.gmra.mxu3 %v1021_v20  ;;  %4668 = vst [vmem:[#allocation35_spill] sm:$0xff] %v4080_v42  ;;  %v985_v55 = vunpack.c.l.b16 %v4080_v42  ;;  %v703_v42 = vld [vmem:[%s3716_s23 + $0x1d0] sm:$0xff] }
 0x178   : > { %v1388_v5 = vpop.f32.mrf.mxu1 }
 0x179   : > { %v1389_v39 = vadd.f32 %v1388_v5, %v1220_v14  ;;  %v700_v14 = vld [vmem:[%s3716_s23 + $0x1b8] sm:$0xff]  ;;  %v1229_v5 = vpop.f32.mrf.mxu0 }
 0x17a   : > { %v4082_v54 = vpack.c.bf16 %v700_v14, %v699_v32  ;;  %v4089_v32 = vpop.f32.mrf.mxu2 }
 0x17b   : > { %v1538_v28 = vmax.f32 %v1389_v39, 0.0  ;;  %v1225_v39 = vadd.f32 %v4001_v45, %v1224_v8 }
 0x17c   : > { %4669 = vst [vmem:[#allocation36_spill] sm:$0xff] %v4082_v54  ;;  %v987_v20 = vunpack.c.l.b16 %v4082_v54  ;;  %v702_v54 = vld [vmem:[%s3716_s23 + $0x1c8] sm:$0xff] }
 0x17d   : > { %v1598_v0 = vpack.c.bf16 %v1538_v28, %v1537_v11 }
 0x17e   : > { %v1023_v46 = vpack.c.b16 %v987_v20, %v985_v55  ;;  %v1228_v55 = vadd.f32 %v4001_v45, %v1227_v31  ;;  %v704_v20 = vld [vmem:[%s3716_s23 + $0x1d8] sm:$0xff] }
 0x17f   : > { %1718 = vmatmul.bf16.gmra.mxu2 %v1598_v0 }
 0x180   : > { %v1391_v57 = vpop.f32.mrf.mxu1 }
 0x181   : > { %v1392_v11 = vadd.f32 %v1391_v57, %v1223_v25  ;;  %v1232_v14 = vpop.f32.mrf.mxu0  ;;  %v701_v25 = vld [vmem:[%s3716_s23 + $0x1c0] sm:$0xff] }
 0x183   : > { %1430 = vmatmul.bf16.gmra.mxu1 %v862_v50  ;;  %v1539_v17 = vmax.f32 %v1392_v11, 0.0  ;;  %v826_v50 = vunpack.c.h.b16 %v3805_v21  ;;  %v4098_v21 = vpack.c.bf16 %v704_v20, %v703_v42  ;;  %v830_v42 = vunpack.c.h.b16 %v3758_v35  ;;  %v3083_v35 = vld [vmem:[#allocation11 + $0x30] sm:$0xff] }
 0x185   : > { %1346 = vmatmul.bf16.gmra.mxu3 %v1023_v46  ;;  %v864_v8 = vpack.c.b16 %v828_v27, %v826_v50  ;;  %4671 = vst [vmem:[#allocation38_spill] sm:$0xff] %v4098_v21  ;;  %v991_v11 = vunpack.c.l.b16 %v4098_v21 }
 0x188   : > { %v1393_v28 = vpop.f32.mrf.mxu1 }
 0x189   : > { %v1394_v1 = vadd.f32 %v1393_v28, %v1225_v39  ;;  %v4096_v39 = vpack.c.bf16 %v702_v54, %v701_v25  ;;  %v1230_v28 = vadd.f32 %v4001_v45, %v1229_v5  ;;  %v3084_v25 = vld [vmem:[#allocation11 + $0x38] sm:$0xff] }
 0x18a   : > { %2028 = vmatpush.bf16.msrb.mxu3 %v3084_v25  ;;  %v3082_v25 = vld [vmem:[#allocation11 + $0x28] sm:$0xff] }
 0x18b   : > { %v1540_v0 = vmax.f32 %v1394_v1, 0.0  ;;  %4670 = vst [vmem:[#allocation37_spill] sm:$0xff] %v4096_v39  ;;  %v989_v22 = vunpack.c.l.b16 %v4096_v39  ;;  %v4103_v1 = vpop.f32.mrf.mxu2 }
 0x18d   : > { %v1599_v40 = vpack.c.bf16 %v1540_v0, %v1539_v17  ;;  %v1234_v0 = vpop.f32.mrf.mxu0  ;;  %v1025_v50 = vpack.c.b16 %v991_v11, %v989_v22  ;;  %v705_v22 = vld [vmem:[%s3716_s23 + $0x1e0] sm:$0xff]  ;;  %v706_v11 = vld [vmem:[%s3716_s23 + $0x1e8] sm:$0xff] }
 0x18e   : > { %2029 = vmatpush.bf16.msrb.mxu3 %v3083_v35 }
 0x18f   : > { %1723 = vmatmul.bf16.gmra.mxu2 %v1599_v40  ;;  %v832_v40 = vunpack.c.h.b16 %v3761_v38  ;;  %v4114_v38 = vpack.c.bf16 %v706_v11, %v705_v22  ;;  %v834_v22 = vunpack.c.h.b16 %v3788_v2  ;;  %v836_v11 = vunpack.c.h.b16 %v3790_v3 }
 0x190   : > { %v1396_v57 = vpop.f32.mrf.mxu1 }
 0x191   : > { %v1397_v46 = vadd.f32 %v1396_v57, %v1228_v55  ;;  %v866_v5 = vpack.c.b16 %v832_v40, %v830_v42 }
 0x192   : > { %2030 = vmatpush.bf16.msrb.mxu3 %v3082_v25 }
 0x193   : > { %1435 = vmatmul.bf16.gmra.mxu1 %v864_v8  ;;  %v1541_v54 = vmax.f32 %v1397_v46, 0.0  ;;  %v4107_v55 = vpop.f32.mrf.mxu2  ;;  %v1233_v46 = vadd.f32 %v4001_v45, %v1232_v14 }
 0x195   : > { %1351 = vmatmul.bf16.gmra.mxu3 %v1025_v50  ;;  %v1237_v20 = vpop.f32.mrf.mxu0 }
 0x198   : > { %v1398_v17 = vpop.f32.mrf.mxu1 }
 0x199   : > { %v1399_v31 = vadd.f32 %v1398_v17, %v1230_v28  ;;  %v707_v28 = vld [vmem:[%s3716_s23 + $0x1f0] sm:$0xff]  ;;  %v708_v17 = vld [vmem:[%s3716_s23 + $0x1f8] sm:$0xff]  ;;  %s2883_s23 = sshll.u32 %s3705_s21, 3 }
 0x19a   : > { %v4116_v50 = vpack.c.bf16 %v708_v17, %v707_v28  ;;  %v3081_v28 = vld [vmem:[#allocation11 + $0x20] sm:$0xff]  ;;  %s545_s6 = scalar_lea.vmem [#allocation14], %s2883_s23 }
 0x19b   : > { %v1542_v27 = vmax.f32 %v1399_v31, 0.0  ;;  %v993_v31 = vunpack.c.l.b16 %v4114_v38  ;;  %v4121_v39 = vpop.f32.mrf.mxu2  ;;  %2031 = vmatpush.bf16.msrb.mxu3 %v3081_v28  ;;  %v3077_v28 = vld [vmem:[#allocation11] sm:$0xff]  ;;  %s2727_s8 = sshll.u32 %s545_s6, 4  ;;  %s2728_s8 = int_to_ptr.vmem [resolvable:$true] %s2727_s8 }
 0x19d   : > { %v1600_v8 = vpack.c.bf16 %v1542_v27, %v1541_v54  ;;  %v995_v54 = vunpack.c.l.b16 %v4116_v50  ;;  %v1235_v27 = vadd.f32 %v4001_v45, %v1234_v0  ;;  %v1239_v35 = vpop.f32.mrf.mxu0  ;;  %v868_v0 = vpack.c.b16 %v836_v11, %v834_v22 }
 0x19e   : > { %v1240_v3 = vadd.f32 %v4001_v45, %v1239_v35  ;;  %v934_v22 = vunpack.c.h.b16 %v3815_v33  ;;  %v936_v11 = vunpack.c.h.b16 %v3817_v34 }
 0x19f   : > { %1728 = vmatmul.bf16.gmra.mxu2 %v1600_v8  ;;  %v1027_v8 = vpack.c.b16 %v995_v54, %v993_v31  ;;  %v4125_v31 = vpop.f32.mrf.mxu3  ;;  %v3079_v54 = vld [vmem:[#allocation11 + $0x10] sm:$0xff] }
 0x1a0   : > { %v1401_v57 = vpop.f32.mrf.mxu1  ;;  %v998_v35 = vpack.c.b16 %v936_v11, %v934_v22  ;;  %v940_v22 = vunpack.c.h.b16 %v3833_v61 }
 0x1a1   : > { %v1402_v42 = vadd.f32 %v1401_v57, %v1233_v46  ;;  %v3080_v46 = vld [vmem:[#allocation11 + $0x18] sm:$0xff] }
 0x1a2   : > { %2032 = vmatpush.bf16.msrb.mxu3 %v3080_v46 }
 0x1a3   : > { %1440 = vmatmul.bf16.gmra.mxu1 %v866_v5  ;;  %v1543_v14 = vmax.f32 %v1402_v42, 0.0 }
 0x1a5   : > { %1356 = vmatmul.bf16.gmra.mxu3 %v1027_v8  ;;  %v1242_v2 = vpop.f32.mrf.mxu0  ;;  %v3078_v8 = vld [vmem:[#allocation11 + $0x8] sm:$0xff] }
 0x1a6   : > { %2033 = vmatpush.bf16.msrb.mxu3 %v3079_v54 }
 0x1a8   : > { %v1403_v40 = vpop.f32.mrf.mxu1 }
 0x1a9   : > { %v1404_v21 = vadd.f32 %v1403_v40, %v1235_v27  ;;  %v4128_v27 = vpop.f32.mrf.mxu2 }
 0x1aa   : > { %2034 = vmatpush.bf16.msrb.mxu3 %v3078_v8 }
 0x1ab   : > { %v1544_v5 = vmax.f32 %v1404_v21, 0.0  ;;  %v1238_v21 = vadd.f32 %v4001_v45, %v1237_v20  ;;  %v4133_v20 = vpop.f32.mrf.mxu3 }
 0x1ad   : > { %v1601_v17 = vpack.c.bf16 %v1544_v5, %v1543_v14 }
 0x1ae   : > { %2035 = vmatpush.bf16.msrb.mxu3 %v3077_v28 }
 0x1af   : > { %1733 = vmatmul.bf16.gmra.mxu2 %v1601_v17 }
 0x1b0   : > { %v1406_v57 = vpop.f32.mrf.mxu1 }
 0x1b1   : > { %v1407_v42 = vadd.f32 %v1406_v57, %v1238_v21  ;;  %v1244_v57 = vpop.f32.mrf.mxu0  ;;  %v1243_v21 = vadd.f32 %v4001_v45, %v1242_v2 }
 0x1b2   : > { %v1245_v33 = vadd.f32 %v4001_v45, %v1244_v57 }
 0x1b3   : > { %1445 = vmatmul.bf16.gmra.mxu1 %v868_v0  ;;  %v1545_v14 = vmax.f32 %v1407_v42, 0.0  ;;  %v4135_v0 = vpop.f32.mrf.mxu2  ;;  %v4138_v54 = vpop.f32.mrf.mxu3 }
 0x1b4   : > { %4672 = vst [vmem:[#allocation39_spill] sm:$0xff] %v4138_v54 }
 0x1b8   : > { %v1408_v40 = vpop.f32.mrf.mxu1 }
 0x1b9   : > { %v1409_v25 = vadd.f32 %v1408_v40, %v1240_v3  ;;  %v1247_v8 = vpop.f32.mrf.mxu0 }
 0x1ba   : > { %v1248_v57 = vadd.f32 %v4001_v45, %v1247_v8 }
 0x1bb   : > { %v1546_v5 = vmax.f32 %v1409_v25, 0.0  ;;  %v4141_v40 = vpop.f32.mrf.mxu2 }
 0x1bd   : > { %v1602_v17 = vpack.c.bf16 %v1546_v5, %v1545_v14  ;;  %v938_v5 = vunpack.c.h.b16 %v3831_v60 }
 0x1bf   : > { %1738 = vmatmul.bf16.gmra.mxu2 %v1602_v17  ;;  %v1000_v2 = vpack.c.b16 %v940_v22, %v938_v5  ;;  %v4145_v17 = vpop.f32.mrf.mxu3 }
 0x1c0   : > { %v1411_v46 = vpop.f32.mrf.mxu1  ;;  %4673 = vst [vmem:[#allocation40_spill] sm:$0xff] %v4145_v17 }
 0x1c1   : > { %v1412_v3 = vadd.f32 %v1411_v46, %v1243_v21  ;;  %v1249_v46 = vpop.f32.mrf.mxu0  ;;  %v4151_v21 = vld [vmem:[%s4613_s5] ss:$0 sm:$0xff] }
 0x1c2   : > { %v1250_v60 = vadd.f32 %v4001_v45, %v1249_v46 }
 0x1c3   : > { %1450 = vmatmul.bf16.gmra.mxu1 %v998_v35  ;;  %v1547_v25 = vmax.f32 %v1412_v3, 0.0 }
 0x1c8   : > { %v1413_v34 = vpop.f32.mrf.mxu1 }
 0x1c9   : > { %v1414_v42 = vadd.f32 %v1413_v34, %v1245_v33 }
 0x1cb   : > { %v1548_v14 = vmax.f32 %v1414_v42, 0.0 }
 0x1cd   : > { %v1603_v11 = vpack.c.bf16 %v1548_v14, %v1547_v25  ;;  %v942_v25 = vunpack.c.h.b16 %v3846_v23  ;;  %v4156_v14 = vpop.f32.mrf.mxu3  ;;  %v1253_v23 = vadd.f32 %v4001_v45, %v3893_v43 }
 0x1cf   : > { %1743 = vmatmul.bf16.gmra.mxu2 %v1603_v11  ;;  %v944_v11 = vunpack.c.h.b16 %v3848_v26 }
 0x1d0   : > { %v1416_v28 = vpop.f32.mrf.mxu1 }
 0x1d1   : > { %v1417_v33 = vadd.f32 %v1416_v28, %v1248_v57  ;;  %v1002_v57 = vpack.c.b16 %v944_v11, %v942_v25 }
 0x1d2   : > { %v1704_v35 = vpop.f32.mrf.mxu2 }
 0x1d3   : > { %1455 = vmatmul.bf16.gmra.mxu1 %v1000_v2  ;;  %v1705_v3 = vadd.f32 %v4151_v21, %v1704_v35  ;;  %v1549_v8 = vmax.f32 %v1417_v33, 0.0  ;;  %v1255_v33 = vadd.f32 %v4001_v45, %v3915_v6 }
 0x1d5   : > { %v1864_v2 = vmax.f32 %v1705_v3, 0.0 }
 0x1d8   : > { %v1418_v61 = vpop.f32.mrf.mxu1 }
 0x1d9   : > { %v1419_v34 = vadd.f32 %v1418_v61, %v1250_v60  ;;  %v4160_v60 = vpop.f32.mrf.mxu3 }
 0x1da   : > { %v1706_v42 = vpop.f32.mrf.mxu2 }
 0x1db   : > { %v1550_v5 = vmax.f32 %v1419_v34, 0.0  ;;  %v1707_v22 = vadd.f32 %v4151_v21, %v1706_v42 }
 0x1dd   : > { %v1865_v17 = vmax.f32 %v1707_v22, 0.0  ;;  %v1604_v54 = vpack.c.bf16 %v1550_v5, %v1549_v8  ;;  %v948_v5 = vunpack.c.h.b16 %v3862_v53 }
 0x1df   : > { %1748 = vmatmul.bf16.gmra.mxu2 %v1604_v54  ;;  %v1928_v28 = vpack.c.bf16 %v1865_v17, %v1864_v2  ;;  %v946_v17 = vunpack.c.h.b16 %v3860_v52  ;;  %v1258_v52 = vadd.f32 %v4001_v45, %v3918_v15 }
 0x1e0   : > { %v1421_v46 = vpop.f32.mrf.mxu1 }
 0x1e1   : > { %2036 = vmatmul.bf16.vlgmr.msrb.gmra.mxu3 %v1928_v28  ;;  %v1422_v61 = vadd.f32 %v1421_v46, %v1253_v23  ;;  %v4170_v2 = vpop.f32.mrf.mxu3  ;;  %v1004_v28 = vpack.c.b16 %v948_v5, %v946_v17 }
 0x1e2   : > { %v1709_v35 = vpop.f32.mrf.mxu2 }
 0x1e3   : > { %1460 = vmatmul.bf16.gmra.mxu1 %v1002_v57  ;;  %v1710_v3 = vadd.f32 %v4151_v21, %v1709_v35  ;;  %v1551_v42 = vmax.f32 %v1422_v61, 0.0  ;;  %v1260_v35 = vadd.f32 %v4001_v45, %v3942_v58 }
 0x1e5   : > { %v1866_v22 = vmax.f32 %v1710_v3, 0.0 }
 0x1e8   : > { %v1423_v26 = vpop.f32.mrf.mxu1 }
 0x1e9   : > { %v1424_v34 = vadd.f32 %v1423_v26, %v1255_v33  ;;  %v4176_v33 = vpop.f32.mrf.mxu3 }
 0x1ea   : > { %v1711_v54 = vpop.f32.mrf.mxu2 }
 0x1eb   : > { %v1552_v25 = vmax.f32 %v1424_v34, 0.0  ;;  %v1712_v8 = vadd.f32 %v4151_v21, %v1711_v54  ;;  %v950_v34 = vunpack.c.h.b16 %v3877_v16  ;;  %v1263_v16 = vadd.f32 %v4001_v45, %v3948_v7 }
 0x1ed   : > { %v1867_v11 = vmax.f32 %v1712_v8, 0.0  ;;  %v1605_v43 = vpack.c.bf16 %v1552_v25, %v1551_v42  ;;  %v952_v25 = vunpack.c.h.b16 %v3879_v18 }
 0x1ef   : > { %1753 = vmatmul.bf16.gmra.mxu2 %v1605_v43  ;;  %v1929_v6 = vpack.c.bf16 %v1867_v11, %v1866_v22  ;;  %v1006_v22 = vpack.c.b16 %v952_v25, %v950_v34 }
 0x1f0   : > { %v1426_v57 = vpop.f32.mrf.mxu1 }
 0x1f1   : > { %2041 = vmatmul.bf16.gmra.mxu3 %v1929_v6  ;;  %v1427_v23 = vadd.f32 %v1426_v57, %v1258_v52  ;;  %v4182_v6 = vpop.f32.mrf.mxu3 }
 0x1f2   : > { %v1714_v46 = vpop.f32.mrf.mxu2 }
 0x1f3   : > { %1465 = vmatmul.bf16.gmra.mxu1 %v1004_v28  ;;  %v1715_v61 = vadd.f32 %v4151_v21, %v1714_v46  ;;  %v1553_v54 = vmax.f32 %v1427_v23, 0.0  ;;  %v1265_v28 = vadd.f32 %v4001_v45, %v3972_v48  ;;  %v954_v23 = vunpack.c.h.b16 %v3899_v51 }
 0x1f4   : > { %v1268_v51 = vadd.f32 %v4001_v45, %v3978_v13 }
 0x1f5   : > { %v1868_v15 = vmax.f32 %v1715_v61, 0.0 }
 0x1f8   : > { %v1428_v53 = vpop.f32.mrf.mxu1 }
 0x1f9   : > { %v1429_v26 = vadd.f32 %v1428_v53, %v1260_v35  ;;  %v4192_v34 = vpop.f32.mrf.mxu3 }
 0x1fa   : > { %v1716_v3 = vpop.f32.mrf.mxu2 }
 0x1fb   : > { %v1554_v17 = vmax.f32 %v1429_v26, 0.0  ;;  %v1717_v42 = vadd.f32 %v4151_v21, %v1716_v3  ;;  %v956_v3 = vunpack.c.h.b16 %v3901_v56  ;;  %v1270_v56 = vadd.f32 %v4001_v45, %v3992_v37 }
 0x1fd   : > { %v1869_v8 = vmax.f32 %v1717_v42, 0.0  ;;  %v1606_v5 = vpack.c.bf16 %v1554_v17, %v1553_v54  ;;  %v1008_v42 = vpack.c.b16 %v956_v3, %v954_v23  ;;  %v1275_v3 = vadd.f32 %v4001_v45, %v3974_v59 }
 0x1ff   : > { %1758 = vmatmul.bf16.gmra.mxu2 %v1606_v5  ;;  %v1930_v58 = vpack.c.bf16 %v1869_v8, %v1868_v15 }
 0x200   : > { %v1431_v11 = vpop.f32.mrf.mxu1 }
 0x201   : > { %2046 = vmatmul.bf16.gmra.mxu3 %v1930_v58  ;;  %v1432_v57 = vadd.f32 %v1431_v11, %v1263_v16  ;;  %v4196_v8 = vpop.f32.mrf.mxu3  ;;  %v958_v16 = vunpack.c.h.b16 %v3924_v29  ;;  %v1273_v29 = vadd.f32 %v4001_v45, %v3946_v4 }
 0x202   : > { %v1719_v43 = vpop.f32.mrf.mxu2 }
 0x203   : > { %1470 = vmatmul.bf16.gmra.mxu1 %v1006_v22  ;;  %v1720_v46 = vadd.f32 %v4151_v21, %v1719_v43  ;;  %v1555_v53 = vmax.f32 %v1432_v57, 0.0 }
 0x205   : > { %v1870_v7 = vmax.f32 %v1720_v46, 0.0  ;;  %v960_v46 = vunpack.c.h.b16 %v3926_v10 }
 0x207   : > { %v1010_v37 = vpack.c.b16 %v960_v46, %v958_v16  ;;  %v3091_v46 = vld [vmem:[#allocation12 + $0x30] sm:$0xff] }
 0x208   : > { %v1433_v18 = vpop.f32.mrf.mxu1 }
 0x209   : > { %v1434_v52 = vadd.f32 %v1433_v18, %v1265_v28 }
 0x20a   : > { %v1721_v35 = vpop.f32.mrf.mxu2 }
 0x20b   : > { %v1556_v61 = vmax.f32 %v1434_v52, 0.0  ;;  %v1722_v26 = vadd.f32 %v4151_v21, %v1721_v35 }
 0x20d   : > { %v1871_v54 = vmax.f32 %v1722_v26, 0.0  ;;  %v1607_v17 = vpack.c.bf16 %v1556_v61, %v1555_v53  ;;  %v4204_v61 = vpop.f32.mrf.mxu3 }
 0x20f   : > { %1763 = vmatmul.bf16.gmra.mxu2 %v1607_v17  ;;  %v1931_v48 = vpack.c.bf16 %v1871_v54, %v1870_v7 }
 0x210   : > { %v1436_v25 = vpop.f32.mrf.mxu1 }
 0x211   : > { %2051 = vmatmul.bf16.gmra.mxu3 %v1931_v48  ;;  %v1437_v5 = vadd.f32 %v1436_v25, %v1268_v51  ;;  %v962_v25 = vunpack.c.h.b16 %v3965_v44  ;;  %v4674_v44 = vld [vmem:[#allocation26_spill] sm:$0xff] }
 0x212   : > { %v1724_v15 = vpop.f32.mrf.mxu2 }
 0x213   : > { %1475 = vmatmul.bf16.gmra.mxu1 %v1008_v42  ;;  %v1725_v22 = vadd.f32 %v4151_v21, %v1724_v15  ;;  %v1557_v28 = vmax.f32 %v1437_v5, 0.0  ;;  %v964_v5 = vunpack.c.h.b16 %v3967_v63 }
 0x215   : > { %v1872_v13 = vmax.f32 %v1725_v22, 0.0  ;;  %v4211_v42 = vpop.f32.mrf.mxu3 }
 0x218   : > { %v1438_v58 = vpop.f32.mrf.mxu1 }
 0x219   : > { %v1439_v11 = vadd.f32 %v1438_v58, %v1270_v56 }
 0x21a   : > { %v1726_v43 = vpop.f32.mrf.mxu2 }
 0x21b   : > { %v1558_v57 = vmax.f32 %v1439_v11, 0.0  ;;  %v1727_v18 = vadd.f32 %v4151_v21, %v1726_v43  ;;  %v1012_v11 = vpack.c.b16 %v964_v5, %v962_v25  ;;  %v3089_v5 = vld [vmem:[#allocation12 + $0x20] sm:$0xff] }
 0x21d   : > { %v1873_v52 = vmax.f32 %v1727_v18, 0.0  ;;  %v1608_v35 = vpack.c.bf16 %v1558_v57, %v1557_v28  ;;  %v3092_v28 = vld [vmem:[#allocation12 + $0x38] sm:$0xff]  ;;  %v4216_v57 = vpop.f32.mrf.mxu3  ;;  %v1278_v18 = vadd.f32 %v4001_v45, %v4674_v44  ;;  %v1285_v44 = vadd.f32 %v4001_v45, %v4021_v19 }
 0x21e   : > { %2361 = vmatpush.bf16.msrb.mxu0 %v3092_v28  ;;  %v3087_v28 = vld [vmem:[#allocation12 + $0x10] sm:$0xff] }
 0x21f   : > { %1768 = vmatmul.bf16.gmra.mxu2 %v1608_v35  ;;  %v1932_v23 = vpack.c.bf16 %v1873_v52, %v1872_v13  ;;  %v4675_v13 = vld [vmem:[#allocation29_spill] sm:$0xff] }
 0x220   : > { %v1441_v53 = vpop.f32.mrf.mxu1  ;;  %v1280_v63 = vadd.f32 %v4001_v45, %v4675_v13 }
 0x221   : > { %2056 = vmatmul.bf16.gmra.mxu3 %v1932_v23  ;;  %v1442_v7 = vadd.f32 %v1441_v53, %v1273_v29 }
 0x222   : > { %v1729_v26 = vpop.f32.mrf.mxu2  ;;  %2362 = vmatpush.bf16.msrb.mxu0 %v3091_v46 }
 0x223   : > { %1480 = vmatmul.bf16.gmra.mxu1 %v1010_v37  ;;  %v1730_v54 = vadd.f32 %v4151_v21, %v1729_v26  ;;  %v1559_v15 = vmax.f32 %v1442_v7, 0.0  ;;  %v4676_v26 = vld [vmem:[#allocation27_spill] sm:$0xff] }
 0x224   : > { %v966_v29 = vunpack.c.h.b16 %v4676_v26 }
 0x225   : > { %v1874_v4 = vmax.f32 %v1730_v54, 0.0 }
 0x228   : > { %v1443_v10 = vpop.f32.mrf.mxu1 }
 0x229   : > { %v1444_v17 = vadd.f32 %v1443_v10, %v1275_v3  ;;  %v3090_v3 = vld [vmem:[#allocation12 + $0x28] sm:$0xff] }
 0x22a   : > { %v1731_v48 = vpop.f32.mrf.mxu2  ;;  %2363 = vmatpush.bf16.msrb.mxu0 %v3090_v3 }
 0x22b   : > { %v1560_v51 = vmax.f32 %v1444_v17, 0.0  ;;  %v1732_v56 = vadd.f32 %v4151_v21, %v1731_v48  ;;  %v4677_v17 = vld [vmem:[#allocation28_spill] sm:$0xff] }
 0x22c   : > { %v968_v48 = vunpack.c.h.b16 %v4677_v17 }
 0x22d   : > { %v1875_v58 = vmax.f32 %v1732_v56, 0.0  ;;  %v1609_v22 = vpack.c.bf16 %v1560_v51, %v1559_v15  ;;  %v4226_v56 = vpop.f32.mrf.mxu3 }
 0x22e   : > { %2364 = vmatpush.bf16.msrb.mxu0 %v3089_v5 }
 0x22f   : > { %1773 = vmatmul.bf16.gmra.mxu2 %v1609_v22  ;;  %v1933_v59 = vpack.c.bf16 %v1875_v58, %v1874_v4  ;;  %v1014_v58 = vpack.c.b16 %v968_v48, %v966_v29  ;;  %v3085_v48 = vld [vmem:[#allocation12] sm:$0xff] }
 0x230   : > { %v1446_v43 = vpop.f32.mrf.mxu1 }
 0x231   : > { %2061 = vmatmul.bf16.gmra.mxu3 %v1933_v59  ;;  %v1447_v52 = vadd.f32 %v1446_v43, %v1278_v18  ;;  %v4678_v43 = vld [vmem:[#allocation32_spill] sm:$0xff] }
 0x232   : > { %v1734_v16 = vpop.f32.mrf.mxu2 }
 0x233   : > { %1485 = vmatmul.bf16.gmra.mxu1 %v1012_v11  ;;  %v1735_v23 = vadd.f32 %v4151_v21, %v1734_v16  ;;  %v1561_v7 = vmax.f32 %v1447_v52, 0.0  ;;  %v3088_v11 = vld [vmem:[#allocation12 + $0x18] sm:$0xff]  ;;  %v1283_v16 = vadd.f32 %v4001_v45, %v4678_v43 }
 0x234   : > { %2365 = vmatpush.bf16.msrb.mxu0 %v3088_v11 }
 0x235   : > { %v1876_v25 = vmax.f32 %v1735_v23, 0.0  ;;  %v4232_v46 = vpop.f32.mrf.mxu3  ;;  %v4679_v23 = vld [vmem:[#allocation30_spill] sm:$0xff] }
 0x238   : > { %v1448_v35 = vpop.f32.mrf.mxu1  ;;  %2366 = vmatpush.bf16.msrb.mxu0 %v3087_v28 }
 0x239   : > { %v1449_v37 = vadd.f32 %v1448_v35, %v1280_v63 }
 0x23a   : > { %v1736_v53 = vpop.f32.mrf.mxu2 }
 0x23b   : > { %v1562_v10 = vmax.f32 %v1449_v37, 0.0  ;;  %v1737_v54 = vadd.f32 %v4151_v21, %v1736_v53  ;;  %v970_v37 = vunpack.c.h.b16 %v4679_v23  ;;  %v3086_v53 = vld [vmem:[#allocation12 + $0x8] sm:$0xff] }
 0x23c   : > { %2367 = vmatpush.bf16.msrb.mxu0 %v3086_v53 }
 0x23d   : > { %v1877_v15 = vmax.f32 %v1737_v54, 0.0  ;;  %v1610_v51 = vpack.c.bf16 %v1562_v10, %v1561_v7  ;;  %v4680_v7 = vld [vmem:[#allocation31_spill] sm:$0xff]  ;;  %v4238_v5 = vpop.f32.mrf.mxu3 }
 0x23e   : > { %v972_v10 = vunpack.c.h.b16 %v4680_v7  ;;  %v1295_v7 = vadd.f32 %v4001_v45, %v4069_v47 }
 0x23f   : > { %1778 = vmatmul.bf16.gmra.mxu2 %v1610_v51  ;;  %v1934_v4 = vpack.c.bf16 %v1877_v15, %v1876_v25 }
 0x240   : > { %v1451_v22 = vpop.f32.mrf.mxu1  ;;  %v1016_v15 = vpack.c.b16 %v972_v10, %v970_v37  ;;  %2368 = vmatpush.bf16.msrb.mxu0 %v3085_v48  ;;  %v4257_v10 = vld [vmem:[%s4615_s7] ss:$0 sm:$0xff] }
 0x241   : > { %2066 = vmatmul.bf16.gmra.mxu3 %v1934_v4  ;;  %v1452_v18 = vadd.f32 %v1451_v22, %v1283_v16  ;;  %v1290_v22 = vadd.f32 %v4001_v45, %v4048_v12 }
 0x242   : > { %v1739_v59 = vpop.f32.mrf.mxu2 }
 0x243   : > { %1490 = vmatmul.bf16.gmra.mxu1 %v1014_v58  ;;  %v1740_v63 = vadd.f32 %v4151_v21, %v1739_v59  ;;  %v1563_v26 = vmax.f32 %v1452_v18, 0.0  ;;  %v1288_v58 = vadd.f32 %v4001_v45, %v4037_v49 }
 0x245   : > { %v1878_v19 = vmax.f32 %v1740_v63, 0.0 }
 0x248   : > { %v1453_v13 = vpop.f32.mrf.mxu1 }
 0x249   : > { %v1454_v52 = vadd.f32 %v1453_v13, %v1285_v44  ;;  %v974_v44 = vunpack.c.h.b16 %v4028_v36  ;;  %v1293_v36 = vadd.f32 %v4001_v45, %v4055_v41 }
 0x24a   : > { %v1741_v35 = vpop.f32.mrf.mxu2 }
 0x24b   : > { %v1564_v29 = vmax.f32 %v1454_v52, 0.0  ;;  %v1742_v3 = vadd.f32 %v4151_v21, %v1741_v35  ;;  %v976_v52 = vunpack.c.h.b16 %v4030_v30  ;;  %v4248_v35 = vpop.f32.mrf.mxu3 }
 0x24d   : > { %v1879_v54 = vmax.f32 %v1742_v3, 0.0  ;;  %v1611_v17 = vpack.c.bf16 %v1564_v29, %v1563_v26  ;;  %v1018_v53 = vpack.c.b16 %v976_v52, %v974_v44 }
 0x24f   : > { %1783 = vmatmul.bf16.gmra.mxu2 %v1611_v17  ;;  %v1935_v25 = vpack.c.bf16 %v1879_v54, %v1878_v19 }
 0x250   : > { %v1456_v51 = vpop.f32.mrf.mxu1 }
 0x251   : > { %2071 = vmatmul.bf16.gmra.mxu3 %v1935_v25  ;;  %v1457_v59 = vadd.f32 %v1456_v51, %v1288_v58  ;;  %v4681_v25 = vld [vmem:[#allocation33_spill] sm:$0xff]  ;;  %v4682_v51 = vld [vmem:[#allocation34_spill] sm:$0xff] }
 0x252   : > { %v1744_v4 = vpop.f32.mrf.mxu2 }
 0x253   : > { %1495 = vmatmul.bf16.gmra.mxu1 %v1016_v15  ;;  %v1745_v43 = vadd.f32 %v4151_v21, %v1744_v4  ;;  %v1565_v18 = vmax.f32 %v1457_v59, 0.0  ;;  %v978_v15 = vunpack.c.h.b16 %v4681_v25  ;;  %v980_v4 = vunpack.c.h.b16 %v4682_v51 }
 0x255   : > { %v1880_v49 = vmax.f32 %v1745_v43, 0.0 }
 0x258   : > { %v1458_v11 = vpop.f32.mrf.mxu1 }
 0x259   : > { %v1459_v16 = vadd.f32 %v1458_v11, %v1290_v22 }
 0x25a   : > { %v1746_v28 = vpop.f32.mrf.mxu2 }
 0x25b   : > { %v1566_v13 = vmax.f32 %v1459_v16, 0.0  ;;  %v1747_v63 = vadd.f32 %v4151_v21, %v1746_v28 }
 0x25d   : > { %v1881_v23 = vmax.f32 %v1747_v63, 0.0  ;;  %v1612_v37 = vpack.c.bf16 %v1566_v13, %v1565_v18  ;;  %v1020_v63 = vpack.c.b16 %v980_v4, %v978_v15 }
 0x25f   : > { %1788 = vmatmul.bf16.gmra.mxu2 %v1612_v37  ;;  %v1936_v12 = vpack.c.bf16 %v1881_v23, %v1880_v49 }
 0x260   : > { %v1461_v26 = vpop.f32.mrf.mxu1 }
 0x261   : > { %2076 = vmatmul.bf16.gmra.mxu3 %v1936_v12  ;;  %v1462_v30 = vadd.f32 %v1461_v26, %v1293_v36  ;;  %v1298_v12 = vadd.f32 %v4001_v45, %v4077_v62 }
 0x262   : > { %v1749_v29 = vpop.f32.mrf.mxu2 }
 0x263   : > { %1500 = vmatmul.bf16.gmra.mxu1 %v1018_v53  ;;  %v1750_v54 = vadd.f32 %v4151_v21, %v1749_v29  ;;  %v1567_v58 = vmax.f32 %v1462_v30, 0.0  ;;  %v1300_v53 = vadd.f32 %v4001_v45, %v4089_v32  ;;  %v982_v30 = vunpack.c.h.b16 %v4062_v9 }
 0x264   : > { %v2037_v3 = vpop.f32.mrf.mxu3 }
 0x265   : > { %v2038_v41 = vadd.f32 %v4257_v10, %v2037_v3  ;;  %v1882_v11 = vmax.f32 %v1750_v54, 0.0 }
 0x267   : > { %v2197_v44 = vmax.f32 %v2038_v41, 0.0 }
 0x268   : > { %v1463_v19 = vpop.f32.mrf.mxu1 }
 0x269   : > { %v1464_v17 = vadd.f32 %v1463_v19, %v1295_v7  ;;  %v984_v19 = vunpack.c.h.b16 %v4064_v24 }
 0x26a   : > { %v1751_v48 = vpop.f32.mrf.mxu2 }
 0x26b   : > { %v1568_v22 = vmax.f32 %v1464_v17, 0.0  ;;  %v1752_v47 = vadd.f32 %v4151_v21, %v1751_v48 }
 0x26c   : > { %v2039_v59 = vpop.f32.mrf.mxu3 }
 0x26d   : > { %v1883_v43 = vmax.f32 %v1752_v47, 0.0  ;;  %v2040_v16 = vadd.f32 %v4257_v10, %v2039_v59  ;;  %v1613_v28 = vpack.c.bf16 %v1568_v22, %v1567_v58  ;;  %v1022_v22 = vpack.c.b16 %v984_v19, %v982_v30 }
 0x26f   : > { %v2198_v18 = vmax.f32 %v2040_v16, 0.0  ;;  %1793 = vmatmul.bf16.gmra.mxu2 %v1613_v28  ;;  %v1937_v13 = vpack.c.bf16 %v1883_v43, %v1882_v11  ;;  %v4278_v11 = vld [vmem:[%s4611_s3] ss:$0 sm:$0xff] }
 0x270   : > { %v1466_v52 = vpop.f32.mrf.mxu1  ;;  %v1303_v43 = vadd.f32 %v4278_v11, %v4103_v1  ;;  %v1305_v16 = vadd.f32 %v4278_v11, %v4107_v55 }
 0x271   : > { %2081 = vmatmul.bf16.gmra.mxu3 %v1937_v13  ;;  %v2261_v49 = vpack.c.bf16 %v2198_v18, %v2197_v44  ;;  %v1467_v26 = vadd.f32 %v1466_v52, %v1298_v12  ;;  %v4683_v52 = vld [vmem:[#allocation35_spill] sm:$0xff] }
 0x272   : > { %v1754_v23 = vpop.f32.mrf.mxu2 }
 0x273   : > { %1505 = vmatmul.bf16.gmra.mxu1 %v1020_v63  ;;  %2369 = vmatmul.bf16.vlgmr.msrb.gmra.mxu0 %v2261_v49  ;;  %v1755_v3 = vadd.f32 %v4151_v21, %v1754_v23  ;;  %v1569_v54 = vmax.f32 %v1467_v26, 0.0  ;;  %v986_v49 = vunpack.c.h.b16 %v4683_v52  ;;  %v4684_v23 = vld [vmem:[#allocation36_spill] sm:$0xff] }
 0x274   : > { %v2042_v37 = vpop.f32.mrf.mxu3 }
 0x275   : > { %v2043_v17 = vadd.f32 %v4257_v10, %v2042_v37  ;;  %v1884_v15 = vmax.f32 %v1755_v3, 0.0  ;;  %v988_v37 = vunpack.c.h.b16 %v4684_v23 }
 0x277   : > { %v2199_v4 = vmax.f32 %v2043_v17, 0.0  ;;  %v1024_v17 = vpack.c.b16 %v988_v37, %v986_v49 }
 0x278   : > { %v1468_v29 = vpop.f32.mrf.mxu1 }
 0x279   : > { %v1469_v36 = vadd.f32 %v1468_v29, %v1300_v53 }
 0x27a   : > { %v1756_v7 = vpop.f32.mrf.mxu2 }
 0x27b   : > { %v1570_v48 = vmax.f32 %v1469_v36, 0.0  ;;  %v1757_v25 = vadd.f32 %v4151_v21, %v1756_v7 }
 0x27c   : > { %v2044_v62 = vpop.f32.mrf.mxu3 }
 0x27d   : > { %v1885_v51 = vmax.f32 %v1757_v25, 0.0  ;;  %v2045_v45 = vadd.f32 %v4257_v10, %v2044_v62  ;;  %v1614_v32 = vpack.c.bf16 %v1570_v48, %v1569_v54 }
 0x27f   : > { %v2200_v58 = vmax.f32 %v2045_v45, 0.0  ;;  %1798 = vmatmul.bf16.gmra.mxu2 %v1614_v32  ;;  %v1938_v41 = vpack.c.bf16 %v1885_v51, %v1884_v15  ;;  %v1308_v51 = vadd.f32 %v4278_v11, %v4121_v39  ;;  %v1310_v45 = vadd.f32 %v4278_v11, %v4128_v27 }
 0x280   : > { %v1471_v9 = vpop.f32.mrf.mxu1 }
 0x281   : > { %2086 = vmatmul.bf16.gmra.mxu3 %v1938_v41  ;;  %v2262_v24 = vpack.c.bf16 %v2200_v58, %v2199_v4  ;;  %v1472_v28 = vadd.f32 %v1471_v9, %v1303_v43  ;;  %v4685_v9 = vld [vmem:[#allocation37_spill] sm:$0xff] }
 0x282   : > { %v1759_v47 = vpop.f32.mrf.mxu2 }
 0x283   : > { %1510 = vmatmul.bf16.gmra.mxu1 %v1022_v22  ;;  %2374 = vmatmul.bf16.gmra.mxu0 %v2262_v24  ;;  %v1760_v18 = vadd.f32 %v4151_v21, %v1759_v47  ;;  %v1571_v12 = vmax.f32 %v1472_v28, 0.0  ;;  %v990_v24 = vunpack.c.h.b16 %v4685_v9  ;;  %v4686_v47 = vld [vmem:[#allocation38_spill] sm:$0xff] }
 0x284   : > { %v2047_v59 = vpop.f32.mrf.mxu3 }
 0x285   : > { %v2048_v53 = vadd.f32 %v4257_v10, %v2047_v59  ;;  %v1886_v3 = vmax.f32 %v1760_v18, 0.0  ;;  %v992_v59 = vunpack.c.h.b16 %v4686_v47  ;;  %v1318_v47 = vadd.f32 %v4278_v11, %v4125_v31 }
 0x287   : > { %v2201_v30 = vmax.f32 %v2048_v53, 0.0  ;;  %v1026_v37 = vpack.c.b16 %v992_v59, %v990_v24  ;;  %v1320_v59 = vadd.f32 %v4278_v11, %v4133_v20 }
 0x288   : > { %v1473_v44 = vpop.f32.mrf.mxu1 }
 0x289   : > { %v1474_v13 = vadd.f32 %v1473_v44, %v1305_v16 }
 0x28a   : > { %v1761_v63 = vpop.f32.mrf.mxu2 }
 0x28b   : > { %v1572_v26 = vmax.f32 %v1474_v13, 0.0  ;;  %v1762_v29 = vadd.f32 %v4151_v21, %v1761_v63 }
 0x28c   : > { %v2049_v1 = vpop.f32.mrf.mxu3 }
 0x28d   : > { %v1887_v36 = vmax.f32 %v1762_v29, 0.0  ;;  %v2050_v55 = vadd.f32 %v4257_v10, %v2049_v1  ;;  %v1615_v7 = vpack.c.bf16 %v1572_v26, %v1571_v12  ;;  %v1313_v1 = vadd.f32 %v4278_v11, %v4135_v0 }
 0x28f   : > { %v2202_v19 = vmax.f32 %v2050_v55, 0.0  ;;  %1803 = vmatmul.bf16.gmra.mxu2 %v1615_v7  ;;  %v1939_v54 = vpack.c.bf16 %v1887_v36, %v1886_v3  ;;  %v1315_v3 = vadd.f32 %v4278_v11, %v4141_v40 }
 0x290   : > { %v1476_v48 = vpop.f32.mrf.mxu1 }
 0x291   : > { %2091 = vmatmul.bf16.gmra.mxu3 %v1939_v54  ;;  %v2263_v25 = vpack.c.bf16 %v2202_v19, %v2201_v30  ;;  %v1477_v32 = vadd.f32 %v1476_v48, %v1308_v51  ;;  %v994_v54 = vunpack.c.h.b16 %v4114_v38 }
 0x292   : > { %v1764_v62 = vpop.f32.mrf.mxu2 }
 0x293   : > { %1515 = vmatmul.bf16.gmra.mxu1 %v1024_v17  ;;  %2379 = vmatmul.bf16.gmra.mxu0 %v2263_v25  ;;  %v1765_v58 = vadd.f32 %v4151_v21, %v1764_v62  ;;  %v1573_v43 = vmax.f32 %v1477_v32, 0.0  ;;  %v996_v17 = vunpack.c.h.b16 %v4116_v50 }
 0x294   : > { %v2052_v15 = vpop.f32.mrf.mxu3 }
 0x295   : > { %v2053_v16 = vadd.f32 %v4257_v10, %v2052_v15  ;;  %v1888_v18 = vmax.f32 %v1765_v58, 0.0 }
 0x297   : > { %v2203_v52 = vmax.f32 %v2053_v16, 0.0 }
 0x298   : > { %v1478_v4 = vpop.f32.mrf.mxu1 }
 0x299   : > { %v1479_v41 = vadd.f32 %v1478_v4, %v1310_v45 }
 0x29a   : > { %v1766_v22 = vpop.f32.mrf.mxu2 }
 0x29b   : > { %v1574_v28 = vmax.f32 %v1479_v41, 0.0  ;;  %v1767_v44 = vadd.f32 %v4151_v21, %v1766_v22  ;;  %v1028_v22 = vpack.c.b16 %v996_v17, %v994_v54 }
 0x29c   : > { %v2054_v39 = vpop.f32.mrf.mxu3 }
 0x29d   : > { %v1889_v13 = vmax.f32 %v1767_v44, 0.0  ;;  %v2055_v27 = vadd.f32 %v4257_v10, %v2054_v39  ;;  %v1616_v63 = vpack.c.bf16 %v1574_v28, %v1573_v43 }
 0x29f   : > { %v2204_v49 = vmax.f32 %v2055_v27, 0.0  ;;  %1808 = vmatmul.bf16.gmra.mxu2 %v1616_v63  ;;  %v1940_v23 = vpack.c.bf16 %v1889_v13, %v1888_v18 }
 0x2a0   : > { %v1481_v12 = vpop.f32.mrf.mxu1 }
 0x2a1   : > { %2096 = vmatmul.bf16.gmra.mxu3 %v1940_v23  ;;  %v2264_v53 = vpack.c.bf16 %v2204_v49, %v2203_v52  ;;  %v1482_v36 = vadd.f32 %v1481_v12, %v1313_v1 }
 0x2a2   : > { %v1769_v26 = vpop.f32.mrf.mxu2 }
 0x2a3   : > { %1520 = vmatmul.bf16.gmra.mxu1 %v1026_v37  ;;  %2384 = vmatmul.bf16.gmra.mxu0 %v2264_v53  ;;  %v1770_v7 = vadd.f32 %v4151_v21, %v1769_v26  ;;  %v1575_v48 = vmax.f32 %v1482_v36, 0.0  ;;  %v4687_v36 = vld [vmem:[#allocation39_spill] sm:$0xff] }
 0x2a4   : > { %v2057_v29 = vpop.f32.mrf.mxu3 }
 0x2a5   : > { %v2058_v25 = vadd.f32 %v4257_v10, %v2057_v29  ;;  %v1890_v51 = vmax.f32 %v1770_v7, 0.0  ;;  %v4688_v7 = vld [vmem:[#allocation40_spill] sm:$0xff] }
 0x2a7   : > { %v2205_v4 = vmax.f32 %v2058_v25, 0.0 }
 0x2a8   : > { %v1483_v55 = vpop.f32.mrf.mxu1 }
 0x2a9   : > { %v1484_v30 = vadd.f32 %v1483_v55, %v1315_v3  ;;  %v1323_v55 = vadd.f32 %v4278_v11, %v4687_v36  ;;  %v1335_v36 = vadd.f32 %v4278_v11, %v4176_v33 }
 0x2aa   : > { %v1771_v19 = vpop.f32.mrf.mxu2 }
 0x2ab   : > { %v1576_v62 = vmax.f32 %v1484_v30, 0.0  ;;  %v1772_v15 = vadd.f32 %v4151_v21, %v1771_v19  ;;  %v1325_v30 = vadd.f32 %v4278_v11, %v4688_v7 }
 0x2ac   : > { %v2059_v0 = vpop.f32.mrf.mxu3 }
 0x2ad   : > { %v1617_v45 = vpack.c.bf16 %v1576_v62, %v1575_v48  ;;  %v1891_v40 = vmax.f32 %v1772_v15, 0.0  ;;  %v2060_v32 = vadd.f32 %v4257_v10, %v2059_v0 }
 0x2af   : > { %v2206_v58 = vmax.f32 %v2060_v32, 0.0  ;;  %1813 = vmatmul.bf16.gmra.mxu2 %v1617_v45  ;;  %v1941_v41 = vpack.c.bf16 %v1891_v40, %v1890_v51 }
 0x2b0   : > { %v1486_v38 = vpop.f32.mrf.mxu1 }
 0x2b1   : > { %2101 = vmatmul.bf16.gmra.mxu3 %v1941_v41  ;;  %v2265_v50 = vpack.c.bf16 %v2206_v58, %v2205_v4  ;;  %v1487_v43 = vadd.f32 %v1486_v38, %v1318_v47 }
 0x2b2   : > { %v1774_v9 = vpop.f32.mrf.mxu2 }
 0x2b3   : > { %1525 = vmatmul.bf16.gmra.mxu1 %v1028_v22  ;;  %2389 = vmatmul.bf16.gmra.mxu0 %v2265_v50  ;;  %v1775_v28 = vadd.f32 %v4151_v21, %v1774_v9  ;;  %v1577_v18 = vmax.f32 %v1487_v43, 0.0  ;;  %v1330_v43 = vadd.f32 %v4278_v11, %v4160_v60 }
 0x2b4   : > { %v2062_v24 = vpop.f32.mrf.mxu3 }
 0x2b5   : > { %v2063_v13 = vadd.f32 %v4257_v10, %v2062_v24  ;;  %v1892_v49 = vmax.f32 %v1775_v28, 0.0 }
 0x2b7   : > { %v2207_v12 = vmax.f32 %v2063_v13, 0.0 }
 0x2b8   : > { %v1488_v16 = vpop.f32.mrf.mxu1 }
 0x2b9   : > { %v1489_v44 = vadd.f32 %v1488_v16, %v1320_v59  ;;  %v1328_v59 = vadd.f32 %v4278_v11, %v4156_v14 }
 0x2ba   : > { %v1776_v39 = vpop.f32.mrf.mxu2 }
 0x2bb   : > { %v1578_v27 = vmax.f32 %v1489_v44, 0.0  ;;  %v1777_v63 = vadd.f32 %v4151_v21, %v1776_v39 }
 0x2bc   : > { %v2064_v52 = vpop.f32.mrf.mxu3 }
 0x2bd   : > { %v1618_v23 = vpack.c.bf16 %v1578_v27, %v1577_v18  ;;  %v1893_v37 = vmax.f32 %v1777_v63, 0.0  ;;  %v2065_v31 = vadd.f32 %v4257_v10, %v2064_v52 }
 0x2bf   : > { %v2208_v20 = vmax.f32 %v2065_v31, 0.0  ;;  %1818 = vmatmul.bf16.gmra.mxu2 %v1618_v23  ;;  %v1942_v53 = vpack.c.bf16 %v1893_v37, %v1892_v49 }
 0x2c0   : > { %v1491_v26 = vpop.f32.mrf.mxu1 }
 0x2c1   : > { %2106 = vmatmul.bf16.gmra.mxu3 %v1942_v53  ;;  %v2266_v29 = vpack.c.bf16 %v2208_v20, %v2207_v12  ;;  %v1492_v19 = vadd.f32 %v1491_v26, %v1323_v55 }
 0x2c2   : > { %v1779_v1 = vpop.f32.mrf.mxu2 }
 0x2c3   : > { %2394 = vmatmul.bf16.gmra.mxu0 %v2266_v29  ;;  %v1780_v17 = vadd.f32 %v4151_v21, %v1779_v1  ;;  %v1579_v62 = vmax.f32 %v1492_v19, 0.0 }
 0x2c4   : > { %v2067_v3 = vpop.f32.mrf.mxu3 }
 0x2c5   : > { %v2068_v15 = vadd.f32 %v4257_v10, %v2067_v3  ;;  %v1894_v40 = vmax.f32 %v1780_v17, 0.0  ;;  %v1333_v3 = vadd.f32 %v4278_v11, %v4170_v2 }
 0x2c7   : > { %v2209_v41 = vmax.f32 %v2068_v15, 0.0 }
 0x2c8   : > { %v1493_v54 = vpop.f32.mrf.mxu1 }
 0x2c9   : > { %v1494_v48 = vadd.f32 %v1493_v54, %v1325_v30 }
 0x2ca   : > { %v1781_v25 = vpop.f32.mrf.mxu2 }
 0x2cb   : > { %v1580_v0 = vmax.f32 %v1494_v48, 0.0  ;;  %v1782_v51 = vadd.f32 %v4151_v21, %v1781_v25 }
 0x2cc   : > { %v2069_v45 = vpop.f32.mrf.mxu3 }
 0x2cd   : > { %v1619_v32 = vpack.c.bf16 %v1580_v0, %v1579_v62  ;;  %v1895_v4 = vmax.f32 %v1782_v51, 0.0  ;;  %v2070_v58 = vadd.f32 %v4257_v10, %v2069_v45 }
 0x2cf   : > { %v2210_v22 = vmax.f32 %v2070_v58, 0.0  ;;  %1823 = vmatmul.bf16.gmra.mxu2 %v1619_v32  ;;  %v1943_v38 = vpack.c.bf16 %v1895_v4, %v1894_v40 }
 0x2d0   : > { %v1496_v50 = vpop.f32.mrf.mxu1 }
 0x2d1   : > { %2111 = vmatmul.bf16.gmra.mxu3 %v1943_v38  ;;  %v2267_v9 = vpack.c.bf16 %v2210_v22, %v2209_v41  ;;  %v1497_v16 = vadd.f32 %v1496_v50, %v1328_v59  ;;  %v4345_v22 = vld [vmem:[%s4617_s9] ss:$0 sm:$0xff]  ;;  %v1338_v50 = vadd.f32 %v4278_v11, %v4182_v6  ;;  %v1340_v59 = vadd.f32 %v4278_v11, %v4192_v34 }
 0x2d2   : > { %v1784_v24 = vpop.f32.mrf.mxu2 }
 0x2d3   : > { %2399 = vmatmul.bf16.gmra.mxu0 %v2267_v9  ;;  %v1785_v44 = vadd.f32 %v4151_v21, %v1784_v24  ;;  %v1581_v13 = vmax.f32 %v1497_v16, 0.0 }
 0x2d4   : > { %v2072_v47 = vpop.f32.mrf.mxu3 }
 0x2d5   : > { %v2073_v27 = vadd.f32 %v4257_v10, %v2072_v47  ;;  %v1896_v23 = vmax.f32 %v1785_v44, 0.0 }
 0x2d7   : > { %v2211_v12 = vmax.f32 %v2073_v27, 0.0 }
 0x2d8   : > { %v1498_v28 = vpop.f32.mrf.mxu1 }
 0x2d9   : > { %v1499_v39 = vadd.f32 %v1498_v28, %v1330_v43 }
 0x2da   : > { %v1786_v18 = vpop.f32.mrf.mxu2 }
 0x2db   : > { %v1582_v63 = vmax.f32 %v1499_v39, 0.0  ;;  %v1787_v52 = vadd.f32 %v4151_v21, %v1786_v18 }
 0x2dc   : > { %v2074_v49 = vpop.f32.mrf.mxu3 }
 0x2dd   : > { %v1620_v37 = vpack.c.bf16 %v1582_v63, %v1581_v13  ;;  %v1897_v31 = vmax.f32 %v1787_v52, 0.0  ;;  %v2075_v14 = vadd.f32 %v4257_v10, %v2074_v49 }
 0x2df   : > { %v2212_v60 = vmax.f32 %v2075_v14, 0.0  ;;  %1828 = vmatmul.bf16.gmra.mxu2 %v1620_v37  ;;  %v1944_v20 = vpack.c.bf16 %v1897_v31, %v1896_v23 }
 0x2e0   : > { %v1501_v53 = vpop.f32.mrf.mxu1 }
 0x2e1   : > { %2116 = vmatmul.bf16.gmra.mxu3 %v1944_v20  ;;  %v2268_v26 = vpack.c.bf16 %v2212_v60, %v2211_v12  ;;  %v1502_v55 = vadd.f32 %v1501_v53, %v1333_v3 }
 0x2e2   : > { %v1789_v29 = vpop.f32.mrf.mxu2 }
 0x2e3   : > { %2404 = vmatmul.bf16.gmra.mxu0 %v2268_v26  ;;  %v1790_v30 = vadd.f32 %v4151_v21, %v1789_v29  ;;  %v1583_v17 = vmax.f32 %v1502_v55, 0.0 }
 0x2e4   : > { %v2077_v1 = vpop.f32.mrf.mxu3 }
 0x2e5   : > { %v2078_v48 = vadd.f32 %v4257_v10, %v2077_v1  ;;  %v1898_v0 = vmax.f32 %v1790_v30, 0.0  ;;  %v1345_v30 = vadd.f32 %v4278_v11, %v4204_v61 }
 0x2e7   : > { %v2213_v40 = vmax.f32 %v2078_v48, 0.0 }
 0x2e8   : > { %v1503_v7 = vpop.f32.mrf.mxu1 }
 0x2e9   : > { %v1504_v19 = vadd.f32 %v1503_v7, %v1335_v36 }
 0x2ea   : > { %v1791_v54 = vpop.f32.mrf.mxu2 }
 0x2eb   : > { %v1584_v25 = vmax.f32 %v1504_v19, 0.0  ;;  %v1792_v62 = vadd.f32 %v4151_v21, %v1791_v54  ;;  %v4367_v19 = vld [vmem:[%s4613_s5] ss:$0 sm:$0xff] }
 0x2ec   : > { %v2079_v15 = vpop.f32.mrf.mxu3 }
 0x2ed   : > { %v1621_v51 = vpack.c.bf16 %v1584_v25, %v1583_v17  ;;  %v1899_v45 = vmax.f32 %v1792_v62, 0.0  ;;  %v2080_v2 = vadd.f32 %v4257_v10, %v2079_v15 }
 0x2ef   : > { %v2214_v33 = vmax.f32 %v2080_v2, 0.0  ;;  %1833 = vmatmul.bf16.gmra.mxu2 %v1621_v51  ;;  %v1945_v32 = vpack.c.bf16 %v1899_v45, %v1898_v0 }
 0x2f0   : > { %v1506_v4 = vpop.f32.mrf.mxu1  ;;  %v2370_v58 = vpop.f32.mrf.mxu0 }
 0x2f1   : > { %2121 = vmatmul.bf16.gmra.mxu3 %v1945_v32  ;;  %v2269_v41 = vpack.c.bf16 %v2214_v33, %v2213_v40  ;;  %v1507_v24 = vadd.f32 %v1506_v4, %v1338_v50  ;;  %v2371_v47 = vadd.f32 %v4345_v22, %v2370_v58 }
 0x2f2   : > { %v1794_v38 = vpop.f32.mrf.mxu2 }
 0x2f3   : > { %2409 = vmatmul.bf16.gmra.mxu0 %v2269_v41  ;;  %v1795_v43 = vadd.f32 %v4151_v21, %v1794_v38  ;;  %v1585_v18 = vmax.f32 %v1507_v24, 0.0  ;;  %v2530_v13 = vmax.f32 %v2371_v47, 0.0 }
 0x2f4   : > { %v2082_v9 = vpop.f32.mrf.mxu3 }
 0x2f5   : > { %v2083_v63 = vadd.f32 %v4257_v10, %v2082_v9  ;;  %v1900_v23 = vmax.f32 %v1795_v43, 0.0 }
 0x2f7   : > { %v2215_v60 = vmax.f32 %v2083_v63, 0.0 }
 0x2f8   : > { %v1508_v16 = vpop.f32.mrf.mxu1  ;;  %v2372_v28 = vpop.f32.mrf.mxu0 }
 0x2f9   : > { %v1509_v44 = vadd.f32 %v1508_v16, %v1340_v59  ;;  %v2373_v39 = vadd.f32 %v4345_v22, %v2372_v28  ;;  %v1348_v16 = vadd.f32 %v4278_v11, %v4211_v42 }
 0x2fa   : > { %v1796_v27 = vpop.f32.mrf.mxu2 }
 0x2fb   : > { %v1586_v6 = vmax.f32 %v1509_v44, 0.0  ;;  %v2531_v52 = vmax.f32 %v2373_v39, 0.0  ;;  %v1797_v49 = vadd.f32 %v4151_v21, %v1796_v27  ;;  %v1343_v21 = vadd.f32 %v4278_v11, %v4196_v8 }
 0x2fc   : > { %v2084_v37 = vpop.f32.mrf.mxu3 }
 0x2fd   : > { %v1622_v31 = vpack.c.bf16 %v1586_v6, %v1585_v18  ;;  %v1901_v34 = vmax.f32 %v1797_v49, 0.0  ;;  %v2085_v14 = vadd.f32 %v4257_v10, %v2084_v37  ;;  %v4357_v12 = vpack.c.bf16 %v2531_v52, %v2530_v13 }
 0x2fe   : > { %v1350_v18 = vadd.f32 %v4278_v11, %v4216_v57 }
 0x2ff   : > { %v2216_v20 = vmax.f32 %v2085_v14, 0.0  ;;  %1838 = vmatmul.bf16.gmra.mxu2 %v1622_v31  ;;  %v1946_v53 = vpack.c.bf16 %v1901_v34, %v1900_v23 }
 0x300   : > { %v1511_v26 = vpop.f32.mrf.mxu1  ;;  %v2375_v29 = vpop.f32.mrf.mxu0 }
 0x301   : > { %2126 = vmatmul.bf16.gmra.mxu3 %v1946_v53  ;;  %v2270_v1 = vpack.c.bf16 %v2216_v20, %v2215_v60  ;;  %v1512_v55 = vadd.f32 %v1511_v26, %v1343_v21  ;;  %v2376_v7 = vadd.f32 %v4345_v22, %v2375_v29 }
 0x302   : > { %v1799_v3 = vpop.f32.mrf.mxu2 }
 0x303   : > { %2414 = vmatmul.bf16.gmra.mxu0 %v2270_v1  ;;  %v1800_v54 = vadd.f32 %v4367_v19, %v1799_v3  ;;  %v1587_v8 = vmax.f32 %v1512_v55, 0.0  ;;  %v2532_v15 = vmax.f32 %v2376_v7, 0.0 }
 0x304   : > { %v2087_v36 = vpop.f32.mrf.mxu3 }
 0x305   : > { %v2088_v51 = vadd.f32 %v4257_v10, %v2087_v36  ;;  %v1902_v40 = vmax.f32 %v1800_v54, 0.0  ;;  %v1353_v54 = vadd.f32 %v4278_v11, %v4226_v56 }
 0x307   : > { %v2217_v38 = vmax.f32 %v2088_v51, 0.0 }
 0x308   : > { %v1513_v17 = vpop.f32.mrf.mxu1  ;;  %v2377_v48 = vpop.f32.mrf.mxu0 }
 0x309   : > { %v1514_v25 = vadd.f32 %v1513_v17, %v1345_v30  ;;  %v2378_v62 = vadd.f32 %v4345_v22, %v2377_v48 }
 0x30a   : > { %v1801_v0 = vpop.f32.mrf.mxu2 }
 0x30b   : > { %v1588_v45 = vmax.f32 %v1514_v25, 0.0  ;;  %v2533_v2 = vmax.f32 %v2378_v62, 0.0  ;;  %v1802_v61 = vadd.f32 %v4367_v19, %v1801_v0  ;;  %v1355_v62 = vadd.f32 %v4278_v11, %v4232_v46 }
 0x30c   : > { %v2089_v33 = vpop.f32.mrf.mxu3 }
 0x30d   : > { %v1623_v32 = vpack.c.bf16 %v1588_v45, %v1587_v8  ;;  %v1903_v4 = vmax.f32 %v1802_v61, 0.0  ;;  %v2090_v58 = vadd.f32 %v4257_v10, %v2089_v33  ;;  %v4374_v41 = vpack.c.bf16 %v2533_v2, %v2532_v15 }
 0x30f   : > { %v2218_v50 = vmax.f32 %v2090_v58, 0.0  ;;  %1843 = vmatmul.bf16.gmra.mxu2 %v1623_v32  ;;  %v1947_v9 = vpack.c.bf16 %v1903_v4, %v1902_v40 }
 0x310   : > { %v1516_v24 = vpop.f32.mrf.mxu1  ;;  %v2380_v47 = vpop.f32.mrf.mxu0 }
 0x311   : > { %2131 = vmatmul.bf16.gmra.mxu3 %v1947_v9  ;;  %v2271_v59 = vpack.c.bf16 %v2218_v50, %v2217_v38  ;;  %v1517_v44 = vadd.f32 %v1516_v24, %v1348_v16  ;;  %v2381_v39 = vadd.f32 %v4345_v22, %v2380_v47 }
 0x312   : > { %v1804_v43 = vpop.f32.mrf.mxu2 }
 0x313   : > { %2419 = vmatmul.bf16.gmra.mxu0 %v2271_v59  ;;  %v1805_v13 = vadd.f32 %v4367_v19, %v1804_v43  ;;  %v1589_v49 = vmax.f32 %v1517_v44, 0.0  ;;  %v2534_v23 = vmax.f32 %v2381_v39, 0.0 }
 0x314   : > { %v2092_v28 = vpop.f32.mrf.mxu3 }
 0x315   : > { %v2093_v31 = vadd.f32 %v4257_v10, %v2092_v28  ;;  %v1904_v60 = vmax.f32 %v1805_v13, 0.0 }
 0x317   : > { %v2219_v1 = vmax.f32 %v2093_v31, 0.0 }
 0x318   : > { %v1518_v27 = vpop.f32.mrf.mxu1  ;;  %v2382_v63 = vpop.f32.mrf.mxu0 }
 0x319   : > { %v1519_v6 = vadd.f32 %v1518_v27, %v1350_v18  ;;  %v2383_v52 = vadd.f32 %v4345_v22, %v2382_v63  ;;  %v1358_v18 = vadd.f32 %v4278_v11, %v4238_v5 }
 0x31a   : > { %v1806_v37 = vpop.f32.mrf.mxu2 }
 0x31b   : > { %v1590_v42 = vmax.f32 %v1519_v6, 0.0  ;;  %v2535_v34 = vmax.f32 %v2383_v52, 0.0  ;;  %v1807_v14 = vadd.f32 %v4367_v19, %v1806_v37  ;;  %v1360_v6 = vadd.f32 %v4278_v11, %v4248_v35 }
 0x31c   : > { %v2094_v20 = vpop.f32.mrf.mxu3 }
 0x31d   : > { %v1624_v53 = vpack.c.bf16 %v1590_v42, %v1589_v49  ;;  %v1905_v57 = vmax.f32 %v1807_v14, 0.0  ;;  %v2095_v26 = vadd.f32 %v4257_v10, %v2094_v20  ;;  %v4386_v29 = vpack.c.bf16 %v2535_v34, %v2534_v23 }
 0x31f   : > { %v2220_v3 = vmax.f32 %v2095_v26, 0.0  ;;  %1848 = vmatmul.bf16.gmra.mxu2 %v1624_v53  ;;  %v1948_v21 = vpack.c.bf16 %v1905_v57, %v1904_v60 }
 0x320   : > { %v1521_v36 = vpop.f32.mrf.mxu1  ;;  %v2385_v55 = vpop.f32.mrf.mxu0 }
 0x321   : > { %2136 = vmatmul.bf16.gmra.mxu3 %v1948_v21  ;;  %v2272_v7 = vpack.c.bf16 %v2220_v3, %v2219_v1  ;;  %v1522_v48 = vadd.f32 %v1521_v36, %v1353_v54  ;;  %v2386_v25 = vadd.f32 %v4345_v22, %v2385_v55 }
 0x322   : > { %v1809_v30 = vpop.f32.mrf.mxu2 }
 0x323   : > { %2424 = vmatmul.bf16.gmra.mxu0 %v2272_v7  ;;  %v1810_v8 = vadd.f32 %v4367_v19, %v1809_v30  ;;  %v1591_v2 = vmax.f32 %v1522_v48, 0.0  ;;  %v2536_v61 = vmax.f32 %v2386_v25, 0.0 }
 0x324   : > { %v2097_v17 = vpop.f32.mrf.mxu3 }
 0x325   : > { %v2098_v33 = vadd.f32 %v4257_v10, %v2097_v17  ;;  %v1906_v58 = vmax.f32 %v1810_v8, 0.0 }
 0x327   : > { %v2221_v47 = vmax.f32 %v2098_v33, 0.0 }
 0x328   : > { %v1523_v15 = vpop.f32.mrf.mxu1  ;;  %v2387_v0 = vpop.f32.mrf.mxu0 }
 0x329   : > { %v1524_v51 = vadd.f32 %v1523_v15, %v1355_v62  ;;  %v2388_v45 = vadd.f32 %v4345_v22, %v2387_v0 }
 0x32a   : > { %v1811_v40 = vpop.f32.mrf.mxu2 }
 0x32b   : > { %v1592_v56 = vmax.f32 %v1524_v51, 0.0  ;;  %v2537_v32 = vmax.f32 %v2388_v45, 0.0  ;;  %v1812_v4 = vadd.f32 %v4367_v19, %v1811_v40 }
 0x32c   : > { %v2099_v38 = vpop.f32.mrf.mxu3 }
 0x32d   : > { %v1625_v50 = vpack.c.bf16 %v1592_v56, %v1591_v2  ;;  %v1907_v46 = vmax.f32 %v1812_v4, 0.0  ;;  %v2100_v9 = vadd.f32 %v4257_v10, %v2099_v38  ;;  %v4398_v24 = vpack.c.bf16 %v2537_v32, %v2536_v61 }
 0x32f   : > { %v1949_v59 = vpack.c.bf16 %v1907_v46, %v1906_v58  ;;  %v2222_v43 = vmax.f32 %v2100_v9, 0.0  ;;  %1853 = vmatmul.bf16.gmra.mxu2 %v1625_v50 }
 0x330   : > { %v1526_v16 = vpop.f32.mrf.mxu1  ;;  %v2390_v28 = vpop.f32.mrf.mxu0 }
 0x331   : > { %2141 = vmatmul.bf16.gmra.mxu3 %v1949_v59  ;;  %v2273_v44 = vpack.c.bf16 %v2222_v43, %v2221_v47  ;;  %v1527_v27 = vadd.f32 %v1526_v16, %v1358_v18  ;;  %v2391_v63 = vadd.f32 %v4345_v22, %v2390_v28 }
 0x332   : > { %v1814_v39 = vpop.f32.mrf.mxu2 }
 0x333   : > { %2429 = vmatmul.bf16.gmra.mxu0 %v2273_v44  ;;  %v1815_v52 = vadd.f32 %v4367_v19, %v1814_v39  ;;  %v1593_v42 = vmax.f32 %v1527_v27, 0.0  ;;  %v2538_v34 = vmax.f32 %v2391_v63, 0.0 }
 0x334   : > { %v2102_v13 = vpop.f32.mrf.mxu3 }
 0x335   : > { %v2103_v60 = vadd.f32 %v4257_v10, %v2102_v13  ;;  %v1908_v57 = vmax.f32 %v1815_v52, 0.0 }
 0x337   : > { %v2223_v21 = vmax.f32 %v2103_v60, 0.0 }
 0x338   : > { %v1528_v49 = vpop.f32.mrf.mxu1  ;;  %v2392_v23 = vpop.f32.mrf.mxu0 }
 0x339   : > { %v1529_v37 = vadd.f32 %v1528_v49, %v1360_v6  ;;  %v2393_v31 = vadd.f32 %v4345_v22, %v2392_v23 }
 0x33a   : > { %v1816_v14 = vpop.f32.mrf.mxu2 }
 0x33b   : > { %v1594_v5 = vmax.f32 %v1529_v37, 0.0  ;;  %v2539_v20 = vmax.f32 %v2393_v31, 0.0  ;;  %v1817_v53 = vadd.f32 %v4367_v19, %v1816_v14 }
 0x33c   : > { %v2104_v26 = vpop.f32.mrf.mxu3 }
 0x33d   : > { %v1626_v1 = vpack.c.bf16 %v1594_v5, %v1593_v42  ;;  %v1909_v35 = vmax.f32 %v1817_v53, 0.0  ;;  %v2105_v11 = vadd.f32 %v4257_v10, %v2104_v26  ;;  %v4410_v3 = vpack.c.bf16 %v2539_v20, %v2538_v34 }
 0x33f   : > { %v1950_v36 = vpack.c.bf16 %v1909_v35, %v1908_v57  ;;  %v2224_v55 = vmax.f32 %v2105_v11, 0.0  ;;  %1858 = vmatmul.bf16.gmra.mxu2 %v1626_v1 }
 0x340   : > { %v4412_v7 = vpop.f32.mrf.mxu0 }
 0x341   : > { %2146 = vmatmul.bf16.gmra.mxu3 %v1950_v36  ;;  %v2274_v30 = vpack.c.bf16 %v2224_v55, %v2223_v21 }
 0x342   : > { %v1819_v54 = vpop.f32.mrf.mxu2 }
 0x343   : > { %2434 = vmatmul.bf16.gmra.mxu0 %v2274_v30  ;;  %v1820_v25 = vadd.f32 %v4367_v19, %v1819_v54 }
 0x344   : > { %v2107_v17 = vpop.f32.mrf.mxu3 }
 0x345   : > { %v2108_v8 = vadd.f32 %v4257_v10, %v2107_v17  ;;  %v1910_v51 = vmax.f32 %v1820_v25, 0.0 }
 0x347   : > { %v2225_v61 = vmax.f32 %v2108_v8, 0.0 }
 0x348   : > { %v4414_v48 = vpop.f32.mrf.mxu0 }
 0x34a   : > { %v1821_v62 = vpop.f32.mrf.mxu2 }
 0x34b   : > { %v1822_v15 = vadd.f32 %v4367_v19, %v1821_v62  ;;  %v2398_v62 = vadd.f32 %v4345_v22, %v4414_v48 }
 0x34c   : > { %v2109_v0 = vpop.f32.mrf.mxu3 }
 0x34d   : > { %v1911_v45 = vmax.f32 %v1822_v15, 0.0  ;;  %v2110_v2 = vadd.f32 %v4257_v10, %v2109_v0  ;;  %v2396_v0 = vadd.f32 %v4345_v22, %v4412_v7 }
 0x34f   : > { %v1951_v40 = vpack.c.bf16 %v1911_v45, %v1910_v51  ;;  %v2226_v33 = vmax.f32 %v2110_v2, 0.0  ;;  %v2541_v45 = vmax.f32 %v2398_v62, 0.0 }
 0x350   : > { %v2400_v56 = vpop.f32.mrf.mxu0 }
 0x351   : > { %2151 = vmatmul.bf16.gmra.mxu3 %v1951_v40  ;;  %v2275_v32 = vpack.c.bf16 %v2226_v33, %v2225_v61  ;;  %v2401_v35 = vadd.f32 %v4345_v22, %v2400_v56  ;;  %v2540_v33 = vmax.f32 %v2396_v0, 0.0 }
 0x352   : > { %v1824_v4 = vpop.f32.mrf.mxu2 }
 0x353   : > { %2439 = vmatmul.bf16.gmra.mxu0 %v2275_v32  ;;  %v1825_v50 = vadd.f32 %v4367_v19, %v1824_v4  ;;  %v2542_v25 = vmax.f32 %v2401_v35, 0.0 }
 0x354   : > { %v2112_v58 = vpop.f32.mrf.mxu3 }
 0x355   : > { %v2113_v9 = vadd.f32 %v4257_v10, %v2112_v58  ;;  %v1912_v43 = vmax.f32 %v1825_v50, 0.0  ;;  %v2599_v50 = vpack.c.bf16 %v2541_v45, %v2540_v33 }
 0x357   : > { %v2227_v44 = vmax.f32 %v2113_v9, 0.0 }
 0x358   : > { %v2402_v38 = vpop.f32.mrf.mxu0 }
 0x359   : > { %v2403_v5 = vadd.f32 %v4345_v22, %v2402_v38 }
 0x35a   : > { %v1826_v46 = vpop.f32.mrf.mxu2 }
 0x35b   : > { %v1827_v47 = vadd.f32 %v4367_v19, %v1826_v46  ;;  %v2543_v30 = vmax.f32 %v2403_v5, 0.0 }
 0x35c   : > { %v2114_v59 = vpop.f32.mrf.mxu3 }
 0x35d   : > { %v1913_v16 = vmax.f32 %v1827_v47, 0.0  ;;  %v2115_v28 = vadd.f32 %v4257_v10, %v2114_v59  ;;  %v2600_v15 = vpack.c.bf16 %v2543_v30, %v2542_v25 }
 0x35f   : > { %v1952_v39 = vpack.c.bf16 %v1913_v16, %v1912_v43  ;;  %v2228_v18 = vmax.f32 %v2115_v28, 0.0 }
 0x360   : > { %v2405_v13 = vpop.f32.mrf.mxu0 }
 0x361   : > { %2156 = vmatmul.bf16.gmra.mxu3 %v1952_v39  ;;  %v2276_v27 = vpack.c.bf16 %v2228_v18, %v2227_v44  ;;  %v2406_v52 = vadd.f32 %v4345_v22, %v2405_v13 }
 0x362   : > { %v1829_v63 = vpop.f32.mrf.mxu2 }
 0x363   : > { %2444 = vmatmul.bf16.gmra.mxu0 %v2276_v27  ;;  %v1830_v23 = vadd.f32 %v4367_v19, %v1829_v63  ;;  %v2544_v42 = vmax.f32 %v2406_v52, 0.0 }
 0x364   : > { %v2117_v6 = vpop.f32.mrf.mxu3 }
 0x365   : > { %v2118_v34 = vadd.f32 %v4257_v10, %v2117_v6  ;;  %v1914_v53 = vmax.f32 %v1830_v23, 0.0 }
 0x367   : > { %v2229_v11 = vmax.f32 %v2118_v34, 0.0 }
 0x368   : > { %v2407_v49 = vpop.f32.mrf.mxu0 }
 0x369   : > { %v2408_v37 = vadd.f32 %v4345_v22, %v2407_v49  ;;  %v4451_v49 = vld [vmem:[%s4615_s7] ss:$0 sm:$0xff] }
 0x36a   : > { %v1831_v31 = vpop.f32.mrf.mxu2 }
 0x36b   : > { %v2545_v14 = vmax.f32 %v2408_v37, 0.0  ;;  %v1832_v60 = vadd.f32 %v4367_v19, %v1831_v31 }
 0x36c   : > { %v2119_v20 = vpop.f32.mrf.mxu3 }
 0x36d   : > { %v2601_v57 = vpack.c.bf16 %v2545_v14, %v2544_v42  ;;  %v1915_v26 = vmax.f32 %v1832_v60, 0.0  ;;  %v2120_v1 = vadd.f32 %v4257_v10, %v2119_v20 }
 0x36f   : > { %v1953_v21 = vpack.c.bf16 %v1915_v26, %v1914_v53  ;;  %v2230_v36 = vmax.f32 %v2120_v1, 0.0  ;;  %2634 = vmatpush.bf16.xpose.msra.mxu1 %v2601_v57 }
 0x370   : > { %v2410_v55 = vpop.f32.mrf.mxu0 }
 0x371   : > { %2161 = vmatmul.bf16.gmra.mxu3 %v1953_v21  ;;  %v2277_v54 = vpack.c.bf16 %v2230_v36, %v2229_v11  ;;  %v2411_v51 = vadd.f32 %v4345_v22, %v2410_v55 }
 0x372   : > { %v1834_v17 = vpop.f32.mrf.mxu2 }
 0x373   : > { %2449 = vmatmul.bf16.gmra.mxu0 %v2277_v54  ;;  %v1835_v61 = vadd.f32 %v4367_v19, %v1834_v17  ;;  %v2546_v32 = vmax.f32 %v2411_v51, 0.0 }
 0x374   : > { %v2122_v8 = vpop.f32.mrf.mxu3 }
 0x375   : > { %v2123_v4 = vadd.f32 %v4257_v10, %v2122_v8  ;;  %v1916_v7 = vmax.f32 %v1835_v61, 0.0 }
 0x377   : > { %2635 = vmatpush.bf16.xpose.msra.mxu1 %v2600_v15  ;;  %v2231_v59 = vmax.f32 %v2123_v4, 0.0 }
 0x378   : > { %v2412_v2 = vpop.f32.mrf.mxu0 }
 0x379   : > { %v2413_v40 = vadd.f32 %v4345_v22, %v2412_v2 }
 0x37a   : > { %v1836_v56 = vpop.f32.mrf.mxu2 }
 0x37b   : > { %v2547_v48 = vmax.f32 %v2413_v40, 0.0  ;;  %v1837_v58 = vadd.f32 %v4367_v19, %v1836_v56 }
 0x37c   : > { %v2124_v38 = vpop.f32.mrf.mxu3 }
 0x37d   : > { %v1917_v46 = vmax.f32 %v1837_v58, 0.0  ;;  %v2125_v9 = vadd.f32 %v4257_v10, %v2124_v38  ;;  %v4442_v47 = vpack.c.bf16 %v2547_v48, %v2546_v32 }
 0x37f   : > { %v1954_v43 = vpack.c.bf16 %v1917_v46, %v1916_v7  ;;  %v2232_v16 = vmax.f32 %v2125_v9, 0.0  ;;  %2636 = vmatpush.bf16.xpose.msra.mxu1 %v2599_v50 }
 0x380   : > { %v2415_v28 = vpop.f32.mrf.mxu0 }
 0x381   : > { %2166 = vmatmul.bf16.gmra.mxu3 %v1954_v43  ;;  %v2278_v44 = vpack.c.bf16 %v2232_v16, %v2231_v59  ;;  %v2416_v13 = vadd.f32 %v4345_v22, %v2415_v28 }
 0x382   : > { %v1839_v39 = vpop.f32.mrf.mxu2 }
 0x383   : > { %2454 = vmatmul.bf16.gmra.mxu0 %v2278_v44  ;;  %v1840_v63 = vadd.f32 %v4367_v19, %v1839_v39  ;;  %v2548_v52 = vmax.f32 %v2416_v13, 0.0 }
 0x384   : > { %v2127_v18 = vpop.f32.mrf.mxu3 }
 0x385   : > { %v2128_v23 = vadd.f32 %v4451_v49, %v2127_v18  ;;  %v1918_v34 = vmax.f32 %v1840_v63, 0.0 }
 0x387   : > { %2637 = vmatpush.bf16.xpose.msra.mxu1 %v4410_v3  ;;  %v2233_v5 = vmax.f32 %v2128_v23, 0.0 }
 0x388   : > { %v2417_v27 = vpop.f32.mrf.mxu0 }
 0x389   : > { %v2418_v10 = vadd.f32 %v4345_v22, %v2417_v27 }
 0x38a   : > { %v1841_v6 = vpop.f32.mrf.mxu2 }
 0x38b   : > { %v2549_v37 = vmax.f32 %v2418_v10, 0.0  ;;  %v1842_v31 = vadd.f32 %v4367_v19, %v1841_v6 }
 0x38c   : > { %v2129_v42 = vpop.f32.mrf.mxu3 }
 0x38d   : > { %v1919_v3 = vmax.f32 %v1842_v31, 0.0  ;;  %v2130_v14 = vadd.f32 %v4451_v49, %v2129_v42  ;;  %v4456_v60 = vpack.c.bf16 %v2549_v37, %v2548_v52 }
 0x38f   : > { %v1955_v20 = vpack.c.bf16 %v1919_v3, %v1918_v34  ;;  %v2234_v53 = vmax.f32 %v2130_v14, 0.0  ;;  %2638 = vmatpush.bf16.xpose.msra.mxu1 %v4398_v24 }
 0x390   : > { %v2420_v57 = vpop.f32.mrf.mxu0 }
 0x391   : > { %2171 = vmatmul.bf16.gmra.mxu3 %v1955_v20  ;;  %v2279_v26 = vpack.c.bf16 %v2234_v53, %v2233_v5  ;;  %v2421_v11 = vadd.f32 %v4345_v22, %v2420_v57 }
 0x392   : > { %v1844_v1 = vpop.f32.mrf.mxu2 }
 0x393   : > { %2459 = vmatmul.bf16.gmra.mxu0 %v2279_v26  ;;  %v1845_v36 = vadd.f32 %v4367_v19, %v1844_v1  ;;  %v2550_v54 = vmax.f32 %v2421_v11, 0.0 }
 0x394   : > { %v2132_v35 = vpop.f32.mrf.mxu3 }
 0x395   : > { %v2133_v17 = vadd.f32 %v4451_v49, %v2132_v35  ;;  %v1920_v8 = vmax.f32 %v1845_v36, 0.0 }
 0x397   : > { %2639 = vmatpush.bf16.xpose.msra.mxu1 %v4386_v29  ;;  %v2235_v29 = vmax.f32 %v2133_v17, 0.0 }
 0x398   : > { %v2422_v21 = vpop.f32.mrf.mxu0 }
 0x399   : > { %v2423_v55 = vadd.f32 %v4345_v22, %v2422_v21 }
 0x39a   : > { %v1846_v30 = vpop.f32.mrf.mxu2 }
 0x39b   : > { %v2551_v24 = vmax.f32 %v2423_v55, 0.0  ;;  %v1847_v25 = vadd.f32 %v4367_v19, %v1846_v30 }
 0x39c   : > { %v2134_v62 = vpop.f32.mrf.mxu3 }
 0x39d   : > { %v1921_v15 = vmax.f32 %v1847_v25, 0.0  ;;  %v2135_v0 = vadd.f32 %v4451_v49, %v2134_v62  ;;  %v4466_v51 = vpack.c.bf16 %v2551_v24, %v2550_v54 }
 0x39f   : > { %v1956_v45 = vpack.c.bf16 %v1921_v15, %v1920_v8  ;;  %v2236_v2 = vmax.f32 %v2135_v0, 0.0  ;;  %2640 = vmatpush.bf16.xpose.msra.mxu1 %v4374_v41 }
 0x3a0   : > { %v2425_v61 = vpop.f32.mrf.mxu0 }
 0x3a1   : > { %2176 = vmatmul.bf16.gmra.mxu3 %v1956_v45  ;;  %v2280_v40 = vpack.c.bf16 %v2236_v2, %v2235_v29  ;;  %v2426_v32 = vadd.f32 %v4345_v22, %v2425_v61 }
 0x3a2   : > { %v1849_v33 = vpop.f32.mrf.mxu2 }
 0x3a3   : > { %2464 = vmatmul.bf16.gmra.mxu0 %v2280_v40  ;;  %v1850_v48 = vadd.f32 %v4367_v19, %v1849_v33  ;;  %v2552_v50 = vmax.f32 %v2426_v32, 0.0 }
 0x3a4   : > { %v2137_v56 = vpop.f32.mrf.mxu3 }
 0x3a5   : > { %v2138_v7 = vadd.f32 %v4451_v49, %v2137_v56  ;;  %v1922_v59 = vmax.f32 %v1850_v48, 0.0 }
 0x3a7   : > { %2641 = vmatpush.bf16.xpose.msra.mxu1 %v4357_v12  ;;  %v2237_v12 = vmax.f32 %v2138_v7, 0.0 }
 0x3a8   : > { %v2427_v4 = vpop.f32.mrf.mxu0 }
 0x3a9   : > { %v2428_v58 = vadd.f32 %v4345_v22, %v2427_v4 }
 0x3aa   : > { %v1851_v38 = vpop.f32.mrf.mxu2 }
 0x3ab   : > { %v2553_v41 = vmax.f32 %v2428_v58, 0.0  ;;  %v1852_v46 = vadd.f32 %v4367_v19, %v1851_v38 }
 0x3ac   : > { %v2139_v9 = vpop.f32.mrf.mxu3 }
 0x3ad   : > { %v1923_v43 = vmax.f32 %v1852_v46, 0.0  ;;  %v2140_v16 = vadd.f32 %v4451_v49, %v2139_v9  ;;  %v4476_v28 = vpack.c.bf16 %v2553_v41, %v2552_v50 }
 0x3af   : > { %v1957_v44 = vpack.c.bf16 %v1923_v43, %v1922_v59  ;;  %v2238_v39 = vmax.f32 %v2140_v16, 0.0 }
 0x3b0   : > { %v2430_v18 = vpop.f32.mrf.mxu0 }
 0x3b1   : > { %2181 = vmatmul.bf16.gmra.mxu3 %v1957_v44  ;;  %v2281_v13 = vpack.c.bf16 %v2238_v39, %v2237_v12  ;;  %v2431_v10 = vadd.f32 %v4345_v22, %v2430_v18 }
 0x3b2   : > { %v1854_v27 = vpop.f32.mrf.mxu2 }
 0x3b3   : > { %2469 = vmatmul.bf16.gmra.mxu0 %v2281_v13  ;;  %v1855_v52 = vadd.f32 %v4367_v19, %v1854_v27  ;;  %v2554_v31 = vmax.f32 %v2431_v10, 0.0 }
 0x3b4   : > { %v2142_v63 = vpop.f32.mrf.mxu3 }
 0x3b5   : > { %v2143_v42 = vadd.f32 %v4451_v49, %v2142_v63  ;;  %v1924_v5 = vmax.f32 %v1855_v52, 0.0 }
 0x3b7   : > { %v2239_v26 = vmax.f32 %v2143_v42, 0.0 }
 0x3b8   : > { %v2432_v6 = vpop.f32.mrf.mxu0 }
 0x3b9   : > { %v2433_v23 = vadd.f32 %v4345_v22, %v2432_v6 }
 0x3ba   : > { %v1856_v37 = vpop.f32.mrf.mxu2 }
 0x3bb   : > { %v2555_v34 = vmax.f32 %v2433_v23, 0.0  ;;  %v1857_v3 = vadd.f32 %v4367_v19, %v1856_v37 }
 0x3bc   : > { %v2144_v14 = vpop.f32.mrf.mxu3 }
 0x3bd   : > { %v1925_v20 = vmax.f32 %v1857_v3, 0.0  ;;  %v2145_v53 = vadd.f32 %v4451_v49, %v2144_v14  ;;  %v4484_v57 = vpack.c.bf16 %v2555_v34, %v2554_v31 }
 0x3bf   : > { %v1958_v1 = vpack.c.bf16 %v1925_v20, %v1924_v5  ;;  %v2240_v35 = vmax.f32 %v2145_v53, 0.0 }
 0x3c0   : > { %v2435_v11 = vpop.f32.mrf.mxu0 }
 0x3c1   : > { %v2282_v21 = vpack.c.bf16 %v2240_v35, %v2239_v26  ;;  %2186 = vmatmul.bf16.gmra.mxu3 %v1958_v1  ;;  %v2436_v34 = vadd.f32 %v4345_v22, %v2435_v11 }
 0x3c2   : > { %v1859_v36 = vpop.f32.mrf.mxu2 }
 0x3c3   : > { %2474 = vmatmul.bf16.gmra.mxu0 %v2282_v21  ;;  %v1860_v54 = vadd.f32 %v4367_v19, %v1859_v36  ;;  %v2556_v53 = vmax.f32 %v2436_v34, 0.0 }
 0x3c4   : > { %v2147_v55 = vpop.f32.mrf.mxu3 }
 0x3c5   : > { %v2148_v24 = vadd.f32 %v4451_v49, %v2147_v55  ;;  %v1926_v8 = vmax.f32 %v1860_v54, 0.0 }
 0x3c7   : > { %v2241_v29 = vmax.f32 %v2148_v24, 0.0 }
 0x3c8   : > { %v2437_v30 = vpop.f32.mrf.mxu0 }
 0x3c9   : > { %v2438_v31 = vadd.f32 %v4345_v22, %v2437_v30 }
 0x3ca   : > { %v1861_v17 = vpop.f32.mrf.mxu2 }
 0x3cb   : > { %v1862_v25 = vadd.f32 %v4367_v19, %v1861_v17  ;;  %v2557_v5 = vmax.f32 %v2438_v31, 0.0 }
 0x3cc   : > { %v2149_v62 = vpop.f32.mrf.mxu3 }
 0x3cd   : > { %v1927_v15 = vmax.f32 %v1862_v25, 0.0  ;;  %v2150_v0 = vadd.f32 %v4451_v49, %v2149_v62  ;;  %v2607_v55 = vpack.c.bf16 %v2557_v5, %v2556_v53 }
 0x3cf   : > { %v1959_v45 = vpack.c.bf16 %v1927_v15, %v1926_v8  ;;  %v2242_v2 = vmax.f32 %v2150_v0, 0.0 }
 0x3d0   : > { %v2440_v61 = vpop.f32.mrf.mxu0 }
 0x3d1   : > { %v2283_v40 = vpack.c.bf16 %v2242_v2, %v2241_v29  ;;  %2191 = vmatmul.bf16.gmra.mxu3 %v1959_v45  ;;  %v2441_v13 = vadd.f32 %v4345_v22, %v2440_v61 }
 0x3d3   : > { %2479 = vmatmul.bf16.gmra.mxu0 %v2283_v40  ;;  %v2558_v23 = vmax.f32 %v2441_v13, 0.0 }
 0x3d4   : > { %v2152_v33 = vpop.f32.mrf.mxu3 }
 0x3d5   : > { %v2153_v32 = vadd.f32 %v4451_v49, %v2152_v33 }
 0x3d7   : > { %v2243_v19 = vmax.f32 %v2153_v32, 0.0 }
 0x3d8   : > { %v2442_v56 = vpop.f32.mrf.mxu0 }
 0x3d9   : > { %v2443_v44 = vadd.f32 %v4345_v22, %v2442_v56 }
 0x3db   : > { %v2559_v6 = vmax.f32 %v2443_v44, 0.0 }
 0x3dc   : > { %v2154_v4 = vpop.f32.mrf.mxu3 }
 0x3dd   : > { %v2155_v48 = vadd.f32 %v4451_v49, %v2154_v4  ;;  %v2608_v42 = vpack.c.bf16 %v2559_v6, %v2558_v23 }
 0x3df   : > { %v2244_v58 = vmax.f32 %v2155_v48, 0.0 }
 0x3e0   : > { %v2445_v38 = vpop.f32.mrf.mxu0 }
 0x3e1   : > { %v2284_v50 = vpack.c.bf16 %v2244_v58, %v2243_v19  ;;  %v2446_v41 = vadd.f32 %v4345_v22, %v2445_v38 }
 0x3e3   : > { %2484 = vmatmul.bf16.gmra.mxu0 %v2284_v50  ;;  %v2560_v59 = vmax.f32 %v2446_v41, 0.0 }
 0x3e4   : > { %v2157_v7 = vpop.f32.mrf.mxu3 }
 0x3e5   : > { %v2158_v43 = vadd.f32 %v4451_v49, %v2157_v7 }
 0x3e7   : > { %v2245_v27 = vmax.f32 %v2158_v43, 0.0 }
 0x3e8   : > { %v2447_v46 = vpop.f32.mrf.mxu0 }
 0x3e9   : > { %v2448_v9 = vadd.f32 %v4345_v22, %v2447_v46 }
 0x3eb   : > { %v2561_v16 = vmax.f32 %v2448_v9, 0.0 }
 0x3ec   : > { %v2159_v12 = vpop.f32.mrf.mxu3 }
 0x3ed   : > { %v2609_v39 = vpack.c.bf16 %v2561_v16, %v2560_v59  ;;  %v2160_v18 = vadd.f32 %v4451_v49, %v2159_v12 }
 0x3ef   : > { %v2246_v63 = vmax.f32 %v2160_v18, 0.0  ;;  %2647 = vmatpush.bf16.xpose.msra.mxu2 %v2609_v39 }
 0x3f0   : > { %v2450_v10 = vpop.f32.mrf.mxu0 }
 0x3f1   : > { %v2285_v52 = vpack.c.bf16 %v2246_v63, %v2245_v27  ;;  %v2451_v3 = vadd.f32 %v4345_v22, %v2450_v10 }
 0x3f3   : > { %2489 = vmatmul.bf16.gmra.mxu0 %v2285_v52  ;;  %v2562_v26 = vmax.f32 %v2451_v3, 0.0 }
 0x3f4   : > { %v2162_v37 = vpop.f32.mrf.mxu3 }
 0x3f5   : > { %v2163_v1 = vadd.f32 %v4451_v49, %v2162_v37 }
 0x3f7   : > { %2648 = vmatpush.bf16.xpose.msra.mxu2 %v2608_v42  ;;  %v2247_v54 = vmax.f32 %v2163_v1, 0.0 }
 0x3f8   : > { %v2452_v14 = vpop.f32.mrf.mxu0 }
 0x3f9   : > { %v2453_v20 = vadd.f32 %v4345_v22, %v2452_v14 }
 0x3fb   : > { %v2563_v35 = vmax.f32 %v2453_v20, 0.0 }
 0x3fc   : > { %v2164_v21 = vpop.f32.mrf.mxu3 }
 0x3fd   : > { %v2165_v36 = vadd.f32 %v4451_v49, %v2164_v21  ;;  %v4504_v30 = vpack.c.bf16 %v2563_v35, %v2562_v26 }
 0x3ff   : > { %v2248_v11 = vmax.f32 %v2165_v36, 0.0  ;;  %2649 = vmatpush.bf16.xpose.msra.mxu2 %v2607_v55 }
 0x400   : > { %v2455_v17 = vpop.f32.mrf.mxu0 }
 0x401   : > { %v2286_v24 = vpack.c.bf16 %v2248_v11, %v2247_v54  ;;  %v2456_v62 = vadd.f32 %v4345_v22, %v2455_v17 }
 0x403   : > { %2494 = vmatmul.bf16.gmra.mxu0 %v2286_v24  ;;  %v2564_v0 = vmax.f32 %v2456_v62, 0.0 }
 0x404   : > { %v2167_v25 = vpop.f32.mrf.mxu3 }
 0x405   : > { %v2168_v29 = vadd.f32 %v4451_v49, %v2167_v25 }
 0x407   : > { %2650 = vmatpush.bf16.xpose.msra.mxu2 %v4484_v57  ;;  %v2249_v33 = vmax.f32 %v2168_v29, 0.0 }
 0x408   : > { %v2457_v8 = vpop.f32.mrf.mxu0 }
 0x409   : > { %v2458_v15 = vadd.f32 %v4345_v22, %v2457_v8 }
 0x40b   : > { %v2565_v45 = vmax.f32 %v2458_v15, 0.0 }
 0x40c   : > { %v2169_v2 = vpop.f32.mrf.mxu3 }
 0x40d   : > { %v2170_v61 = vadd.f32 %v4451_v49, %v2169_v2  ;;  %v4511_v40 = vpack.c.bf16 %v2565_v45, %v2564_v0 }
 0x40f   : > { %v2250_v56 = vmax.f32 %v2170_v61, 0.0  ;;  %2651 = vmatpush.bf16.xpose.msra.mxu2 %v4476_v28 }
 0x410   : > { %v2460_v32 = vpop.f32.mrf.mxu0 }
 0x411   : > { %v2287_v4 = vpack.c.bf16 %v2250_v56, %v2249_v33  ;;  %v2461_v48 = vadd.f32 %v4345_v22, %v2460_v32 }
 0x413   : > { %2499 = vmatmul.bf16.gmra.mxu0 %v2287_v4  ;;  %v2566_v38 = vmax.f32 %v2461_v48, 0.0  ;;  %v4540_v4 = vld [vmem:[%s4617_s9] ss:$0 sm:$0xff] }
 0x414   : > { %v2172_v57 = vpop.f32.mrf.mxu3 }
 0x415   : > { %v2173_v50 = vadd.f32 %v4451_v49, %v2172_v57 }
 0x417   : > { %2652 = vmatpush.bf16.xpose.msra.mxu2 %v4466_v51  ;;  %v2251_v28 = vmax.f32 %v2173_v50, 0.0 }
 0x418   : > { %v2462_v19 = vpop.f32.mrf.mxu0 }
 0x419   : > { %v2463_v58 = vadd.f32 %v4345_v22, %v2462_v19 }
 0x41b   : > { %v2567_v7 = vmax.f32 %v2463_v58, 0.0 }
 0x41c   : > { %v2174_v41 = vpop.f32.mrf.mxu3 }
 0x41d   : > { %v2175_v46 = vadd.f32 %v4451_v49, %v2174_v41  ;;  %v4519_v9 = vpack.c.bf16 %v2567_v7, %v2566_v38 }
 0x41f   : > { %v2252_v59 = vmax.f32 %v2175_v46, 0.0  ;;  %2653 = vmatpush.bf16.xpose.msra.mxu2 %v4456_v60 }
 0x420   : > { %v2465_v43 = vpop.f32.mrf.mxu0 }
 0x421   : > { %v2288_v16 = vpack.c.bf16 %v2252_v59, %v2251_v28  ;;  %v2466_v12 = vadd.f32 %v4345_v22, %v2465_v43 }
 0x423   : > { %2504 = vmatmul.bf16.gmra.mxu0 %v2288_v16  ;;  %v2568_v18 = vmax.f32 %v2466_v12, 0.0 }
 0x424   : > { %v2177_v51 = vpop.f32.mrf.mxu3 }
 0x425   : > { %v2178_v13 = vadd.f32 %v4451_v49, %v2177_v51 }
 0x427   : > { %2654 = vmatpush.bf16.xpose.msra.mxu2 %v4442_v47  ;;  %v2253_v60 = vmax.f32 %v2178_v13, 0.0 }
 0x428   : > { %v2467_v44 = vpop.f32.mrf.mxu0 }
 0x429   : > { %v2468_v39 = vadd.f32 %v4345_v22, %v2467_v44 }
 0x42b   : > { %v2569_v27 = vmax.f32 %v2468_v39, 0.0 }
 0x42c   : > { %v2179_v63 = vpop.f32.mrf.mxu3 }
 0x42d   : > { %v2180_v10 = vadd.f32 %v4451_v49, %v2179_v63  ;;  %v4527_v6 = vpack.c.bf16 %v2569_v27, %v2568_v18 }
 0x42f   : > { %v2254_v52 = vmax.f32 %v2180_v10, 0.0 }
 0x430   : > { %v2470_v23 = vpop.f32.mrf.mxu0 }
 0x431   : > { %v2289_v37 = vpack.c.bf16 %v2254_v52, %v2253_v60  ;;  %v2471_v47 = vadd.f32 %v4345_v22, %v2470_v23 }
 0x433   : > { %2509 = vmatmul.bf16.gmra.mxu0 %v2289_v37  ;;  %v2570_v3 = vmax.f32 %v2471_v47, 0.0 }
 0x434   : > { %v2182_v31 = vpop.f32.mrf.mxu3 }
 0x435   : > { %v2183_v14 = vadd.f32 %v4451_v49, %v2182_v31 }
 0x437   : > { %v2255_v1 = vmax.f32 %v2183_v14, 0.0 }
 0x438   : > { %v2472_v42 = vpop.f32.mrf.mxu0 }
 0x439   : > { %v2473_v34 = vadd.f32 %v4345_v22, %v2472_v42 }
 0x43b   : > { %v2571_v5 = vmax.f32 %v2473_v34, 0.0 }
 0x43c   : > { %v2184_v20 = vpop.f32.mrf.mxu3 }
 0x43d   : > { %v2614_v53 = vpack.c.bf16 %v2571_v5, %v2570_v3  ;;  %v2185_v26 = vadd.f32 %v4451_v49, %v2184_v20 }
 0x43f   : > { %v2256_v35 = vmax.f32 %v2185_v26, 0.0 }
 0x440   : > { %v2475_v21 = vpop.f32.mrf.mxu0 }
 0x441   : > { %v2290_v36 = vpack.c.bf16 %v2256_v35, %v2255_v1  ;;  %v2476_v16 = vadd.f32 %v4540_v4, %v2475_v21 }
 0x443   : > { %2514 = vmatmul.bf16.gmra.mxu0 %v2290_v36  ;;  %v2572_v18 = vmax.f32 %v2476_v16, 0.0 }
 0x444   : > { %v2187_v55 = vpop.f32.mrf.mxu3 }
 0x445   : > { %v2188_v11 = vadd.f32 %v4451_v49, %v2187_v55 }
 0x447   : > { %v2257_v24 = vmax.f32 %v2188_v11, 0.0 }
 0x448   : > { %v2477_v54 = vpop.f32.mrf.mxu0 }
 0x449   : > { %v2478_v59 = vadd.f32 %v4540_v4, %v2477_v54 }
 0x44b   : > { %v2573_v44 = vmax.f32 %v2478_v59, 0.0  ;;  %v2627_v59 = vld [vmem:[#allocation2] sm:$0x1] }
 0x44c   : > { %v2189_v17 = vpop.f32.mrf.mxu3 }
 0x44d   : > { %v2190_v22 = vadd.f32 %v4451_v49, %v2189_v17  ;;  %v2615_v63 = vpack.c.bf16 %v2573_v44, %v2572_v18 }
 0x44f   : > { %v2258_v25 = vmax.f32 %v2190_v22, 0.0 }
 0x450   : > { %v2480_v62 = vpop.f32.mrf.mxu0 }
 0x451   : > { %v2291_v8 = vpack.c.bf16 %v2258_v25, %v2257_v24  ;;  %v2481_v7 = vadd.f32 %v4540_v4, %v2480_v62 }
 0x453   : > { %2519 = vmatmul.bf16.gmra.mxu0 %v2291_v8  ;;  %v2574_v28 = vmax.f32 %v2481_v7, 0.0 }
 0x454   : > { %v2192_v15 = vpop.f32.mrf.mxu3 }
 0x455   : > { %v2193_v29 = vadd.f32 %v4451_v49, %v2192_v15 }
 0x457   : > { %v2259_v61 = vmax.f32 %v2193_v29, 0.0 }
 0x458   : > { %v2482_v0 = vpop.f32.mrf.mxu0 }
 0x459   : > { %v2483_v50 = vadd.f32 %v4540_v4, %v2482_v0 }
 0x45b   : > { %v2575_v46 = vmax.f32 %v2483_v50, 0.0 }
 0x45c   : > { %v2194_v45 = vpop.f32.mrf.mxu3 }
 0x45d   : > { %v2195_v2 = vadd.f32 %v4451_v49, %v2194_v45  ;;  %v2616_v43 = vpack.c.bf16 %v2575_v46, %v2574_v28  ;;  %v3496_v28 = vmov 0  }
 0x45e   : > { %3215 = vset.pattern.permute.xlu0 %v3496_v28 }
 0x45f   : > { %v2260_v33 = vmax.f32 %v2195_v2, 0.0  ;;  %2630 = vperm.xlu0 %3215, %v2627_v59  }
 0x460   : > { %v2485_v56 = vpop.f32.mrf.mxu0 }
 0x461   : > { %v2292_v32 = vpack.c.bf16 %v2260_v33, %v2259_v61  ;;  %v2486_v57 = vadd.f32 %v4540_v4, %v2485_v56 }
 0x463   : > { %2524 = vmatmul.bf16.gmra.mxu0 %v2292_v32  ;;  %v2576_v58 = vmax.f32 %v2486_v57, 0.0 }
 0x468   : > { %v2487_v48 = vpop.f32.mrf.mxu0 }
 0x469   : > { %v2488_v19 = vadd.f32 %v4540_v4, %v2487_v48 }
 0x46b   : > { %v2577_v38 = vmax.f32 %v2488_v19, 0.0 }
 0x46d   : > { %v2617_v49 = vpack.c.bf16 %v2577_v38, %v2576_v58  ;;  %v2626_v58 = vld [vmem:[%s4618_s10] sm:$0x1] }
 0x46e   : > { %2642 = vmatmul.bf16.vlgmr.msra.gmra.mxu1 %v2626_v58  ;;  %2655 = vmatmul.bf16.vlgmr.msra.gmra.mxu2 %v2626_v58 }
 0x46f   : > { %2660 = vmatpush.bf16.xpose.msra.mxu3 %v2617_v49 }
 0x470   : > { %v2490_v41 = vpop.f32.mrf.mxu0 }
 0x471   : > { %v2491_v51 = vadd.f32 %v4540_v4, %v2490_v41 }
 0x473   : > { %v2578_v13 = vmax.f32 %v2491_v51, 0.0 }
 0x477   : > { %2661 = vmatpush.bf16.xpose.msra.mxu3 %v2616_v43 }
 0x478   : > { %v2492_v12 = vpop.f32.mrf.mxu0 }
 0x479   : > { %v2493_v39 = vadd.f32 %v4540_v4, %v2492_v12 }
 0x47b   : > { %v2579_v27 = vmax.f32 %v2493_v39, 0.0 }
 0x47d   : > { %v4550_v10 = vpack.c.bf16 %v2579_v27, %v2578_v13 }
 0x47f   : > { %2662 = vmatpush.bf16.xpose.msra.mxu3 %v2615_v63 }
 0x480   : > { %v2495_v60 = vpop.f32.mrf.mxu0 }
 0x481   : > { %v2496_v52 = vadd.f32 %v4540_v4, %v2495_v60 }
 0x483   : > { %v2580_v31 = vmax.f32 %v2496_v52, 0.0 }
 0x487   : > { %2663 = vmatpush.bf16.xpose.msra.mxu3 %v2614_v53 }
 0x488   : > { %v2497_v23 = vpop.f32.mrf.mxu0 }
 0x489   : > { %v2498_v37 = vadd.f32 %v4540_v4, %v2497_v23 }
 0x48b   : > { %v2581_v47 = vmax.f32 %v2498_v37, 0.0 }
 0x48d   : > { %v2619_v42 = vpack.c.bf16 %v2581_v47, %v2580_v31 }
 0x48f   : > { %2664 = vmatpush.bf16.xpose.msra.mxu3 %v4527_v6 }
 0x490   : > { %v2500_v34 = vpop.f32.mrf.mxu0 }
 0x491   : > { %v2501_v3 = vadd.f32 %v4540_v4, %v2500_v34 }
 0x493   : > { %v2582_v20 = vmax.f32 %v2501_v3, 0.0 }
 0x497   : > { %2665 = vmatpush.bf16.xpose.msra.mxu3 %v4519_v9 }
 0x498   : > { %v2502_v14 = vpop.f32.mrf.mxu0 }
 0x499   : > { %v2503_v5 = vadd.f32 %v4540_v4, %v2502_v14 }
 0x49b   : > { %v2583_v26 = vmax.f32 %v2503_v5, 0.0 }
 0x49d   : > { %v2620_v1 = vpack.c.bf16 %v2583_v26, %v2582_v20 }
 0x49f   : > { %2666 = vmatpush.bf16.xpose.msra.mxu3 %v4511_v40 }
 0x4a0   : > { %v2505_v53 = vpop.f32.mrf.mxu0 }
 0x4a1   : > { %v2506_v35 = vadd.f32 %v4540_v4, %v2505_v53 }
 0x4a3   : > { %v2584_v36 = vmax.f32 %v2506_v35, 0.0 }
 0x4a7   : > { %2667 = vmatpush.bf16.xpose.msra.mxu3 %v4504_v30 }
 0x4a8   : > { %v2507_v21 = vpop.f32.mrf.mxu0 }
 0x4a9   : > { %v2508_v6 = vadd.f32 %v4540_v4, %v2507_v21 }
 0x4ab   : > { %v2585_v55 = vmax.f32 %v2508_v6, 0.0 }
 0x4ad   : > { %v2621_v54 = vpack.c.bf16 %v2585_v55, %v2584_v36 }
 0x4ae   : > { %2668 = vmatmul.bf16.vlgmr.msra.gmra.mxu3 %v2626_v58 }
 0x4b0   : > { %v2510_v9 = vpop.f32.mrf.mxu0 }
 0x4b1   : > { %v2511_v11 = vadd.f32 %v4540_v4, %v2510_v9 }
 0x4b3   : > { %v2586_v24 = vmax.f32 %v2511_v11, 0.0 }
 0x4b8   : > { %v2512_v17 = vpop.f32.mrf.mxu0 }
 0x4b9   : > { %v2513_v22 = vadd.f32 %v4540_v4, %v2512_v17 }
 0x4bb   : > { %v2587_v25 = vmax.f32 %v2513_v22, 0.0 }
 0x4bd   : > { %v2622_v40 = vpack.c.bf16 %v2587_v25, %v2586_v24 }
 0x4c0   : > { %v2515_v62 = vpop.f32.mrf.mxu0 }
 0x4c1   : > { %v2516_v49 = vadd.f32 %v4540_v4, %v2515_v62 }
 0x4c3   : > { %v2588_v41 = vmax.f32 %v2516_v49, 0.0 }
 0x4c8   : > { %v2517_v8 = vpop.f32.mrf.mxu0 }
 0x4c9   : > { %v2518_v38 = vadd.f32 %v4540_v4, %v2517_v8 }
 0x4cb   : > { %v2589_v7 = vmax.f32 %v2518_v38, 0.0 }
 0x4cd   : > { %v2623_v46 = vpack.c.bf16 %v2589_v7, %v2588_v41 }
 0x4d0   : > { %v2520_v15 = vpop.f32.mrf.mxu0 }
 0x4d1   : > { %v2521_v57 = vadd.f32 %v4540_v4, %v2520_v15  ;;  %v2631_v39 = vpop.permute.xlu0 %2630 }
 0x4d2   : > { %v2633_v18 = vperm.slane %v2631_v39, 0 }
 0x4d3   : > { %v2590_v19 = vmax.f32 %v2521_v57, 0.0 }
 0x4d8   : > { %v2522_v0 = vpop.f32.mrf.mxu0 }
 0x4d9   : > { %v2523_v56 = vadd.f32 %v4540_v4, %v2522_v0 }
 0x4db   : > { %v2591_v48 = vmax.f32 %v2523_v56, 0.0 }
 0x4dd   : > { %v2624_v50 = vpack.c.bf16 %v2591_v48, %v2590_v19 }
 0x4e0   : > { %v2525_v30 = vpop.f32.mrf.mxu0 }
 0x4e1   : > { %v2526_v29 = vadd.f32 %v4540_v4, %v2525_v30 }
 0x4e3   : > { %v2592_v61 = vmax.f32 %v2526_v29, 0.0 }
 0x4e8   : > { %v2527_v45 = vpop.f32.mrf.mxu0 }
 0x4e9   : > { %v2528_v2 = vadd.f32 %v4540_v4, %v2527_v45 }
 0x4eb   : > { %v2593_v33 = vmax.f32 %v2528_v2, 0.0  ;;  %v2643_v43 = vpop.f32.mrf.mxu1 }
 0x4ec   : > { %v2644_v13 = vadd.f32 %v2643_v43, %v2633_v18 }
 0x4ed   : > { %v2625_v32 = vpack.c.bf16 %v2593_v33, %v2592_v61 }
 0x4ef   : > { %2673 = vmatpush.bf16.xpose.msrb.mxu1 %v2625_v32 }
 0x4f1   : > { %v2656_v4 = vpop.f32.mrf.mxu2 }
 0x4f2   : > { %v2657_v63 = vadd.f32 %v2656_v4, %v2633_v18 }
 0x4f3   : > { %v2645_v51 = vpop.f32.mrf.mxu1 }
 0x4f7   : > { %2674 = vmatpush.bf16.xpose.msrb.mxu1 %v2624_v50 }
 0x4f9   : > { %v2658_v12 = vpop.f32.mrf.mxu2 }
 0x4ff   : > { %2675 = vmatpush.bf16.xpose.msrb.mxu1 %v2623_v46 }
 0x507   : > { %2676 = vmatpush.bf16.xpose.msrb.mxu1 %v2622_v40 }
 0x50f   : > { %2677 = vmatpush.bf16.xpose.msrb.mxu1 %v2621_v54 }
 0x517   : > { %2678 = vmatpush.bf16.xpose.msrb.mxu1 %v2620_v1 }
 0x51f   : > { %2679 = vmatpush.bf16.xpose.msrb.mxu1 %v2619_v42 }
 0x527   : > { %2680 = vmatpush.bf16.xpose.msrb.mxu1 %v4550_v10 }
 0x52e   : > { %2681 = vmatmul.bf16.vlgmr.msrb.gmra.mxu1 %v2626_v58 }
 0x531   : > { %v2669_v16 = vpop.f32.mrf.mxu3 }
 0x532   : > { %v2670_v27 = vadd.f32 %v2669_v16, %v2633_v18 }
 0x534   : > { %v2686_v23 = vsub.f32 %v2644_v13, %v2670_v27  ;;  %v2690_v37 = vrot.slane %v2670_v27, 7 }
 0x536   : > { %v2696_v34 = vrot.slane %v2686_v23, 6  ;;  %v2701_v3 = vsel %vm2700_vm0, %v2644_v13, %v2690_v37 }
 0x538   : > { %v2704_v26 = vsel %vm2703_vm1, %v2701_v3, %v2696_v34 }
 0x539   : > { %v2671_v44 = vpop.f32.mrf.mxu3 }
 0x5ab   : > { %v2682_v60 = vpop.f32.mrf.mxu1 }
 0x5ac   : > { %v2683_v52 = vadd.f32 %v2682_v60, %v2633_v18 }
 0x5ae   : > { %v2687_v31 = vsub.f32 %v2657_v63, %v2683_v52  ;;  %v2691_v10 = vrot.slane %v2683_v52, 7 }
 0x5b0   : > { %v2697_v47 = vrot.slane %v2687_v31, 6  ;;  %v2702_v42 = vsel %vm2700_vm0, %v2657_v63, %v2691_v10 }
 0x5b2   : > { %v2705_v14 = vsel %vm2703_vm1, %v2702_v42, %v2697_v47 }
 0x5b3   : > { %v2708_v5 = vrot.slane %v2705_v14, 4  ;;  %v2684_v20 = vpop.f32.mrf.mxu1 }
 0x5b5   : > { %v2710_v1 = vsel %vm2709_vm2, %v2704_v26, %v2708_v5 }
 0x5b6   : > { %2712 = vst [vmem:[%s545_s6] sm:$0x77] %v2710_v1 }
 0x5b7   : > { %3431 = shalt.err (!%p3428_p9)
}
 0x5b8   : > { %3138 = dma.vmem_to_hbm [thread:$0]  (%p3649_p3), %s2728_s8, 128, %s2730_s11, %s2714_s30  }
 0x5b9 PF: > { %s4689_s21 = sld [smem:[#allocation21_spill]]  ;;  %p4691_p12 = scmp.ge.s32.totalorder %s3486_s26, 2 }
 0x5bb   : > { %p3161_p13 = pnand %p4691_p12, %p3600_p6 }
 0x5bd   : > { %p3162_p0 = pneg %p3161_p13 }
 0x5bf   : > { %s2741_s22 = sand.u32 1, %s4689_s21  }
 0x5c0   : > { %s2742_s0 = scalar_lea.sflag [#allocation5], %s2741_s22 }
 0x5c1   : > { %3469 = dma.done.wait (%p3162_p0), %s2742_s0, 128  }
 0x5c2   : > { %3471 = vsyncadd (%p3162_p0), %s2742_s0, 4294967168  ;;  %s4692_s26 = sld [smem:[#allocation24_spill]]  ;;  %s4695_s23 = smov %s3478_s24 }
 0x5c3   : > { %s4693_s4 = sld [smem:[#allocation22_spill]] }
 0x5c4   : > { %s4694_s25 = sld [smem:[#allocation25_spill]] }
 0x5c8   : > { %p32_p5 = scmp.ge.s32.totalorder %s4692_s26, 4  }
 0x5c9   : > { %s4696_s24 = smov %s4693_s4 }
 0x5ca   :  { %34 = sbr.rel (!%p32_p5) target bundleno = 15 (0xf), region = 142 }
 0x5cf   :  { %2748 = vsyncpa [#allocation4], 1 }
 0x5d0   :  { %2750 = vsyncpa [#allocation4 + $0x1], 1 }
 0x5d1   :  { %2751 = vsyncpa [#allocation7], 1 }
 0x5d2   :  { %2753 = vsyncpa [#allocation7 + $0x1], 1 }
 0x5d3   :  { %2754 = vsyncpa [#allocation10], 1 }
 0x5d4   :  { %2755 = vsyncpa [#allocation13], 1 }
 0x5d5   :  { %2756 = vsyncpa [#allocation5], 1 }
 0x5d6   :  { %2758 = vsyncpa [#allocation5 + $0x1], 1 }

</bundles_post_ra>
